<compile_context>
chip_gen: v6e
topology: v6e:2x2x1
jax: 0.10.0
libtpu: 0.0.40
codegen_flags: <defaults>
</compile_context>

<pallas_src>
import math
import functools

import numpy as np
import jax
import jax.numpy as jnp
from jax import lax
from jax.experimental import pallas as pl
from jax.experimental.pallas import tpu as pltpu


# ----------------------------------------------------------------------------
# Config (small shapes consistent with the module)
# ----------------------------------------------------------------------------
BATCH = 2
CHW = (4, 16, 16)          # (C, H, W)
N_PATCHES = 4              # -> 16 patches, patch_size 4
N_BLOCKS = 2
HIDDEN = 32
N_HEADS = 2
MLP_RATIO = 4

C, H, W = CHW
PATCH = H // N_PATCHES
N_TOKENS = N_PATCHES * N_PATCHES          # 16 patches per image
SEQ = N_TOKENS + 1                        # 17 real tokens (+ class token)
SEQ_PAD = 24                              # padded to a multiple of 8 sublanes
CLS_ROW = N_TOKENS                        # class token lives at 8-aligned row 16
D_IN = C * PATCH * PATCH                  # 64
D_HEAD = HIDDEN // N_HEADS                # 16
D_MLP = MLP_RATIO * HIDDEN                # 128
LN_EPS = 1e-5
NEG_INF = -1e30                           # finite mask value (keeps pad rows finite)


# ----------------------------------------------------------------------------
# Helpers (plain JAX / numpy glue, outside the kernel)
# ----------------------------------------------------------------------------
def get_positional_embeddings(sequence_length, d):
    # exact same formula as the PyTorch reference
    result = np.ones((sequence_length, d), dtype=np.float32)
    for i in range(sequence_length):
        for j in range(d):
            if j % 2 == 0:
                result[i, j] = np.sin(i / 10000 ** (j / d))
            else:
                result[i, j] = np.cos(i / 10000 ** ((j - 1) / d))
    return jnp.asarray(result)


def patchify(images, n_patches):
    # images: (N, C, H, W) -> (N, n_patches^2, C*ps*ps), flatten order = (C, row, col)
    n, c, h, w = images.shape
    ps = h // n_patches
    x = images.reshape(n, c, n_patches, ps, n_patches, ps)
    x = x.transpose(0, 2, 4, 1, 3, 5)                     # (n, pi, pj, c, ps, ps)
    return x.reshape(n, n_patches * n_patches, c * ps * ps)


def _erf(x):
    # Exact-GELU uses erf; Mosaic has no erf primitive, so use the
    # Abramowitz & Stegun 7.1.26 rational approximation (|err| < 1.5e-7).
    a1, a2, a3, a4, a5 = 0.254829592, -0.284496736, 1.421413741, -1.453152027, 1.061405429
    p = 0.3275911
    ax = jnp.abs(x)
    t = 1.0 / (1.0 + p * ax)
    poly = ((((a5 * t + a4) * t + a3) * t + a2) * t + a1) * t
    y = 1.0 - poly * jnp.exp(-ax * ax)
    return jnp.where(x >= 0, y, -y)


def _block_diag(mats):
    # host-side helper: list of (dh, dh) -> (nh*dh, nh*dh) block-diagonal
    nh = len(mats)
    dh = mats[0].shape[0]
    rows = []
    for i in range(nh):
        row = [mats[i] if j == i else jnp.zeros((dh, dh), jnp.float32) for j in range(nh)]
        rows.append(jnp.concatenate(row, axis=1))
    return jnp.concatenate(rows, axis=0)


# ----------------------------------------------------------------------------
# Fused ViT forward kernel (single invocation, everything VMEM-resident)
# ----------------------------------------------------------------------------
def _vit_fused_kernel(
    p_ref, mw_ref, bias_ref, vec_ref, wqkv_ref, w1_ref, w2_ref, o_ref,
    *, n, seq_pad, n_real, d, n_heads, d_head, d_mlp, n_blocks,
):
    f32 = jnp.float32
    inv_sqrt2 = 1.0 / math.sqrt(2.0)

    # --- patch embedding + token/pos/class bias (layout pre-built outside):
    #     x: (n*seq_pad, d); patch rows b*24+0..15, class row b*24+16,
    #     pad rows b*24+17..23 are exactly zero.
    x = jnp.dot(p_ref[...], mw_ref[...], preferred_element_type=f32) + bias_ref[...]

    # key-padding mask: 0 for real key rows (< n_real), NEG_INF for pad rows.
    key_idx = lax.broadcasted_iota(jnp.int32, (1, seq_pad), 1)
    key_mask = jnp.where(key_idx < n_real, 0.0, NEG_INF).astype(f32)   # (1, seq_pad)

    def layernorm(y, gamma, beta):
        mu = jnp.mean(y, axis=-1, keepdims=True)
        yc = y - mu
        var = jnp.mean(yc * yc, axis=-1, keepdims=True)
        return yc * lax.rsqrt(var + LN_EPS) * gamma + beta

    # --- encoder blocks: static unroll, stacked weights indexed per block ---
    for bi in range(n_blocks):
        vec = vec_ref[bi]                       # (8, 128) packed per-block vectors
        ln1w = vec[0:1, 0:d]
        ln1b = vec[1:2, 0:d]
        ln2w = vec[2:3, 0:d]
        ln2b = vec[3:4, 0:d]
        b2 = vec[4:5, 0:d]
        bqkv = vec[5:6, 0:3 * d]
        b1 = vec[6:7, 0:d_mlp]

        xn = layernorm(x, ln1w, ln1b)

        # fused block-diagonal Q/K/V projection for all heads + whole batch;
        # 1/sqrt(d_head) is pre-folded into the Q columns of wqkv.
        qkv = jnp.dot(xn, wqkv_ref[bi], preferred_element_type=f32) + bqkv
        q = qkv[:, 0 * d:1 * d]
        k = qkv[:, 1 * d:2 * d]
        v = qkv[:, 2 * d:3 * d]

        # softmax attention, static unroll over (image, head) — batch items
        # never mix; head outputs land contiguously (== torch.hstack order).
        seq_outs = []
        for b in range(n):
            r0 = b * seq_pad
            head_outs = []
            for hh in range(n_heads):
                c0 = hh * d_head
                qh = q[r0:r0 + seq_pad, c0:c0 + d_head]
                kh = k[r0:r0 + seq_pad, c0:c0 + d_head]
                vh = v[r0:r0 + seq_pad, c0:c0 + d_head]
                # q @ k^T without materializing a transpose (contract dim 1 of both)
                s = lax.dot_general(qh, kh, dimension_numbers=(((1,), (1,)), ((), ())),
                                    preferred_element_type=f32)        # (seq_pad, seq_pad)
                s = s + key_mask                                       # mask pad keys
                s = s - jnp.max(s, axis=-1, keepdims=True)             # stable softmax
                e = jnp.exp(s)
                denom = jnp.sum(e, axis=-1, keepdims=True)
                a = e * pl.reciprocal(denom, approx=True)
                head_outs.append(jnp.dot(a, vh, preferred_element_type=f32))
            seq_outs.append(jnp.concatenate(head_outs, axis=-1))        # (seq_pad, d)
        mhsa = jnp.concatenate(seq_outs, axis=0)                        # (n*seq_pad, d)

        h1 = x + mhsa                                                   # residual 1

        hn = layernorm(h1, ln2w, ln2b)

        # MLP: Linear -> GELU (exact, erf-based as nn.GELU default) -> Linear
        m = jnp.dot(hn, w1_ref[bi], preferred_element_type=f32) + b1
        g = 0.5 * m * (1.0 + _erf(m * inv_sqrt2))
        x = h1 + jnp.dot(g, w2_ref[bi], preferred_element_type=f32) + b2

    # --- write back only the class-token rows (8-aligned rows 16, 40) -> (n, d)
    o_ref[...] = jnp.concatenate(
        [x[b * seq_pad + (n_real - 1): b * seq_pad + n_real, :] for b in range(n)],
        axis=0)


def vit_forward(images, params):
    n = images.shape[0]

    # Wrapper-side layout glue (plain JAX): padded-sequence patch matrix.
    patches = patchify(images, N_PATCHES)                               # (n, 16, 64)
    padded = jnp.zeros((n, SEQ_PAD, D_IN), jnp.float32)
    padded = padded.at[:, :N_TOKENS, :].set(patches)                    # pad+class rows = 0
    patches_padded = padded.reshape(n * SEQ_PAD, D_IN)                  # (n*24, 64)

    # Per-image bias (map_b + pos_emb on patch rows, class_token + pos_emb[0]
    # on class row, zeros on pad rows), tiled over the batch.
    tok_bias = jnp.tile(params["bias_img"], (n, 1))                     # (n*24, 32)

    kernel = functools.partial(
        _vit_fused_kernel, n=n, seq_pad=SEQ_PAD, n_real=SEQ, d=HIDDEN,
        n_heads=N_HEADS, d_head=D_HEAD, d_mlp=D_MLP, n_blocks=N_BLOCKS)

    args = (
        patches_padded, params["map_w"], tok_bias,
        params["vecs"], params["w_qkv"], params["w1"], params["w2"],
    )
    vmem = pltpu.MemorySpace.VMEM
    return pl.pallas_call(
        kernel,
        out_shape=jax.ShapeDtypeStruct((n, HIDDEN), jnp.float32),
        in_specs=[pl.BlockSpec(memory_space=vmem) for _ in args],
        out_specs=pl.BlockSpec(memory_space=vmem),
    )(*args)


# ----------------------------------------------------------------------------
# Parameter init (deterministic, synthetic) — produces the fused/packed form
# ----------------------------------------------------------------------------
def _init_linear(key, din, dout):
    kw, kb = jax.random.split(key)
    lim = 1.0 / math.sqrt(din)
    w = jax.random.uniform(kw, (din, dout), jnp.float32, -lim, lim)
    b = jax.random.uniform(kb, (1, dout), jnp.float32, -lim, lim)
    return w, b


def init_vit_params(key):
    keys = jax.random.split(key, 2 + N_BLOCKS)
    map_w, map_b = _init_linear(keys[0], D_IN, HIDDEN)
    class_token = jax.random.uniform(keys[1], (1, HIDDEN), jnp.float32)  # torch.rand
    pos_emb = get_positional_embeddings(SEQ, HIDDEN)
    scale = 1.0 / math.sqrt(D_HEAD)

    # Per-image token bias in the padded, class-at-row-16 layout:
    #   rows 0..15  : map_b + pos_emb[1:]   (patch tokens)
    #   row  16     : class_token + pos_emb[0]
    #   rows 17..23 : 0 (padding)
    bias_img = jnp.zeros((SEQ_PAD, HIDDEN), jnp.float32)
    bias_img = bias_img.at[:N_TOKENS, :].set(pos_emb[1:] + map_b)
    bias_img = bias_img.at[CLS_ROW:CLS_ROW + 1, :].set(class_token + pos_emb[0:1])

    w_qkv, w1s, w2s, vecs = [], [], [], []
    for bi in range(N_BLOCKS):
        bkeys = jax.random.split(keys[2 + bi], 3 * N_HEADS + 2)
        wq, bq, wk, bk, wv, bv = [], [], [], [], [], []
        for hh in range(N_HEADS):
            w_, b_ = _init_linear(bkeys[3 * hh + 0], D_HEAD, D_HEAD); wq.append(w_); bq.append(b_)
            w_, b_ = _init_linear(bkeys[3 * hh + 1], D_HEAD, D_HEAD); wk.append(w_); bk.append(b_)
            w_, b_ = _init_linear(bkeys[3 * hh + 2], D_HEAD, D_HEAD); wv.append(w_); bv.append(b_)
        # Block-diagonal fused QKV weight: one (D, 3D) matmul reproduces the
        # per-head nn.Linear Q/K/V projections exactly; softmax scale folded
        # into the Q columns (host-side parameter prep, zero kernel cost).
        wq_bd = _block_diag(wq) * scale
        wk_bd = _block_diag(wk)
        wv_bd = _block_diag(wv)
        b_qkv = jnp.concatenate(
            [jnp.concatenate(bq, axis=1) * scale,
             jnp.concatenate(bk, axis=1),
             jnp.concatenate(bv, axis=1)], axis=1)                      # (1, 3D)
        w_qkv.append(jnp.concatenate([wq_bd, wk_bd, wv_bd], axis=1))    # (D, 3D)

        w1_, b1_ = _init_linear(bkeys[3 * N_HEADS + 0], HIDDEN, D_MLP)
        w2_, b2_ = _init_linear(bkeys[3 * N_HEADS + 1], D_MLP, HIDDEN)
        w1s.append(w1_); w2s.append(w2_)

        # Pack all per-block small vectors into one (8, 128) slab:
        #   row 0: ln1 gamma   row 1: ln1 beta
        #   row 2: ln2 gamma   row 3: ln2 beta
        #   row 4: mlp bias2   row 5: fused qkv bias   row 6: mlp bias1
        vec = jnp.zeros((8, 128), jnp.float32)
        vec = vec.at[0, :HIDDEN].set(jnp.ones((HIDDEN,), jnp.float32))  # ln1 gamma
        vec = vec.at[2, :HIDDEN].set(jnp.ones((HIDDEN,), jnp.float32))  # ln2 gamma
        vec = vec.at[4, :HIDDEN].set(b2_[0])
        vec = vec.at[5, :3 * HIDDEN].set(b_qkv[0])
        vec = vec.at[6, :D_MLP].set(b1_[0])
        vecs.append(vec)

    return dict(
        map_w=map_w,
        bias_img=bias_img,                     # (SEQ_PAD, D) per-image bias
        vecs=jnp.stack(vecs),                  # (N_BLOCKS, 8, 128)
        w_qkv=jnp.stack(w_qkv),                # (N_BLOCKS, D, 3D)
        w1=jnp.stack(w1s),                     # (N_BLOCKS, D, D_MLP)
        w2=jnp.stack(w2s),                     # (N_BLOCKS, D_MLP, D)
    )


# ----------------------------------------------------------------------------
if __name__ == "__main__":
    key = jax.random.PRNGKey(0)
    k_img, k_par = jax.random.split(key)
    images = jax.random.normal(k_img, (BATCH, C, H, W), dtype=jnp.float32)
    params = init_vit_params(k_par)

    fwd = jax.jit(vit_forward)
    out = jax.block_until_ready(fwd(images, params))
    assert out.shape == (BATCH, HIDDEN), out.shape
    assert out.dtype == jnp.float32
    assert bool(jnp.all(jnp.isfinite(out)))
    print("KERNEL_OK")
</pallas_src>

<mosaic_0001>
module attributes {stable_mosaic.version = 11 : i64} {
  func.func @_vit_fused_kernel(%arg0: memref<48x64xf32, #tpu.memory_space<vmem>>, %arg1: memref<64x32xf32, #tpu.memory_space<vmem>>, %arg2: memref<48x32xf32, #tpu.memory_space<vmem>>, %arg3: memref<2x8x128xf32, #tpu.memory_space<vmem>>, %arg4: memref<2x32x96xf32, #tpu.memory_space<vmem>>, %arg5: memref<2x32x128xf32, #tpu.memory_space<vmem>>, %arg6: memref<2x128x32xf32, #tpu.memory_space<vmem>>, %arg7: memref<2x32xf32, #tpu.memory_space<vmem>>) attributes {dimension_semantics = [], scalar_prefetch = 0 : i64, scratch_operands = 0 : i64, tpu.core_type = #tpu.core_type<tc>} {
    %c0 = arith.constant 0 : index
    %c0_0 = arith.constant 0 : index
    %0 = vector.load %arg0[%c0, %c0_0] : memref<48x64xf32, #tpu.memory_space<vmem>>, vector<48x64xf32>
    %c0_1 = arith.constant 0 : index
    %c0_2 = arith.constant 0 : index
    %1 = vector.load %arg1[%c0_1, %c0_2] : memref<64x32xf32, #tpu.memory_space<vmem>>, vector<64x32xf32>
    %cst = arith.constant dense<0.000000e+00> : vector<48x32xf32>
    %2 = tpu.matmul %0, %1, %cst {dimension_numbers = #tpu.dot_dimension_numbers<[1], [0], [0], [1], [0, 0, 1, 1], [], []>} : vector<48x64xf32>, vector<64x32xf32>, vector<48x32xf32> -> vector<48x32xf32>
    %c0_3 = arith.constant 0 : index
    %c0_4 = arith.constant 0 : index
    %3 = vector.load %arg2[%c0_3, %c0_4] : memref<48x32xf32, #tpu.memory_space<vmem>>, vector<48x32xf32>
    %4 = arith.addf %2, %3 : vector<48x32xf32>
    %5 = tpu.iota {dimensions = array<i32: 1>} : vector<1x24xi32>
    %c17_i32 = arith.constant 17 : i32
    %6 = vector.broadcast %c17_i32 : i32 to vector<1x24xi32>
    %7 = arith.cmpi slt, %5, %6 : vector<1x24xi32>
    %cst_5 = arith.constant 0.000000e+00 : f32
    %cst_6 = arith.constant -1.000000e+30 : f32
    %8 = vector.broadcast %cst_5 : f32 to vector<1x24xf32>
    %9 = vector.broadcast %cst_6 : f32 to vector<1x24xf32>
    %10 = arith.select %7, %8, %9 : vector<1x24xi1>, vector<1x24xf32>
    %c0_7 = arith.constant 0 : index
    %c0_8 = arith.constant 0 : index
    %c0_9 = arith.constant 0 : index
    %11 = vector.load %arg3[%c0_7, %c0_8, %c0_9] : memref<2x8x128xf32, #tpu.memory_space<vmem>>, vector<1x8x128xf32>
    %12 = vector.shape_cast %11 : vector<1x8x128xf32> to vector<8x128xf32>
    %13 = vector.extract_strided_slice %12 {offsets = [0, 0], sizes = [1, 32], strides = [1, 1]} : vector<8x128xf32> to vector<1x32xf32>
    %14 = vector.extract_strided_slice %12 {offsets = [1, 0], sizes = [1, 32], strides = [1, 1]} : vector<8x128xf32> to vector<1x32xf32>
    %15 = vector.extract_strided_slice %12 {offsets = [2, 0], sizes = [1, 32], strides = [1, 1]} : vector<8x128xf32> to vector<1x32xf32>
    %16 = vector.extract_strided_slice %12 {offsets = [3, 0], sizes = [1, 32], strides = [1, 1]} : vector<8x128xf32> to vector<1x32xf32>
    %17 = vector.extract_strided_slice %12 {offsets = [4, 0], sizes = [1, 32], strides = [1, 1]} : vector<8x128xf32> to vector<1x32xf32>
    %18 = vector.extract_strided_slice %12 {offsets = [5, 0], sizes = [1, 96], strides = [1, 1]} : vector<8x128xf32> to vector<1x96xf32>
    %19 = vector.extract_strided_slice %12 {offsets = [6, 0], sizes = [1, 128], strides = [1, 1]} : vector<8x128xf32> to vector<1x128xf32>
    %cst_10 = arith.constant dense<0.000000e+00> : vector<48xf32>
    %20 = vector.multi_reduction <add>, %4, %cst_10 [1] : vector<48x32xf32> to vector<48xf32>
    %21 = vector.shape_cast %20 : vector<48xf32> to vector<48x1xf32>
    %cst_11 = arith.constant 3.200000e+01 : f32
    %22 = vector.broadcast %cst_11 : f32 to vector<48x1xf32>
    %23 = arith.divf %21, %22 : vector<48x1xf32>
    %24 = vector.broadcast %23 : vector<48x1xf32> to vector<48x32xf32>
    %25 = arith.subf %4, %24 : vector<48x32xf32>
    %26 = arith.mulf %25, %25 : vector<48x32xf32>
    %cst_12 = arith.constant dense<0.000000e+00> : vector<48xf32>
    %27 = vector.multi_reduction <add>, %26, %cst_12 [1] : vector<48x32xf32> to vector<48xf32>
    %28 = vector.shape_cast %27 : vector<48xf32> to vector<48x1xf32>
    %cst_13 = arith.constant 3.200000e+01 : f32
    %29 = vector.broadcast %cst_13 : f32 to vector<48x1xf32>
    %30 = arith.divf %28, %29 : vector<48x1xf32>
    %cst_14 = arith.constant 9.99999974E-6 : f32
    %31 = vector.broadcast %cst_14 : f32 to vector<48x1xf32>
    %32 = arith.addf %30, %31 : vector<48x1xf32>
    %33 = math.rsqrt %32 : vector<48x1xf32>
    %34 = vector.broadcast %33 : vector<48x1xf32> to vector<48x32xf32>
    %35 = arith.mulf %25, %34 : vector<48x32xf32>
    %36 = vector.broadcast %13 : vector<1x32xf32> to vector<48x32xf32>
    %37 = arith.mulf %35, %36 : vector<48x32xf32>
    %38 = vector.broadcast %14 : vector<1x32xf32> to vector<48x32xf32>
    %39 = arith.addf %37, %38 : vector<48x32xf32>
    %c0_15 = arith.constant 0 : index
    %c0_16 = arith.constant 0 : index
    %c0_17 = arith.constant 0 : index
    %40 = vector.load %arg4[%c0_15, %c0_16, %c0_17] : memref<2x32x96xf32, #tpu.memory_space<vmem>>, vector<1x32x96xf32>
    %41 = vector.shape_cast %40 : vector<1x32x96xf32> to vector<32x96xf32>
    %cst_18 = arith.constant dense<0.000000e+00> : vector<48x96xf32>
    %42 = tpu.matmul %39, %41, %cst_18 {dimension_numbers = #tpu.dot_dimension_numbers<[1], [0], [0], [1], [0, 0, 1, 1], [], []>} : vector<48x32xf32>, vector<32x96xf32>, vector<48x96xf32> -> vector<48x96xf32>
    %43 = vector.broadcast %18 : vector<1x96xf32> to vector<48x96xf32>
    %44 = arith.addf %42, %43 : vector<48x96xf32>
    %45 = vector.extract_strided_slice %44 {offsets = [0, 0], sizes = [48, 32], strides = [1, 1]} : vector<48x96xf32> to vector<48x32xf32>
    %46 = vector.extract_strided_slice %44 {offsets = [0, 32], sizes = [48, 32], strides = [1, 1]} : vector<48x96xf32> to vector<48x32xf32>
    %47 = vector.extract_strided_slice %44 {offsets = [0, 64], sizes = [48, 32], strides = [1, 1]} : vector<48x96xf32> to vector<48x32xf32>
    %48 = vector.extract_strided_slice %45 {offsets = [0, 0], sizes = [24, 16], strides = [1, 1]} : vector<48x32xf32> to vector<24x16xf32>
    %49 = vector.extract_strided_slice %46 {offsets = [0, 0], sizes = [24, 16], strides = [1, 1]} : vector<48x32xf32> to vector<24x16xf32>
    %50 = vector.extract_strided_slice %47 {offsets = [0, 0], sizes = [24, 16], strides = [1, 1]} : vector<48x32xf32> to vector<24x16xf32>
    %cst_19 = arith.constant dense<0.000000e+00> : vector<24x24xf32>
    %51 = tpu.matmul %48, %49, %cst_19 {dimension_numbers = #tpu.dot_dimension_numbers<[1], [1], [0], [0], [0, 0, 1, 0], [], []>} : vector<24x16xf32>, vector<24x16xf32>, vector<24x24xf32> -> vector<24x24xf32>
    %52 = vector.broadcast %10 : vector<1x24xf32> to vector<24x24xf32>
    %53 = arith.addf %51, %52 : vector<24x24xf32>
    %cst_20 = arith.constant dense<0xFF800000> : vector<24xf32>
    %54 = vector.multi_reduction <maximumf>, %53, %cst_20 [1] : vector<24x24xf32> to vector<24xf32>
    %55 = vector.shape_cast %54 : vector<24xf32> to vector<24x1xf32>
    %56 = vector.broadcast %55 : vector<24x1xf32> to vector<24x24xf32>
    %57 = arith.subf %53, %56 : vector<24x24xf32>
    %58 = math.exp %57 : vector<24x24xf32>
    %cst_21 = arith.constant dense<0.000000e+00> : vector<24xf32>
    %59 = vector.multi_reduction <add>, %58, %cst_21 [1] : vector<24x24xf32> to vector<24xf32>
    %60 = vector.shape_cast %59 : vector<24xf32> to vector<24x1xf32>
    %61 = tpu.reciprocal %60 {approx = true} : vector<24x1xf32> -> vector<24x1xf32>
    %62 = vector.broadcast %61 : vector<24x1xf32> to vector<24x24xf32>
    %63 = arith.mulf %58, %62 : vector<24x24xf32>
    %cst_22 = arith.constant dense<0.000000e+00> : vector<24x16xf32>
    %64 = tpu.matmul %63, %50, %cst_22 {dimension_numbers = #tpu.dot_dimension_numbers<[1], [0], [0], [1], [0, 0, 1, 1], [], []>} : vector<24x24xf32>, vector<24x16xf32>, vector<24x16xf32> -> vector<24x16xf32>
    %65 = vector.extract_strided_slice %45 {offsets = [0, 16], sizes = [24, 16], strides = [1, 1]} : vector<48x32xf32> to vector<24x16xf32>
    %66 = vector.extract_strided_slice %46 {offsets = [0, 16], sizes = [24, 16], strides = [1, 1]} : vector<48x32xf32> to vector<24x16xf32>
    %67 = vector.extract_strided_slice %47 {offsets = [0, 16], sizes = [24, 16], strides = [1, 1]} : vector<48x32xf32> to vector<24x16xf32>
    %cst_23 = arith.constant dense<0.000000e+00> : vector<24x24xf32>
    %68 = tpu.matmul %65, %66, %cst_23 {dimension_numbers = #tpu.dot_dimension_numbers<[1], [1], [0], [0], [0, 0, 1, 0], [], []>} : vector<24x16xf32>, vector<24x16xf32>, vector<24x24xf32> -> vector<24x24xf32>
    %69 = vector.broadcast %10 : vector<1x24xf32> to vector<24x24xf32>
    %70 = arith.addf %68, %69 : vector<24x24xf32>
    %cst_24 = arith.constant dense<0xFF800000> : vector<24xf32>
    %71 = vector.multi_reduction <maximumf>, %70, %cst_24 [1] : vector<24x24xf32> to vector<24xf32>
    %72 = vector.shape_cast %71 : vector<24xf32> to vector<24x1xf32>
    %73 = vector.broadcast %72 : vector<24x1xf32> to vector<24x24xf32>
    %74 = arith.subf %70, %73 : vector<24x24xf32>
    %75 = math.exp %74 : vector<24x24xf32>
    %cst_25 = arith.constant dense<0.000000e+00> : vector<24xf32>
    %76 = vector.multi_reduction <add>, %75, %cst_25 [1] : vector<24x24xf32> to vector<24xf32>
    %77 = vector.shape_cast %76 : vector<24xf32> to vector<24x1xf32>
    %78 = tpu.reciprocal %77 {approx = true} : vector<24x1xf32> -> vector<24x1xf32>
    %79 = vector.broadcast %78 : vector<24x1xf32> to vector<24x24xf32>
    %80 = arith.mulf %75, %79 : vector<24x24xf32>
    %cst_26 = arith.constant dense<0.000000e+00> : vector<24x16xf32>
    %81 = tpu.matmul %80, %67, %cst_26 {dimension_numbers = #tpu.dot_dimension_numbers<[1], [0], [0], [1], [0, 0, 1, 1], [], []>} : vector<24x24xf32>, vector<24x16xf32>, vector<24x16xf32> -> vector<24x16xf32>
    %82 = tpu.concatenate %64, %81 in 1 : vector<24x16xf32>, vector<24x16xf32> -> vector<24x32xf32>
    %83 = vector.extract_strided_slice %45 {offsets = [24, 0], sizes = [24, 16], strides = [1, 1]} : vector<48x32xf32> to vector<24x16xf32>
    %84 = vector.extract_strided_slice %46 {offsets = [24, 0], sizes = [24, 16], strides = [1, 1]} : vector<48x32xf32> to vector<24x16xf32>
    %85 = vector.extract_strided_slice %47 {offsets = [24, 0], sizes = [24, 16], strides = [1, 1]} : vector<48x32xf32> to vector<24x16xf32>
    %cst_27 = arith.constant dense<0.000000e+00> : vector<24x24xf32>
    %86 = tpu.matmul %83, %84, %cst_27 {dimension_numbers = #tpu.dot_dimension_numbers<[1], [1], [0], [0], [0, 0, 1, 0], [], []>} : vector<24x16xf32>, vector<24x16xf32>, vector<24x24xf32> -> vector<24x24xf32>
    %87 = vector.broadcast %10 : vector<1x24xf32> to vector<24x24xf32>
    %88 = arith.addf %86, %87 : vector<24x24xf32>
    %cst_28 = arith.constant dense<0xFF800000> : vector<24xf32>
    %89 = vector.multi_reduction <maximumf>, %88, %cst_28 [1] : vector<24x24xf32> to vector<24xf32>
    %90 = vector.shape_cast %89 : vector<24xf32> to vector<24x1xf32>
    %91 = vector.broadcast %90 : vector<24x1xf32> to vector<24x24xf32>
    %92 = arith.subf %88, %91 : vector<24x24xf32>
    %93 = math.exp %92 : vector<24x24xf32>
    %cst_29 = arith.constant dense<0.000000e+00> : vector<24xf32>
    %94 = vector.multi_reduction <add>, %93, %cst_29 [1] : vector<24x24xf32> to vector<24xf32>
    %95 = vector.shape_cast %94 : vector<24xf32> to vector<24x1xf32>
    %96 = tpu.reciprocal %95 {approx = true} : vector<24x1xf32> -> vector<24x1xf32>
    %97 = vector.broadcast %96 : vector<24x1xf32> to vector<24x24xf32>
    %98 = arith.mulf %93, %97 : vector<24x24xf32>
    %cst_30 = arith.constant dense<0.000000e+00> : vector<24x16xf32>
    %99 = tpu.matmul %98, %85, %cst_30 {dimension_numbers = #tpu.dot_dimension_numbers<[1], [0], [0], [1], [0, 0, 1, 1], [], []>} : vector<24x24xf32>, vector<24x16xf32>, vector<24x16xf32> -> vector<24x16xf32>
    %100 = vector.extract_strided_slice %45 {offsets = [24, 16], sizes = [24, 16], strides = [1, 1]} : vector<48x32xf32> to vector<24x16xf32>
    %101 = vector.extract_strided_slice %46 {offsets = [24, 16], sizes = [24, 16], strides = [1, 1]} : vector<48x32xf32> to vector<24x16xf32>
    %102 = vector.extract_strided_slice %47 {offsets = [24, 16], sizes = [24, 16], strides = [1, 1]} : vector<48x32xf32> to vector<24x16xf32>
    %cst_31 = arith.constant dense<0.000000e+00> : vector<24x24xf32>
    %103 = tpu.matmul %100, %101, %cst_31 {dimension_numbers = #tpu.dot_dimension_numbers<[1], [1], [0], [0], [0, 0, 1, 0], [], []>} : vector<24x16xf32>, vector<24x16xf32>, vector<24x24xf32> -> vector<24x24xf32>
    %104 = vector.broadcast %10 : vector<1x24xf32> to vector<24x24xf32>
    %105 = arith.addf %103, %104 : vector<24x24xf32>
    %cst_32 = arith.constant dense<0xFF800000> : vector<24xf32>
    %106 = vector.multi_reduction <maximumf>, %105, %cst_32 [1] : vector<24x24xf32> to vector<24xf32>
    %107 = vector.shape_cast %106 : vector<24xf32> to vector<24x1xf32>
    %108 = vector.broadcast %107 : vector<24x1xf32> to vector<24x24xf32>
    %109 = arith.subf %105, %108 : vector<24x24xf32>
    %110 = math.exp %109 : vector<24x24xf32>
    %cst_33 = arith.constant dense<0.000000e+00> : vector<24xf32>
    %111 = vector.multi_reduction <add>, %110, %cst_33 [1] : vector<24x24xf32> to vector<24xf32>
    %112 = vector.shape_cast %111 : vector<24xf32> to vector<24x1xf32>
    %113 = tpu.reciprocal %112 {approx = true} : vector<24x1xf32> -> vector<24x1xf32>
    %114 = vector.broadcast %113 : vector<24x1xf32> to vector<24x24xf32>
    %115 = arith.mulf %110, %114 : vector<24x24xf32>
    %cst_34 = arith.constant dense<0.000000e+00> : vector<24x16xf32>
    %116 = tpu.matmul %115, %102, %cst_34 {dimension_numbers = #tpu.dot_dimension_numbers<[1], [0], [0], [1], [0, 0, 1, 1], [], []>} : vector<24x24xf32>, vector<24x16xf32>, vector<24x16xf32> -> vector<24x16xf32>
    %117 = tpu.concatenate %99, %116 in 1 : vector<24x16xf32>, vector<24x16xf32> -> vector<24x32xf32>
    %118 = tpu.concatenate %82, %117 in 0 : vector<24x32xf32>, vector<24x32xf32> -> vector<48x32xf32>
    %119 = arith.addf %4, %118 : vector<48x32xf32>
    %cst_35 = arith.constant dense<0.000000e+00> : vector<48xf32>
    %120 = vector.multi_reduction <add>, %119, %cst_35 [1] : vector<48x32xf32> to vector<48xf32>
    %121 = vector.shape_cast %120 : vector<48xf32> to vector<48x1xf32>
    %cst_36 = arith.constant 3.200000e+01 : f32
    %122 = vector.broadcast %cst_36 : f32 to vector<48x1xf32>
    %123 = arith.divf %121, %122 : vector<48x1xf32>
    %124 = vector.broadcast %123 : vector<48x1xf32> to vector<48x32xf32>
    %125 = arith.subf %119, %124 : vector<48x32xf32>
    %126 = arith.mulf %125, %125 : vector<48x32xf32>
    %cst_37 = arith.constant dense<0.000000e+00> : vector<48xf32>
    %127 = vector.multi_reduction <add>, %126, %cst_37 [1] : vector<48x32xf32> to vector<48xf32>
    %128 = vector.shape_cast %127 : vector<48xf32> to vector<48x1xf32>
    %cst_38 = arith.constant 3.200000e+01 : f32
    %129 = vector.broadcast %cst_38 : f32 to vector<48x1xf32>
    %130 = arith.divf %128, %129 : vector<48x1xf32>
    %cst_39 = arith.constant 9.99999974E-6 : f32
    %131 = vector.broadcast %cst_39 : f32 to vector<48x1xf32>
    %132 = arith.addf %130, %131 : vector<48x1xf32>
    %133 = math.rsqrt %132 : vector<48x1xf32>
    %134 = vector.broadcast %133 : vector<48x1xf32> to vector<48x32xf32>
    %135 = arith.mulf %125, %134 : vector<48x32xf32>
    %136 = vector.broadcast %15 : vector<1x32xf32> to vector<48x32xf32>
    %137 = arith.mulf %135, %136 : vector<48x32xf32>
    %138 = vector.broadcast %16 : vector<1x32xf32> to vector<48x32xf32>
    %139 = arith.addf %137, %138 : vector<48x32xf32>
    %c0_40 = arith.constant 0 : index
    %c0_41 = arith.constant 0 : index
    %c0_42 = arith.constant 0 : index
    %140 = vector.load %arg5[%c0_40, %c0_41, %c0_42] : memref<2x32x128xf32, #tpu.memory_space<vmem>>, vector<1x32x128xf32>
    %141 = vector.shape_cast %140 : vector<1x32x128xf32> to vector<32x128xf32>
    %cst_43 = arith.constant dense<0.000000e+00> : vector<48x128xf32>
    %142 = tpu.matmul %139, %141, %cst_43 {dimension_numbers = #tpu.dot_dimension_numbers<[1], [0], [0], [1], [0, 0, 1, 1], [], []>} : vector<48x32xf32>, vector<32x128xf32>, vector<48x128xf32> -> vector<48x128xf32>
    %143 = vector.broadcast %19 : vector<1x128xf32> to vector<48x128xf32>
    %144 = arith.addf %142, %143 : vector<48x128xf32>
    %cst_44 = arith.constant 5.000000e-01 : f32
    %145 = vector.broadcast %cst_44 : f32 to vector<48x128xf32>
    %146 = arith.mulf %145, %144 : vector<48x128xf32>
    %cst_45 = arith.constant 0.707106769 : f32
    %147 = vector.broadcast %cst_45 : f32 to vector<48x128xf32>
    %148 = arith.mulf %144, %147 : vector<48x128xf32>
    %149 = math.absf %148 : vector<48x128xf32>
    %cst_46 = arith.constant 0.327591091 : f32
    %150 = vector.broadcast %cst_46 : f32 to vector<48x128xf32>
    %151 = arith.mulf %150, %149 : vector<48x128xf32>
    %cst_47 = arith.constant 1.000000e+00 : f32
    %152 = vector.broadcast %cst_47 : f32 to vector<48x128xf32>
    %153 = arith.addf %152, %151 : vector<48x128xf32>
    %cst_48 = arith.constant 1.000000e+00 : f32
    %154 = vector.broadcast %cst_48 : f32 to vector<48x128xf32>
    %155 = arith.divf %154, %153 : vector<48x128xf32>
    %cst_49 = arith.constant 1.06140542 : f32
    %156 = vector.broadcast %cst_49 : f32 to vector<48x128xf32>
    %157 = arith.mulf %156, %155 : vector<48x128xf32>
    %cst_50 = arith.constant -1.45315206 : f32
    %158 = vector.broadcast %cst_50 : f32 to vector<48x128xf32>
    %159 = arith.addf %157, %158 : vector<48x128xf32>
    %160 = arith.mulf %159, %155 : vector<48x128xf32>
    %cst_51 = arith.constant 1.42141378 : f32
    %161 = vector.broadcast %cst_51 : f32 to vector<48x128xf32>
    %162 = arith.addf %160, %161 : vector<48x128xf32>
    %163 = arith.mulf %162, %155 : vector<48x128xf32>
    %cst_52 = arith.constant -0.284496725 : f32
    %164 = vector.broadcast %cst_52 : f32 to vector<48x128xf32>
    %165 = arith.addf %163, %164 : vector<48x128xf32>
    %166 = arith.mulf %165, %155 : vector<48x128xf32>
    %cst_53 = arith.constant 0.254829586 : f32
    %167 = vector.broadcast %cst_53 : f32 to vector<48x128xf32>
    %168 = arith.addf %166, %167 : vector<48x128xf32>
    %169 = arith.mulf %168, %155 : vector<48x128xf32>
    %cst_54 = arith.constant 0.000000e+00 : f32
    %170 = vector.broadcast %cst_54 : f32 to vector<48x128xf32>
    %171 = arith.subf %170, %149 : vector<48x128xf32>
    %172 = arith.mulf %171, %149 : vector<48x128xf32>
    %173 = math.exp %172 : vector<48x128xf32>
    %174 = arith.mulf %169, %173 : vector<48x128xf32>
    %cst_55 = arith.constant 1.000000e+00 : f32
    %175 = vector.broadcast %cst_55 : f32 to vector<48x128xf32>
    %176 = arith.subf %175, %174 : vector<48x128xf32>
    %cst_56 = arith.constant 0.000000e+00 : f32
    %177 = vector.broadcast %cst_56 : f32 to vector<48x128xf32>
    %178 = arith.cmpf oge, %148, %177 : vector<48x128xf32>
    %cst_57 = arith.constant 0.000000e+00 : f32
    %179 = vector.broadcast %cst_57 : f32 to vector<48x128xf32>
    %180 = arith.subf %179, %176 : vector<48x128xf32>
    %181 = arith.select %178, %176, %180 : vector<48x128xi1>, vector<48x128xf32>
    %cst_58 = arith.constant 1.000000e+00 : f32
    %182 = vector.broadcast %cst_58 : f32 to vector<48x128xf32>
    %183 = arith.addf %182, %181 : vector<48x128xf32>
    %184 = arith.mulf %146, %183 : vector<48x128xf32>
    %c0_59 = arith.constant 0 : index
    %c0_60 = arith.constant 0 : index
    %c0_61 = arith.constant 0 : index
    %185 = vector.load %arg6[%c0_59, %c0_60, %c0_61] : memref<2x128x32xf32, #tpu.memory_space<vmem>>, vector<1x128x32xf32>
    %186 = vector.shape_cast %185 : vector<1x128x32xf32> to vector<128x32xf32>
    %cst_62 = arith.constant dense<0.000000e+00> : vector<48x32xf32>
    %187 = tpu.matmul %184, %186, %cst_62 {dimension_numbers = #tpu.dot_dimension_numbers<[1], [0], [0], [1], [0, 0, 1, 1], [], []>} : vector<48x128xf32>, vector<128x32xf32>, vector<48x32xf32> -> vector<48x32xf32>
    %188 = arith.addf %119, %187 : vector<48x32xf32>
    %189 = vector.broadcast %17 : vector<1x32xf32> to vector<48x32xf32>
    %190 = arith.addf %188, %189 : vector<48x32xf32>
    %c1 = arith.constant 1 : index
    %c0_63 = arith.constant 0 : index
    %c0_64 = arith.constant 0 : index
    %191 = vector.load %arg3[%c1, %c0_63, %c0_64] : memref<2x8x128xf32, #tpu.memory_space<vmem>>, vector<1x8x128xf32>
    %192 = vector.shape_cast %191 : vector<1x8x128xf32> to vector<8x128xf32>
    %193 = vector.extract_strided_slice %192 {offsets = [0, 0], sizes = [1, 32], strides = [1, 1]} : vector<8x128xf32> to vector<1x32xf32>
    %194 = vector.extract_strided_slice %192 {offsets = [1, 0], sizes = [1, 32], strides = [1, 1]} : vector<8x128xf32> to vector<1x32xf32>
    %195 = vector.extract_strided_slice %192 {offsets = [2, 0], sizes = [1, 32], strides = [1, 1]} : vector<8x128xf32> to vector<1x32xf32>
    %196 = vector.extract_strided_slice %192 {offsets = [3, 0], sizes = [1, 32], strides = [1, 1]} : vector<8x128xf32> to vector<1x32xf32>
    %197 = vector.extract_strided_slice %192 {offsets = [4, 0], sizes = [1, 32], strides = [1, 1]} : vector<8x128xf32> to vector<1x32xf32>
    %198 = vector.extract_strided_slice %192 {offsets = [5, 0], sizes = [1, 96], strides = [1, 1]} : vector<8x128xf32> to vector<1x96xf32>
    %199 = vector.extract_strided_slice %192 {offsets = [6, 0], sizes = [1, 128], strides = [1, 1]} : vector<8x128xf32> to vector<1x128xf32>
    %cst_65 = arith.constant dense<0.000000e+00> : vector<48xf32>
    %200 = vector.multi_reduction <add>, %190, %cst_65 [1] : vector<48x32xf32> to vector<48xf32>
    %201 = vector.shape_cast %200 : vector<48xf32> to vector<48x1xf32>
    %cst_66 = arith.constant 3.200000e+01 : f32
    %202 = vector.broadcast %cst_66 : f32 to vector<48x1xf32>
    %203 = arith.divf %201, %202 : vector<48x1xf32>
    %204 = vector.broadcast %203 : vector<48x1xf32> to vector<48x32xf32>
    %205 = arith.subf %190, %204 : vector<48x32xf32>
    %206 = arith.mulf %205, %205 : vector<48x32xf32>
    %cst_67 = arith.constant dense<0.000000e+00> : vector<48xf32>
    %207 = vector.multi_reduction <add>, %206, %cst_67 [1] : vector<48x32xf32> to vector<48xf32>
    %208 = vector.shape_cast %207 : vector<48xf32> to vector<48x1xf32>
    %cst_68 = arith.constant 3.200000e+01 : f32
    %209 = vector.broadcast %cst_68 : f32 to vector<48x1xf32>
    %210 = arith.divf %208, %209 : vector<48x1xf32>
    %cst_69 = arith.constant 9.99999974E-6 : f32
    %211 = vector.broadcast %cst_69 : f32 to vector<48x1xf32>
    %212 = arith.addf %210, %211 : vector<48x1xf32>
    %213 = math.rsqrt %212 : vector<48x1xf32>
    %214 = vector.broadcast %213 : vector<48x1xf32> to vector<48x32xf32>
    %215 = arith.mulf %205, %214 : vector<48x32xf32>
    %216 = vector.broadcast %193 : vector<1x32xf32> to vector<48x32xf32>
    %217 = arith.mulf %215, %216 : vector<48x32xf32>
    %218 = vector.broadcast %194 : vector<1x32xf32> to vector<48x32xf32>
    %219 = arith.addf %217, %218 : vector<48x32xf32>
    %c1_70 = arith.constant 1 : index
    %c0_71 = arith.constant 0 : index
    %c0_72 = arith.constant 0 : index
    %220 = vector.load %arg4[%c1_70, %c0_71, %c0_72] : memref<2x32x96xf32, #tpu.memory_space<vmem>>, vector<1x32x96xf32>
    %221 = vector.shape_cast %220 : vector<1x32x96xf32> to vector<32x96xf32>
    %cst_73 = arith.constant dense<0.000000e+00> : vector<48x96xf32>
    %222 = tpu.matmul %219, %221, %cst_73 {dimension_numbers = #tpu.dot_dimension_numbers<[1], [0], [0], [1], [0, 0, 1, 1], [], []>} : vector<48x32xf32>, vector<32x96xf32>, vector<48x96xf32> -> vector<48x96xf32>
    %223 = vector.broadcast %198 : vector<1x96xf32> to vector<48x96xf32>
    %224 = arith.addf %222, %223 : vector<48x96xf32>
    %225 = vector.extract_strided_slice %224 {offsets = [0, 0], sizes = [48, 32], strides = [1, 1]} : vector<48x96xf32> to vector<48x32xf32>
    %226 = vector.extract_strided_slice %224 {offsets = [0, 32], sizes = [48, 32], strides = [1, 1]} : vector<48x96xf32> to vector<48x32xf32>
    %227 = vector.extract_strided_slice %224 {offsets = [0, 64], sizes = [48, 32], strides = [1, 1]} : vector<48x96xf32> to vector<48x32xf32>
    %228 = vector.extract_strided_slice %225 {offsets = [0, 0], sizes = [24, 16], strides = [1, 1]} : vector<48x32xf32> to vector<24x16xf32>
    %229 = vector.extract_strided_slice %226 {offsets = [0, 0], sizes = [24, 16], strides = [1, 1]} : vector<48x32xf32> to vector<24x16xf32>
    %230 = vector.extract_strided_slice %227 {offsets = [0, 0], sizes = [24, 16], strides = [1, 1]} : vector<48x32xf32> to vector<24x16xf32>
    %cst_74 = arith.constant dense<0.000000e+00> : vector<24x24xf32>
    %231 = tpu.matmul %228, %229, %cst_74 {dimension_numbers = #tpu.dot_dimension_numbers<[1], [1], [0], [0], [0, 0, 1, 0], [], []>} : vector<24x16xf32>, vector<24x16xf32>, vector<24x24xf32> -> vector<24x24xf32>
    %232 = vector.broadcast %10 : vector<1x24xf32> to vector<24x24xf32>
    %233 = arith.addf %231, %232 : vector<24x24xf32>
    %cst_75 = arith.constant dense<0xFF800000> : vector<24xf32>
    %234 = vector.multi_reduction <maximumf>, %233, %cst_75 [1] : vector<24x24xf32> to vector<24xf32>
    %235 = vector.shape_cast %234 : vector<24xf32> to vector<24x1xf32>
    %236 = vector.broadcast %235 : vector<24x1xf32> to vector<24x24xf32>
    %237 = arith.subf %233, %236 : vector<24x24xf32>
    %238 = math.exp %237 : vector<24x24xf32>
    %cst_76 = arith.constant dense<0.000000e+00> : vector<24xf32>
    %239 = vector.multi_reduction <add>, %238, %cst_76 [1] : vector<24x24xf32> to vector<24xf32>
    %240 = vector.shape_cast %239 : vector<24xf32> to vector<24x1xf32>
    %241 = tpu.reciprocal %240 {approx = true} : vector<24x1xf32> -> vector<24x1xf32>
    %242 = vector.broadcast %241 : vector<24x1xf32> to vector<24x24xf32>
    %243 = arith.mulf %238, %242 : vector<24x24xf32>
    %cst_77 = arith.constant dense<0.000000e+00> : vector<24x16xf32>
    %244 = tpu.matmul %243, %230, %cst_77 {dimension_numbers = #tpu.dot_dimension_numbers<[1], [0], [0], [1], [0, 0, 1, 1], [], []>} : vector<24x24xf32>, vector<24x16xf32>, vector<24x16xf32> -> vector<24x16xf32>
    %245 = vector.extract_strided_slice %225 {offsets = [0, 16], sizes = [24, 16], strides = [1, 1]} : vector<48x32xf32> to vector<24x16xf32>
    %246 = vector.extract_strided_slice %226 {offsets = [0, 16], sizes = [24, 16], strides = [1, 1]} : vector<48x32xf32> to vector<24x16xf32>
    %247 = vector.extract_strided_slice %227 {offsets = [0, 16], sizes = [24, 16], strides = [1, 1]} : vector<48x32xf32> to vector<24x16xf32>
    %cst_78 = arith.constant dense<0.000000e+00> : vector<24x24xf32>
    %248 = tpu.matmul %245, %246, %cst_78 {dimension_numbers = #tpu.dot_dimension_numbers<[1], [1], [0], [0], [0, 0, 1, 0], [], []>} : vector<24x16xf32>, vector<24x16xf32>, vector<24x24xf32> -> vector<24x24xf32>
    %249 = vector.broadcast %10 : vector<1x24xf32> to vector<24x24xf32>
    %250 = arith.addf %248, %249 : vector<24x24xf32>
    %cst_79 = arith.constant dense<0xFF800000> : vector<24xf32>
    %251 = vector.multi_reduction <maximumf>, %250, %cst_79 [1] : vector<24x24xf32> to vector<24xf32>
    %252 = vector.shape_cast %251 : vector<24xf32> to vector<24x1xf32>
    %253 = vector.broadcast %252 : vector<24x1xf32> to vector<24x24xf32>
    %254 = arith.subf %250, %253 : vector<24x24xf32>
    %255 = math.exp %254 : vector<24x24xf32>
    %cst_80 = arith.constant dense<0.000000e+00> : vector<24xf32>
    %256 = vector.multi_reduction <add>, %255, %cst_80 [1] : vector<24x24xf32> to vector<24xf32>
    %257 = vector.shape_cast %256 : vector<24xf32> to vector<24x1xf32>
    %258 = tpu.reciprocal %257 {approx = true} : vector<24x1xf32> -> vector<24x1xf32>
    %259 = vector.broadcast %258 : vector<24x1xf32> to vector<24x24xf32>
    %260 = arith.mulf %255, %259 : vector<24x24xf32>
    %cst_81 = arith.constant dense<0.000000e+00> : vector<24x16xf32>
    %261 = tpu.matmul %260, %247, %cst_81 {dimension_numbers = #tpu.dot_dimension_numbers<[1], [0], [0], [1], [0, 0, 1, 1], [], []>} : vector<24x24xf32>, vector<24x16xf32>, vector<24x16xf32> -> vector<24x16xf32>
    %262 = tpu.concatenate %244, %261 in 1 : vector<24x16xf32>, vector<24x16xf32> -> vector<24x32xf32>
    %263 = vector.extract_strided_slice %225 {offsets = [24, 0], sizes = [24, 16], strides = [1, 1]} : vector<48x32xf32> to vector<24x16xf32>
    %264 = vector.extract_strided_slice %226 {offsets = [24, 0], sizes = [24, 16], strides = [1, 1]} : vector<48x32xf32> to vector<24x16xf32>
    %265 = vector.extract_strided_slice %227 {offsets = [24, 0], sizes = [24, 16], strides = [1, 1]} : vector<48x32xf32> to vector<24x16xf32>
    %cst_82 = arith.constant dense<0.000000e+00> : vector<24x24xf32>
    %266 = tpu.matmul %263, %264, %cst_82 {dimension_numbers = #tpu.dot_dimension_numbers<[1], [1], [0], [0], [0, 0, 1, 0], [], []>} : vector<24x16xf32>, vector<24x16xf32>, vector<24x24xf32> -> vector<24x24xf32>
    %267 = vector.broadcast %10 : vector<1x24xf32> to vector<24x24xf32>
    %268 = arith.addf %266, %267 : vector<24x24xf32>
    %cst_83 = arith.constant dense<0xFF800000> : vector<24xf32>
    %269 = vector.multi_reduction <maximumf>, %268, %cst_83 [1] : vector<24x24xf32> to vector<24xf32>
    %270 = vector.shape_cast %269 : vector<24xf32> to vector<24x1xf32>
    %271 = vector.broadcast %270 : vector<24x1xf32> to vector<24x24xf32>
    %272 = arith.subf %268, %271 : vector<24x24xf32>
    %273 = math.exp %272 : vector<24x24xf32>
    %cst_84 = arith.constant dense<0.000000e+00> : vector<24xf32>
    %274 = vector.multi_reduction <add>, %273, %cst_84 [1] : vector<24x24xf32> to vector<24xf32>
    %275 = vector.shape_cast %274 : vector<24xf32> to vector<24x1xf32>
    %276 = tpu.reciprocal %275 {approx = true} : vector<24x1xf32> -> vector<24x1xf32>
    %277 = vector.broadcast %276 : vector<24x1xf32> to vector<24x24xf32>
    %278 = arith.mulf %273, %277 : vector<24x24xf32>
    %cst_85 = arith.constant dense<0.000000e+00> : vector<24x16xf32>
    %279 = tpu.matmul %278, %265, %cst_85 {dimension_numbers = #tpu.dot_dimension_numbers<[1], [0], [0], [1], [0, 0, 1, 1], [], []>} : vector<24x24xf32>, vector<24x16xf32>, vector<24x16xf32> -> vector<24x16xf32>
    %280 = vector.extract_strided_slice %225 {offsets = [24, 16], sizes = [24, 16], strides = [1, 1]} : vector<48x32xf32> to vector<24x16xf32>
    %281 = vector.extract_strided_slice %226 {offsets = [24, 16], sizes = [24, 16], strides = [1, 1]} : vector<48x32xf32> to vector<24x16xf32>
    %282 = vector.extract_strided_slice %227 {offsets = [24, 16], sizes = [24, 16], strides = [1, 1]} : vector<48x32xf32> to vector<24x16xf32>
    %cst_86 = arith.constant dense<0.000000e+00> : vector<24x24xf32>
    %283 = tpu.matmul %280, %281, %cst_86 {dimension_numbers = #tpu.dot_dimension_numbers<[1], [1], [0], [0], [0, 0, 1, 0], [], []>} : vector<24x16xf32>, vector<24x16xf32>, vector<24x24xf32> -> vector<24x24xf32>
    %284 = vector.broadcast %10 : vector<1x24xf32> to vector<24x24xf32>
    %285 = arith.addf %283, %284 : vector<24x24xf32>
    %cst_87 = arith.constant dense<0xFF800000> : vector<24xf32>
    %286 = vector.multi_reduction <maximumf>, %285, %cst_87 [1] : vector<24x24xf32> to vector<24xf32>
    %287 = vector.shape_cast %286 : vector<24xf32> to vector<24x1xf32>
    %288 = vector.broadcast %287 : vector<24x1xf32> to vector<24x24xf32>
    %289 = arith.subf %285, %288 : vector<24x24xf32>
    %290 = math.exp %289 : vector<24x24xf32>
    %cst_88 = arith.constant dense<0.000000e+00> : vector<24xf32>
    %291 = vector.multi_reduction <add>, %290, %cst_88 [1] : vector<24x24xf32> to vector<24xf32>
    %292 = vector.shape_cast %291 : vector<24xf32> to vector<24x1xf32>
    %293 = tpu.reciprocal %292 {approx = true} : vector<24x1xf32> -> vector<24x1xf32>
    %294 = vector.broadcast %293 : vector<24x1xf32> to vector<24x24xf32>
    %295 = arith.mulf %290, %294 : vector<24x24xf32>
    %cst_89 = arith.constant dense<0.000000e+00> : vector<24x16xf32>
    %296 = tpu.matmul %295, %282, %cst_89 {dimension_numbers = #tpu.dot_dimension_numbers<[1], [0], [0], [1], [0, 0, 1, 1], [], []>} : vector<24x24xf32>, vector<24x16xf32>, vector<24x16xf32> -> vector<24x16xf32>
    %297 = tpu.concatenate %279, %296 in 1 : vector<24x16xf32>, vector<24x16xf32> -> vector<24x32xf32>
    %298 = tpu.concatenate %262, %297 in 0 : vector<24x32xf32>, vector<24x32xf32> -> vector<48x32xf32>
    %299 = arith.addf %190, %298 : vector<48x32xf32>
    %cst_90 = arith.constant dense<0.000000e+00> : vector<48xf32>
    %300 = vector.multi_reduction <add>, %299, %cst_90 [1] : vector<48x32xf32> to vector<48xf32>
    %301 = vector.shape_cast %300 : vector<48xf32> to vector<48x1xf32>
    %cst_91 = arith.constant 3.200000e+01 : f32
    %302 = vector.broadcast %cst_91 : f32 to vector<48x1xf32>
    %303 = arith.divf %301, %302 : vector<48x1xf32>
    %304 = vector.broadcast %303 : vector<48x1xf32> to vector<48x32xf32>
    %305 = arith.subf %299, %304 : vector<48x32xf32>
    %306 = arith.mulf %305, %305 : vector<48x32xf32>
    %cst_92 = arith.constant dense<0.000000e+00> : vector<48xf32>
    %307 = vector.multi_reduction <add>, %306, %cst_92 [1] : vector<48x32xf32> to vector<48xf32>
    %308 = vector.shape_cast %307 : vector<48xf32> to vector<48x1xf32>
    %cst_93 = arith.constant 3.200000e+01 : f32
    %309 = vector.broadcast %cst_93 : f32 to vector<48x1xf32>
    %310 = arith.divf %308, %309 : vector<48x1xf32>
    %cst_94 = arith.constant 9.99999974E-6 : f32
    %311 = vector.broadcast %cst_94 : f32 to vector<48x1xf32>
    %312 = arith.addf %310, %311 : vector<48x1xf32>
    %313 = math.rsqrt %312 : vector<48x1xf32>
    %314 = vector.broadcast %313 : vector<48x1xf32> to vector<48x32xf32>
    %315 = arith.mulf %305, %314 : vector<48x32xf32>
    %316 = vector.broadcast %195 : vector<1x32xf32> to vector<48x32xf32>
    %317 = arith.mulf %315, %316 : vector<48x32xf32>
    %318 = vector.broadcast %196 : vector<1x32xf32> to vector<48x32xf32>
    %319 = arith.addf %317, %318 : vector<48x32xf32>
    %c1_95 = arith.constant 1 : index
    %c0_96 = arith.constant 0 : index
    %c0_97 = arith.constant 0 : index
    %320 = vector.load %arg5[%c1_95, %c0_96, %c0_97] : memref<2x32x128xf32, #tpu.memory_space<vmem>>, vector<1x32x128xf32>
    %321 = vector.shape_cast %320 : vector<1x32x128xf32> to vector<32x128xf32>
    %cst_98 = arith.constant dense<0.000000e+00> : vector<48x128xf32>
    %322 = tpu.matmul %319, %321, %cst_98 {dimension_numbers = #tpu.dot_dimension_numbers<[1], [0], [0], [1], [0, 0, 1, 1], [], []>} : vector<48x32xf32>, vector<32x128xf32>, vector<48x128xf32> -> vector<48x128xf32>
    %323 = vector.broadcast %199 : vector<1x128xf32> to vector<48x128xf32>
    %324 = arith.addf %322, %323 : vector<48x128xf32>
    %cst_99 = arith.constant 5.000000e-01 : f32
    %325 = vector.broadcast %cst_99 : f32 to vector<48x128xf32>
    %326 = arith.mulf %325, %324 : vector<48x128xf32>
    %cst_100 = arith.constant 0.707106769 : f32
    %327 = vector.broadcast %cst_100 : f32 to vector<48x128xf32>
    %328 = arith.mulf %324, %327 : vector<48x128xf32>
    %329 = math.absf %328 : vector<48x128xf32>
    %cst_101 = arith.constant 0.327591091 : f32
    %330 = vector.broadcast %cst_101 : f32 to vector<48x128xf32>
    %331 = arith.mulf %330, %329 : vector<48x128xf32>
    %cst_102 = arith.constant 1.000000e+00 : f32
    %332 = vector.broadcast %cst_102 : f32 to vector<48x128xf32>
    %333 = arith.addf %332, %331 : vector<48x128xf32>
    %cst_103 = arith.constant 1.000000e+00 : f32
    %334 = vector.broadcast %cst_103 : f32 to vector<48x128xf32>
    %335 = arith.divf %334, %333 : vector<48x128xf32>
    %cst_104 = arith.constant 1.06140542 : f32
    %336 = vector.broadcast %cst_104 : f32 to vector<48x128xf32>
    %337 = arith.mulf %336, %335 : vector<48x128xf32>
    %cst_105 = arith.constant -1.45315206 : f32
    %338 = vector.broadcast %cst_105 : f32 to vector<48x128xf32>
    %339 = arith.addf %337, %338 : vector<48x128xf32>
    %340 = arith.mulf %339, %335 : vector<48x128xf32>
    %cst_106 = arith.constant 1.42141378 : f32
    %341 = vector.broadcast %cst_106 : f32 to vector<48x128xf32>
    %342 = arith.addf %340, %341 : vector<48x128xf32>
    %343 = arith.mulf %342, %335 : vector<48x128xf32>
    %cst_107 = arith.constant -0.284496725 : f32
    %344 = vector.broadcast %cst_107 : f32 to vector<48x128xf32>
    %345 = arith.addf %343, %344 : vector<48x128xf32>
    %346 = arith.mulf %345, %335 : vector<48x128xf32>
    %cst_108 = arith.constant 0.254829586 : f32
    %347 = vector.broadcast %cst_108 : f32 to vector<48x128xf32>
    %348 = arith.addf %346, %347 : vector<48x128xf32>
    %349 = arith.mulf %348, %335 : vector<48x128xf32>
    %cst_109 = arith.constant 0.000000e+00 : f32
    %350 = vector.broadcast %cst_109 : f32 to vector<48x128xf32>
    %351 = arith.subf %350, %329 : vector<48x128xf32>
    %352 = arith.mulf %351, %329 : vector<48x128xf32>
    %353 = math.exp %352 : vector<48x128xf32>
    %354 = arith.mulf %349, %353 : vector<48x128xf32>
    %cst_110 = arith.constant 1.000000e+00 : f32
    %355 = vector.broadcast %cst_110 : f32 to vector<48x128xf32>
    %356 = arith.subf %355, %354 : vector<48x128xf32>
    %cst_111 = arith.constant 0.000000e+00 : f32
    %357 = vector.broadcast %cst_111 : f32 to vector<48x128xf32>
    %358 = arith.cmpf oge, %328, %357 : vector<48x128xf32>
    %cst_112 = arith.constant 0.000000e+00 : f32
    %359 = vector.broadcast %cst_112 : f32 to vector<48x128xf32>
    %360 = arith.subf %359, %356 : vector<48x128xf32>
    %361 = arith.select %358, %356, %360 : vector<48x128xi1>, vector<48x128xf32>
    %cst_113 = arith.constant 1.000000e+00 : f32
    %362 = vector.broadcast %cst_113 : f32 to vector<48x128xf32>
    %363 = arith.addf %362, %361 : vector<48x128xf32>
    %364 = arith.mulf %326, %363 : vector<48x128xf32>
    %c1_114 = arith.constant 1 : index
    %c0_115 = arith.constant 0 : index
    %c0_116 = arith.constant 0 : index
    %365 = vector.load %arg6[%c1_114, %c0_115, %c0_116] : memref<2x128x32xf32, #tpu.memory_space<vmem>>, vector<1x128x32xf32>
    %366 = vector.shape_cast %365 : vector<1x128x32xf32> to vector<128x32xf32>
    %cst_117 = arith.constant dense<0.000000e+00> : vector<48x32xf32>
    %367 = tpu.matmul %364, %366, %cst_117 {dimension_numbers = #tpu.dot_dimension_numbers<[1], [0], [0], [1], [0, 0, 1, 1], [], []>} : vector<48x128xf32>, vector<128x32xf32>, vector<48x32xf32> -> vector<48x32xf32>
    %368 = arith.addf %299, %367 : vector<48x32xf32>
    %369 = vector.broadcast %197 : vector<1x32xf32> to vector<48x32xf32>
    %370 = arith.addf %368, %369 : vector<48x32xf32>
    %371 = vector.extract_strided_slice %370 {offsets = [16, 0], sizes = [1, 32], strides = [1, 1]} : vector<48x32xf32> to vector<1x32xf32>
    %372 = vector.extract_strided_slice %370 {offsets = [40, 0], sizes = [1, 32], strides = [1, 1]} : vector<48x32xf32> to vector<1x32xf32>
    %373 = tpu.concatenate %371, %372 in 0 : vector<1x32xf32>, vector<1x32xf32> -> vector<2x32xf32>
    %c0_118 = arith.constant 0 : index
    %c0_119 = arith.constant 0 : index
    %374 = vector.load %arg7[%c0_118, %c0_119] : memref<2x32xf32, #tpu.memory_space<vmem>>, vector<2x32xf32>
    tpu.vector_store %arg7[%c0_118, %c0_119], %373 {strides = array<i32>} : memref<2x32xf32, #tpu.memory_space<vmem>>, vector<2x32xf32>,
    return
  }
}

</mosaic_0001>

<bundles_post_ra>
// kernel: vit_forward.1
= control target key start
LH: loop header
LB: loop body
LE: loop exit
PB: predicated region body
PF: predicated region fallthrough
CT: control target
= control target key end

     0   :  { %vm47_vm0 = vcmask 523264   ;;  %s5851_s0 = inlined_call_operand.vmem [shape: f32[48,64], index: 0, kind: input, shape index: {}]   ;;  %s5852_s1 = inlined_call_operand.vmem [shape: f32[64,32], index: 1, kind: input, shape index: {}]   ;;  %s5853_s2 = inlined_call_operand.vmem [shape: f32[48,32], index: 2, kind: input, shape index: {}]   ;;  %s5854_s3 = inlined_call_operand.vmem [shape: f32[2,8,128], index: 3, kind: input, shape index: {}]   ;;  %s5855_s4 = inlined_call_operand.vmem [shape: f32[2,32,96], index: 4, kind: input, shape index: {}]   ;;  %s5856_s5 = inlined_call_operand.vmem [shape: f32[2,32,128], index: 5, kind: input, shape index: {}]   ;;  %s5857_s6 = inlined_call_operand.vmem [shape: f32[2,128,32], index: 6, kind: input, shape index: {}]   ;;  %s5858_s7 = inlined_call_operand.hbm [shape: f32[2,32], index: 7, kind: output, shape index: {}]  }
   0x1   :  { %v40_v0 = vld [vmem:[%s5852_s1 + $0x38] sm:$0xff]  ;;  %v39_v1 = vld [vmem:[%s5852_s1 + $0x30] sm:$0xff]  ;;  %v38_v2 = vld [vmem:[%s5852_s1 + $0x28] sm:$0xff] }
   0x2   :  { %3899 = vmatprep.subr.mxu0 %v40_v0  ;;  %v27_v3 = vld [vmem:[%s5851_s0] sm:$0xff] }
   0x3   :  { %3900 = vmatpush3.msra.mxu0 %v40_v0  ;;  %3915 = vmatprep.mubr.msk.f32.mxu0 %vm47_vm0, %v27_v3  ;;  %v37_v4 = vld [vmem:[%s5852_s1 + $0x20] sm:$0xff] }
   0x4   :  { %3901 = vmatprep.subr.mxu0 %v39_v1 }
   0x5   :  { %3902 = vmatpush3.msra.mxu0 %v39_v1 }
   0x6   :  { %3903 = vmatprep.subr.mxu0 %v38_v2 }
   0x7   :  { %12 = vsyncpa [#allocation3], 0  ;;  %3904 = vmatpush3.msra.mxu0 %v38_v2  ;;  %v36_v5 = vld [vmem:[%s5852_s1 + $0x18] sm:$0xff]  ;;  %v35_v6 = vld [vmem:[%s5852_s1 + $0x10] sm:$0xff]  ;;  %vm166_vm1 = vcmask 261120   ;;  %vm4542_vm2 = vmmov 0  }
   0x8   :  { %3905 = vmatprep.subr.mxu0 %v37_v4  ;;  %v34_v7 = vld [vmem:[%s5852_s1 + $0x8] sm:$0xff]  ;;  %v33_v8 = vld [vmem:[%s5852_s1] sm:$0xff]  ;;  %v29_v10 = vld [vmem:[%s5851_s0 + $0x10] sm:$0xff]  ;;  %s4541_s1 = smov 96   ;;  %s4543_s25 = smov 80   ;;  %vm396_vm3 = vcmask 130048  }
   0x9   :  { %3906 = vmatpush3.msra.mxu0 %v37_v4  ;;  %v28_v9 = vld [vmem:[%s5851_s0 + $0x8] sm:$0xff]  ;;  %v30_v11 = vld [vmem:[%s5851_s0 + $0x18] sm:$0xff]  ;;  %v31_v12 = vld [vmem:[%s5851_s0 + $0x20] sm:$0xff]  ;;  %s4544_s26 = smov 112   ;;  %s4545_s27 = smov 64   ;;  %vm489_vm5 = vcmask 195584  }
   0xa   :  { %3907 = vmatprep.subr.mxu0 %v36_v5  ;;  %v32_v13 = vld [vmem:[%s5851_s0 + $0x28] sm:$0xff]  ;;  %v41_v15 = vld [vmem:[%s5853_s2] sm:$0xff]  ;;  %v43_v20 = vld [vmem:[%s5853_s2 + $0x10] sm:$0xff]  ;;  %s4546_s28 = smov 48   ;;  %s4548_s29 = smov 16  }
   0xb   :  { %3908 = vmatpush3.msra.mxu0 %v36_v5  ;;  %v42_v16 = vld [vmem:[%s5853_s2 + $0x8] sm:$0xff]  ;;  %v44_v23 = vld [vmem:[%s5853_s2 + $0x18] sm:$0xff]  ;;  %v45_v28 = vld [vmem:[%s5853_s2 + $0x20] sm:$0xff] }
   0xc   :  { %3909 = vmatprep.subr.mxu0 %v35_v6  ;;  %v46_v26 = vld [vmem:[%s5853_s2 + $0x28] sm:$0xff]  ;;  %v269_v4 = vld [vmem:[%s5855_s4 + $0x18] sm:$0xff]  ;;  %v268_v5 = vld [vmem:[%s5855_s4 + $0x10] sm:$0xff] }
   0xd   :  { %3910 = vmatpush3.msra.mxu0 %v35_v6  ;;  %3924 = vmatprep.subr.mxu1 %v269_v4  ;;  %v267_v6 = vld [vmem:[%s5855_s4 + $0x8] sm:$0xff] }
   0xe   :  { %3911 = vmatprep.subr.mxu0 %v34_v7  ;;  %3925 = vmatpush3.msra.mxu1 %v269_v4 }
   0xf   :  { %3912 = vmatpush3.msra.mxu0 %v34_v7  ;;  %3926 = vmatprep.subr.mxu1 %v268_v5  ;;  %v266_v7 = vld [vmem:[%s5855_s4] sm:$0xff] }
  0x10   :  { %3913 = vmatprep.subr.mxu0 %v33_v8  ;;  %3927 = vmatpush3.msra.mxu1 %v268_v5 }
  0x11   :  { %3914 = vmatpush3.msra.mxu0 %v33_v8  ;;  %3928 = vmatprep.subr.mxu1 %v267_v6 }
  0x12   :  { %3916 = vmatmul.mubr.msk.f32.vlgmr.msra.gmra.mxu0 %vm47_vm0, %v28_v9  ;;  %3929 = vmatpush3.msra.mxu1 %v267_v6 }
  0x13   :  { %3918 = vmatprep.mubr.msk.f32.mxu0 %vm47_vm0, %v29_v10  ;;  %3930 = vmatprep.subr.mxu1 %v266_v7 }
  0x14   :  { %3931 = vmatpush3.msra.mxu1 %v266_v7 }
  0x16   :  { %3919 = vmatmul.mubr.msk.f32.gmra.mxu0 %vm47_vm0, %v30_v11 }
  0x17   :  { %3921 = vmatprep.mubr.msk.f32.mxu0 %vm47_vm0, %v31_v12 }
  0x1a   :  { %3922 = vmatmul.mubr.msk.f32.gmra.mxu0 %vm47_vm0, %v32_v13 }
  0xd2   :  { %v3917_v14 = vpop.f32.mrf.mxu0 }
  0xd3   :  { %v4649_v21 = vadd.f32 %v3917_v14, %v42_v16 }
  0xd4   :  { %v132_v17 = vpop.f32.mrf.mxu0 }
  0xd5   :  { %v4644_v18 = vadd.f32 %v132_v17, %v41_v15  ;;  %v170_v31 = vsel %vm166_vm1, %v4649_v21, 0.0  ;;  %v161_v15 = vlaneseq }
  0xd6   :  { %v3920_v19 = vpop.f32.mrf.mxu0 }
  0xd7   :  { %v167_v22 = vsel %vm166_vm1, %v4644_v18, 0.0  ;;  %v4664_v29 = vadd.f32 %v3920_v19, %v44_v23 }
  0xd8   :  { %v142_v24 = vpop.f32.mrf.mxu0  ;;  %168 = vadd.xlane.f32.xlu0 %v167_v22 }
  0xd9   :  { %v4656_v25 = vadd.f32 %v142_v24, %v43_v20  ;;  %v176_v35 = vsel %vm166_vm1, %v4664_v29, 0.0  ;;  %v4729_v24 = vshrl.u32 %v161_v15, 7 }
  0xda   :  { %v3923_v27 = vpop.f32.mrf.mxu0 }
  0xdb   :  { %v173_v30 = vsel %vm166_vm1, %v4656_v25, 0.0  ;;  %v4670_v33 = vadd.f32 %v3923_v27, %v46_v26 }
  0xdc   :  { %v152_v32 = vpop.f32.mrf.mxu0  ;;  %174 = vadd.xlane.f32.xlu1 %v173_v30  ;;  %171 = vadd.xlane.f32.xlu0 %v170_v31  ;;  %v248_v31 = vsub.s32 0, %v4729_v24 }
  0xdd   :  { %v4672_v34 = vadd.f32 %v152_v32, %v45_v28  ;;  %v182_v37 = vsel %vm166_vm1, %v4670_v33, 0.0  ;;  %v165_v32 = vld [vmem:[%s5854_s3] sm:$0xff] }
  0xdf   :  { %v179_v36 = vsel %vm166_vm1, %v4672_v34, 0.0 }
  0xe0   :  { %177 = vadd.xlane.f32.xlu1 %v176_v35  ;;  %180 = vadd.xlane.f32.xlu0 %v179_v36  ;;  %v258_v36 = vsub.s32 1, %v4729_v24 }
  0xe4   :  { %183 = vadd.xlane.f32.xlu1 %v182_v37  ;;  %v249_v37 = vrot.slane %v165_v32, %v248_v31 }
 0x161   :  { %v169_v38 = vpop.xlane.xlu0 %168 }
 0x162   :  { %v186_v39 = vmul.f32 0.03125, %v169_v38 }
 0x164   :  { %v4681_v40 = vsub.f32 %v4644_v18, %v186_v39 }
 0x165   :  { %v175_v41 = vpop.xlane.xlu1 %174  ;;  %v172_v42 = vpop.xlane.xlu0 %171 }
 0x166   :  { %v188_v43 = vmul.f32 0.03125, %v175_v41  ;;  %v187_v44 = vmul.f32 0.03125, %v172_v42  ;;  %v198_v45 = vmul.f32 %v4681_v40, %v4681_v40  ;;  %v259_v41 = vrot.slane %v165_v32, %v258_v36 }
 0x168   :  { %v4686_v46 = vsub.f32 %v4656_v25, %v188_v43  ;;  %v4689_v47 = vsub.f32 %v4649_v21, %v187_v44  ;;  %v204_v48 = vsel %vm166_vm1, %v198_v45, 0.0 }
 0x169   :  { %v178_v49 = vpop.xlane.xlu1 %177  ;;  %205 = vadd.xlane.f32.xlu0 %v204_v48  ;;  %v181_v50 = vpop.xlane.xlu0 %180 }
 0x16a   :  { %v189_v51 = vmul.f32 0.03125, %v178_v49  ;;  %v190_v52 = vmul.f32 0.03125, %v181_v50  ;;  %v200_v53 = vmul.f32 %v4686_v46, %v4686_v46  ;;  %v199_v54 = vmul.f32 %v4689_v47, %v4689_v47 }
 0x16c   :  { %v4697_v55 = vsub.f32 %v4664_v29, %v189_v51  ;;  %v4700_v56 = vsub.f32 %v4672_v34, %v190_v52  ;;  %v210_v57 = vsel %vm166_vm1, %v200_v53, 0.0  ;;  %v207_v58 = vsel %vm166_vm1, %v199_v54, 0.0 }
 0x16d   :  { %v184_v59 = vpop.xlane.xlu1 %183  ;;  %211 = vadd.xlane.f32.xlu0 %v210_v57  ;;  %208 = vadd.xlane.f32.xlu1 %v207_v58 }
 0x16e   :  { %v191_v60 = vmul.f32 0.03125, %v184_v59  ;;  %v201_v61 = vmul.f32 %v4697_v55, %v4697_v55  ;;  %v202_v62 = vmul.f32 %v4700_v56, %v4700_v56 }
 0x170   :  { %v4709_v63 = vsub.f32 %v4670_v33, %v191_v60  ;;  %v213_v0 = vsel %vm166_vm1, %v201_v61, 0.0  ;;  %v216_v1 = vsel %vm166_vm1, %v202_v62, 0.0 }
 0x171   :  { %214 = vadd.xlane.f32.xlu1 %v213_v0  ;;  %217 = vadd.xlane.f32.xlu0 %v216_v1  ;;  %v4540_v1 = vmov 0.0  }
 0x172   :  { %v203_v2 = vmul.f32 %v4709_v63, %v4709_v63  ;;  %3941 = vmatprep.subr.mxu0 %v4540_v1  ;;  %3971 = vmatprep.subr.mxu1 %v4540_v1 }
 0x173   :  { %3947 = vmatprep.mubr.msk.f32.mxu0 %vm4542_vm2, %v4540_v1 }
 0x174   :  { %v219_v3 = vsel %vm166_vm1, %v203_v2, 0.0 }
 0x175   :  { %220 = vadd.xlane.f32.xlu1 %v219_v3 }
 0x1f2   :  { %v206_v8 = vpop.xlane.xlu0 %205 }
 0x1f3   :  { %v222_v9 = vmul.f32 0.03125, %v206_v8 }
 0x1f5   :  { %v228_v10 = vadd.f32 1e-05, %v222_v9 }
 0x1f6   :  { %v209_v11 = vpop.xlane.xlu1 %208  ;;  %v212_v12 = vpop.xlane.xlu0 %211 }
 0x1f7   :  { %4324 = vrsqrt.f32 %v228_v10  ;;  %v223_v13 = vmul.f32 0.03125, %v209_v11  ;;  %v224_v14 = vmul.f32 0.03125, %v212_v12 }
 0x1f9   :  { %v229_v16 = vadd.f32 1e-05, %v223_v13  ;;  %v230_v17 = vadd.f32 1e-05, %v224_v14 }
 0x1fa   :  { %v215_v19 = vpop.xlane.xlu1 %214  ;;  %v218_v20 = vpop.xlane.xlu0 %217 }
 0x1fb   :  { %4326 = vrsqrt.f32 %v229_v16  ;;  %v225_v22 = vmul.f32 0.03125, %v215_v19  ;;  %v226_v23 = vmul.f32 0.03125, %v218_v20 }
 0x1fc   :  { %4328 = vrsqrt.f32 %v230_v17 }
 0x1fd   :  { %v231_v26 = vadd.f32 1e-05, %v225_v22  ;;  %v232_v27 = vadd.f32 1e-05, %v226_v23 }
 0x1fe   :  { %v221_v28 = vpop.xlane.xlu1 %220 }
 0x1ff   :  { %4330 = vrsqrt.f32 %v231_v26  ;;  %v227_v30 = vmul.f32 0.03125, %v221_v28 }
 0x200   :  { %4332 = vrsqrt.f32 %v232_v27 }
 0x201   :  { %v233_v35 = vadd.f32 1e-05, %v227_v30 }
 0x203   :  { %4334 = vrsqrt.f32 %v233_v35 }
 0x204   :  { %v4325_v38 = vpop.eup %4324 }
 0x205   :  { %v240_v39 = vmul.f32 %v4325_v38, %v4681_v40 }
 0x207   :  { %v250_v42 = vmul.f32 %v249_v37, %v240_v39 }
 0x208   :  { %v4327_v43 = vpop.eup %4326 }
 0x209   :  { %v4329_v44 = vpop.eup %4328  ;;  %v260_v45 = vadd.f32 %v259_v41, %v250_v42  ;;  %v241_v48 = vmul.f32 %v4327_v43, %v4689_v47 }
 0x20a   :  { %v242_v49 = vmul.f32 %v4329_v44, %v4686_v46 }
 0x20b   :  { %3932 = vmatprep.mubr.msk.f32.mxu1 %vm166_vm1, %v260_v45  ;;  %v251_v50 = vmul.f32 %v249_v37, %v241_v48  ;;  %v162_v48 = vand.u32 127, %v161_v15 }
 0x20c   :  { %v4331_v51 = vpop.eup %4330  ;;  %v252_v52 = vmul.f32 %v249_v37, %v242_v49  ;;  %v4547_v49 = vmov -1e+30  }
 0x20d   :  { %v4333_v53 = vpop.eup %4332  ;;  %v261_v54 = vadd.f32 %v259_v41, %v251_v50  ;;  %v243_v40 = vmul.f32 %v4331_v51, %v4697_v55  ;;  %vm163_vm4 = vcmp.lt.s32.totalorder %v162_v48, 17 }
 0x20e   :  { %v262_v57 = vadd.f32 %v259_v41, %v252_v52  ;;  %v244_v58 = vmul.f32 %v4333_v53, %v4700_v56  ;;  %v272_v56 = vsub.s32 5, %v4729_v24  ;;  %v4884_v50 = vsel %vm163_vm4, 0.0, %v4547_v49 }
 0x20f   :  { %3933 = vmatmul.mubr.msk.f32.vlgmr.msra.gmra.mxu1 %vm166_vm1, %v261_v54  ;;  %v253_v59 = vmul.f32 %v249_v37, %v243_v40 }
 0x210   :  { %v4335_v60 = vpop.eup %4334  ;;  %3935 = vmatprep.mubr.msk.f32.mxu1 %vm166_vm1, %v262_v57  ;;  %v254_v47 = vmul.f32 %v249_v37, %v244_v58  ;;  %v273_v2 = vrot.slane %v165_v32, %v272_v56 }
 0x211   :  { %v263_v46 = vadd.f32 %v259_v41, %v253_v59  ;;  %v245_v61 = vmul.f32 %v4335_v60, %v4709_v63 }
 0x212   :  { %v264_v62 = vadd.f32 %v259_v41, %v254_v47 }
 0x213   :  { %3936 = vmatmul.mubr.msk.f32.gmra.mxu1 %vm166_vm1, %v263_v46  ;;  %v255_v0 = vmul.f32 %v249_v37, %v245_v61 }
 0x214   :  { %3938 = vmatprep.mubr.msk.f32.mxu1 %vm166_vm1, %v264_v62 }
 0x215   :  { %v265_v55 = vadd.f32 %v259_v41, %v255_v0 }
 0x217   :  { %3939 = vmatmul.mubr.msk.f32.gmra.mxu1 %vm166_vm1, %v265_v55 }
 0x218   :  { %3977 = vmatprep.mubr.msk.f32.mxu1 %vm4542_vm2, %v4540_v1 }
 0x2cf   :  { %v3934_v63 = vpop.f32.mrf.mxu1 }
 0x2d0   :  { %v4757_v3 = vadd.f32 %v3934_v63, %v273_v2 }
 0x2d1   :  { %v358_v4 = vpop.f32.mrf.mxu1 }
 0x2d2   :  { %392 = vrot.lane.b32.xlu1 %v4757_v3, %s4541_s1  ;;  %v4761_v6 = vadd.f32 %v358_v4, %v273_v2 }
 0x2d3   :  { %v3937_v5 = vpop.f32.mrf.mxu1 }
 0x2d4   :  { %v4791_v13 = vadd.f32 %v3937_v5, %v273_v2 }
 0x2d5   :  { %v368_v7 = vpop.f32.mrf.mxu1 }
 0x2d6   :  { %v4767_v8 = vadd.f32 %v368_v7, %v273_v2  ;;  %390 = vrot.lane.b32.xlu1 %v4761_v6, %s4541_s1 }
 0x2d7   :  { %v3940_v9 = vpop.f32.mrf.mxu1 }
 0x2d8   :  { %394 = vrot.lane.b32.xlu0 %v4767_v8, %s4541_s1  ;;  %v4779_v10 = vadd.f32 %v3940_v9, %v273_v2 }
 0x2d9   :  { %v378_v11 = vpop.f32.mrf.mxu1 }
 0x2da   :  { %631 = vrot.lane.b32.xlu1 %v4767_v8, %s4543_s25  ;;  %v4785_v12 = vadd.f32 %v378_v11, %v273_v2 }
 0x2dc   :  { %629 = vrot.lane.b32.xlu0 %v4757_v3, %s4543_s25 }
 0x2de   :  { %627 = vrot.lane.b32.xlu1 %v4761_v6, %s4543_s25 }
 0x2e0   :  { %621 = vrot.lane.b32.xlu0 %v4761_v6, %s4544_s26 }
 0x2e2   :  { %878 = vrot.lane.b32.xlu1 %v4779_v10, %s4541_s1 }
 0x2e4   :  { %623 = vrot.lane.b32.xlu0 %v4757_v3, %s4544_s26 }
 0x2e6   :  { %876 = vrot.lane.b32.xlu1 %v4785_v12, %s4541_s1 }
 0x2e8   :  { %625 = vrot.lane.b32.xlu0 %v4767_v8, %s4544_s26 }
 0x2ea   :  { %874 = vrot.lane.b32.xlu1 %v4791_v13, %s4541_s1 }
 0x2ec   :  { %1113 = vrot.lane.b32.xlu0 %v4779_v10, %s4543_s25 }
 0x2ee   :  { %1111 = vrot.lane.b32.xlu1 %v4785_v12, %s4543_s25 }
 0x2f0   :  { %1109 = vrot.lane.b32.xlu0 %v4791_v13, %s4543_s25 }
 0x2f2   :  { %1103 = vrot.lane.b32.xlu1 %v4791_v13, %s4544_s26 }
 0x2f4   :  { %1105 = vrot.lane.b32.xlu0 %v4785_v12, %s4544_s26 }
 0x2f6   :  { %1107 = vrot.lane.b32.xlu1 %v4779_v10, %s4544_s26 }
 0x2f8   :  { %527 = vrot.lane.b32.xlu0 %v4767_v8, %s4545_s27 }
 0x2fa   :  { %525 = vrot.lane.b32.xlu1 %v4757_v3, %s4545_s27 }
 0x2fc   :  { %762 = vrot.lane.b32.xlu0 %v4767_v8, %s4546_s28 }
 0x2fe   :  { %523 = vrot.lane.b32.xlu1 %v4761_v6, %s4545_s27 }
 0x344   :  { %v393_v14 = vpop.permute.xlu1 %392 }
 0x348   :  { %v391_v16 = vpop.permute.xlu1 %390 }
 0x34a   :  { %v395_v17 = vpop.permute.xlu0 %394 }
 0x34b   :  { %3942 = vmatpush3.xpose.msk.msra.mxu0 %vm396_vm3, %v395_v17 }
 0x34c   :  { %v632_v19 = vpop.permute.xlu1 %631  ;;  %3943 = vmatprep.subr.mxu0 %v4540_v1 }
 0x34d   :  { %3972 = vmatpush3.xpose.msk.msra.mxu1 %vm396_vm3, %v632_v19 }
 0x34e   :  { %v630_v20 = vpop.permute.xlu0 %629  ;;  %3973 = vmatprep.subr.mxu1 %v4540_v1 }
 0x34f   :  { %3944 = vmatpush3.xpose.msk.msra.mxu0 %vm396_vm3, %v393_v14 }
 0x350   :  { %v628_v22 = vpop.permute.xlu1 %627  ;;  %3945 = vmatprep.subr.mxu0 %v4540_v1 }
 0x351   :  { %3974 = vmatpush3.xpose.msk.msra.mxu1 %vm396_vm3, %v630_v20 }
 0x352   :  { %v622_v23 = vpop.permute.xlu0 %621  ;;  %3975 = vmatprep.subr.mxu1 %v4540_v1 }
 0x353   :  { %3946 = vmatpush3.xpose.msk.msra.mxu0 %vm396_vm3, %v391_v16 }
 0x354   :  { %v879_v26 = vpop.permute.xlu1 %878  ;;  %3956 = vmatprep.subr.mxu0 %v4540_v1 }
 0x355   :  { %3976 = vmatpush3.xpose.msk.msra.mxu1 %vm396_vm3, %v628_v22 }
 0x356   :  { %3948 = vmatmul.mubr.msk.f32.vlgmr.msra.gmra.mxu0 %vm396_vm3, %v4761_v6  ;;  %v624_v27 = vpop.permute.xlu0 %623  ;;  %4001 = vmatprep.subr.mxu1 %v4540_v1 }
 0x357   :  { %3950 = vmatprep.mubr.msk.f32.mxu0 %vm4542_vm2, %v4540_v1 }
 0x358   :  { %v877_v28 = vpop.permute.xlu1 %876  ;;  %3978 = vmatmul.mubr.msk.f32.vlgmr.msra.gmra.mxu1 %vm396_vm3, %v622_v23 }
 0x359   :  { %4002 = vmatpush3.xpose.msk.msra.mxu1 %vm396_vm3, %v879_v26  ;;  %3980 = vmatprep.mubr.msk.f32.mxu1 %vm4542_vm2, %v4540_v1 }
 0x35a   :  { %3951 = vmatmul.mubr.msk.f32.gmra.mxu0 %vm396_vm3, %v4757_v3  ;;  %v626_v30 = vpop.permute.xlu0 %625  ;;  %4003 = vmatprep.subr.mxu1 %v4540_v1 }
 0x35b   :  { %3953 = vmatprep.mubr.msk.f32.mxu0 %vm4542_vm2, %v4540_v1 }
 0x35c   :  { %v875_v32 = vpop.permute.xlu1 %874  ;;  %3981 = vmatmul.mubr.msk.f32.gmra.mxu1 %vm396_vm3, %v624_v27 }
 0x35d   :  { %4004 = vmatpush3.xpose.msk.msra.mxu1 %vm396_vm3, %v877_v28  ;;  %3983 = vmatprep.mubr.msk.f32.mxu1 %vm4542_vm2, %v4540_v1 }
 0x35e   :  { %3954 = vmatmul.mubr.msk.f32.gmra.mxu0 %vm396_vm3, %v4767_v8  ;;  %v1114_v35 = vpop.permute.xlu0 %1113  ;;  %4005 = vmatprep.subr.mxu1 %v4540_v1 }
 0x35f   :  { %3962 = vmatprep.mubr.msk.f32.mxu0 %vm4542_vm2, %v4540_v1 }
 0x360   :  { %v1112_v37 = vpop.permute.xlu1 %1111  ;;  %3984 = vmatmul.mubr.msk.f32.gmra.mxu1 %vm396_vm3, %v626_v30 }
 0x361   :  { %4006 = vmatpush3.xpose.msk.msra.mxu1 %vm396_vm3, %v875_v32  ;;  %4007 = vmatprep.mubr.msk.f32.mxu1 %vm4542_vm2, %v4540_v1 }
 0x362   :  { %v1110_v38 = vpop.permute.xlu0 %1109  ;;  %4031 = vmatprep.subr.mxu1 %v4540_v1 }
 0x364   :  { %v1104_v39 = vpop.permute.xlu1 %1103  ;;  %4008 = vmatmul.mubr.msk.f32.vlgmr.msra.gmra.mxu1 %vm396_vm3, %v4791_v13 }
 0x365   :  { %4032 = vmatpush3.xpose.msk.msra.mxu1 %vm396_vm3, %v1114_v35  ;;  %4010 = vmatprep.mubr.msk.f32.mxu1 %vm4542_vm2, %v4540_v1 }
 0x366   :  { %v1106_v41 = vpop.permute.xlu0 %1105  ;;  %4033 = vmatprep.subr.mxu1 %v4540_v1 }
 0x368   :  { %v1108_v42 = vpop.permute.xlu1 %1107  ;;  %4011 = vmatmul.mubr.msk.f32.gmra.mxu1 %vm396_vm3, %v4785_v12 }
 0x369   :  { %4034 = vmatpush3.xpose.msk.msra.mxu1 %vm396_vm3, %v1112_v37  ;;  %4013 = vmatprep.mubr.msk.f32.mxu1 %vm4542_vm2, %v4540_v1 }
 0x36a   :  { %v528_v43 = vpop.permute.xlu0 %527  ;;  %4035 = vmatprep.subr.mxu1 %v4540_v1 }
 0x36b   :  { %3957 = vmatpush3.msra.mxu0 %v528_v43 }
 0x36c   :  { %v526_v44 = vpop.permute.xlu1 %525  ;;  %3958 = vmatprep.subr.mxu0 %v4540_v1  ;;  %4014 = vmatmul.mubr.msk.f32.gmra.mxu1 %vm396_vm3, %v4779_v10 }
 0x36d   :  { %3959 = vmatpush3.msra.mxu0 %v526_v44  ;;  %4036 = vmatpush3.xpose.msk.msra.mxu1 %vm396_vm3, %v1110_v38 }
 0x36e   :  { %4037 = vmatprep.mubr.msk.f32.mxu1 %vm4542_vm2, %v4540_v1  ;;  %3960 = vmatprep.subr.mxu0 %v4540_v1  ;;  %v4952_v49 = vpop.permute.xlu0 %762 }
 0x370   :  { %v524_v45 = vpop.permute.xlu1 %523  ;;  %4038 = vmatmul.mubr.msk.f32.vlgmr.msra.gmra.mxu1 %vm396_vm3, %v1104_v39 }
 0x371   :  { %3961 = vmatpush3.msra.mxu0 %v524_v45  ;;  %4040 = vmatprep.mubr.msk.f32.mxu1 %vm4542_vm2, %v4540_v1 }
 0x372   :  { %3986 = vmatprep.subr.mxu0 %v4540_v1 }
 0x374   :  { %4041 = vmatmul.mubr.msk.f32.gmra.mxu1 %vm396_vm3, %v1106_v41 }
 0x375   :  { %4043 = vmatprep.mubr.msk.f32.mxu1 %vm4542_vm2, %v4540_v1 }
 0x378   :  { %4044 = vmatmul.mubr.msk.f32.gmra.mxu1 %vm396_vm3, %v1108_v42 }
 0x416   :  { %v475_v51 = vpop.f32.mrf.mxu0 }
 0x417   :  { %v4887_v52 = vadd.f32 %v475_v51, %v4884_v50 }
 0x418   :  { %v3949_v53 = vpop.f32.mrf.mxu0  ;;  %v711_v54 = vpop.f32.mrf.mxu1 }
 0x419   :  { %v4890_v40 = vadd.f32 %v711_v54, %v4884_v50  ;;  %v490_v57 = vsel %vm489_vm5, %v4887_v52, -inf }
 0x41a   :  { %491 = vmax.xlane.f32.xlu0 %v490_v57  ;;  %v480_v58 = vpop.f32.mrf.mxu0  ;;  %v3979_v15 = vpop.f32.mrf.mxu1 }
 0x41b   :  { %v4895_v59 = vadd.f32 %v480_v58, %v4884_v50  ;;  %v725_v62 = vsel %vm489_vm5, %v4890_v40, -inf }
 0x41c   :  { %v3952_v60 = vpop.f32.mrf.mxu0  ;;  %v716_v47 = vpop.f32.mrf.mxu1 }
 0x41d   :  { %v4898_v46 = vadd.f32 %v716_v47, %v4884_v50  ;;  %v493_v61 = vsel %vm489_vm5, %v4895_v59, -inf }
 0x41e   :  { %494 = vmax.xlane.f32.xlu1 %v493_v61  ;;  %v485_v0 = vpop.f32.mrf.mxu0  ;;  %726 = vmax.xlane.f32.xlu0 %v725_v62  ;;  %v3982_v55 = vpop.f32.mrf.mxu1 }
 0x41f   :  { %v4905_v4 = vadd.f32 %v485_v0, %v4884_v50  ;;  %v728_v7 = vsel %vm489_vm5, %v4898_v46, -inf }
 0x420   :  { %v3955_v2 = vpop.f32.mrf.mxu0  ;;  %v721_v63 = vpop.f32.mrf.mxu1 }
 0x421   :  { %v4908_v5 = vadd.f32 %v721_v63, %v4884_v50  ;;  %v496_v16 = vsel %vm489_vm5, %v4905_v4, -inf }
 0x422   :  { %729 = vmax.xlane.f32.xlu0 %v728_v7  ;;  %v3985_v8 = vpop.f32.mrf.mxu1 }
 0x423   :  { %v731_v9 = vsel %vm489_vm5, %v4908_v5, -inf }
 0x424   :  { %732 = vmax.xlane.f32.xlu1 %v731_v9  ;;  %v958_v11 = vpop.f32.mrf.mxu1 }
 0x425   :  { %v4915_v14 = vadd.f32 %v958_v11, %v4884_v50 }
 0x426   :  { %497 = vmax.xlane.f32.xlu0 %v496_v16  ;;  %v4009_v17 = vpop.f32.mrf.mxu1 }
 0x427   :  { %v972_v22 = vsel %vm489_vm5, %v4915_v14, -inf }
 0x428   :  { %v963_v19 = vpop.f32.mrf.mxu1 }
 0x429   :  { %v4920_v20 = vadd.f32 %v963_v19, %v4884_v50 }
 0x42a   :  { %973 = vmax.xlane.f32.xlu0 %v972_v22  ;;  %v4012_v23 = vpop.f32.mrf.mxu1 }
 0x42b   :  { %v975_v26 = vsel %vm489_vm5, %v4920_v20, -inf }
 0x42c   :  { %976 = vmax.xlane.f32.xlu1 %v975_v26  ;;  %v968_v27 = vpop.f32.mrf.mxu1 }
 0x42d   :  { %v4936_v42 = vadd.f32 %v968_v27, %v4884_v50 }
 0x42e   :  { %v4015_v28 = vpop.f32.mrf.mxu1 }
 0x430   :  { %v1193_v30 = vpop.f32.mrf.mxu1 }
 0x431   :  { %v4933_v41 = vadd.f32 %v1193_v30, %v4884_v50 }
 0x432   :  { %v4039_v32 = vpop.f32.mrf.mxu1 }
 0x433   :  { %v1207_v44 = vsel %vm489_vm5, %v4933_v41, -inf }
 0x434   :  { %v1198_v35 = vpop.f32.mrf.mxu1 }
 0x436   :  { %v4042_v37 = vpop.f32.mrf.mxu1 }
 0x438   :  { %v1203_v38 = vpop.f32.mrf.mxu1 }
 0x439   :  { %v4939_v43 = vadd.f32 %v1203_v38, %v4884_v50 }
 0x43a   :  { %v4045_v39 = vpop.f32.mrf.mxu1 }
 0x43b   :  { %v1213_v45 = vsel %vm489_vm5, %v4939_v43, -inf }
 0x43d   :  { %760 = vrot.lane.b32.xlu1 %v4757_v3, %s4546_s28  ;;  %v4944_v3 = vadd.f32 %v1198_v35, %v4884_v50 }
 0x43f   :  { %v1210_v48 = vsel %vm489_vm5, %v4944_v3, -inf }
 0x440   :  { %758 = vrot.lane.b32.xlu0 %v4761_v6, %s4546_s28  ;;  %v978_v6 = vsel %vm489_vm5, %v4936_v42, -inf }
 0x444   :  { %1009 = vrot.lane.b32.xlu0 %v4779_v10, %s4545_s27 }
 0x461   :  { %1208 = vmax.xlane.f32.xlu1 %v1207_v44 }
 0x463   :  { %979 = vmax.xlane.f32.xlu0 %v978_v6 }
 0x465   :  { %1214 = vmax.xlane.f32.xlu1 %v1213_v45 }
 0x467   :  { %1211 = vmax.xlane.f32.xlu0 %v1210_v48 }
 0x4a3   :  { %v492_v51 = vpop.xlane.xlu0 %491 }
 0x4a4   :  { %v499_v53 = vsub.f32 %v4887_v52, %v492_v51 }
 0x4a6   :  { %v502_v54 = vmul.f32 1.442695, %v499_v53 }
 0x4a7   :  { %v495_v57 = vpop.xlane.xlu1 %494  ;;  %v727_v58 = vpop.xlane.xlu0 %726 }
 0x4a8   :  { %4336 = vpow2.f32 %v502_v54  ;;  %v500_v15 = vsub.f32 %v4895_v59, %v495_v57  ;;  %v734_v60 = vsub.f32 %v4890_v40, %v727_v58 }
 0x4aa   :  { %v737_v47 = vmul.f32 1.442695, %v734_v60  ;;  %v504_v61 = vmul.f32 1.442695, %v500_v15 }
 0x4ab   :  { %v730_v59 = vpop.xlane.xlu0 %729 }
 0x4ac   :  { %4338 = vpow2.f32 %v737_v47  ;;  %v735_v7 = vsub.f32 %v4898_v46, %v730_v59 }
 0x4ad   :  { %4340 = vpow2.f32 %v504_v61  ;;  %v733_v8 = vpop.xlane.xlu1 %732 }
 0x4ae   :  { %v739_v9 = vmul.f32 1.442695, %v735_v7  ;;  %v736_v16 = vsub.f32 %v4908_v5, %v733_v8 }
 0x4af   :  { %v498_v63 = vpop.xlane.xlu0 %497 }
 0x4b0   :  { %v501_v11 = vsub.f32 %v4905_v4, %v498_v63  ;;  %4342 = vpow2.f32 %v739_v9  ;;  %v741_v26 = vmul.f32 1.442695, %v736_v16 }
 0x4b2   :  { %v506_v22 = vmul.f32 1.442695, %v501_v11 }
 0x4b3   :  { %v974_v17 = vpop.xlane.xlu0 %973 }
 0x4b4   :  { %v981_v27 = vsub.f32 %v4915_v14, %v974_v17  ;;  %4344 = vpow2.f32 %v506_v22 }
 0x4b5   :  { %v4957_v62 = vpop.eup %4336  ;;  %v977_v19 = vpop.xlane.xlu1 %976  ;;  %4346 = vpow2.f32 %v741_v26 }
 0x4b6   :  { %v508_v0 = vsel %vm489_vm5, %v4957_v62, 0.0  ;;  %v982_v23 = vsub.f32 %v4920_v20, %v977_v19  ;;  %v984_v46 = vmul.f32 1.442695, %v981_v27 }
 0x4b7   :  { %509 = vadd.xlane.f32.xlu0 %v508_v0  ;;  %v4980_v28 = vpop.permute.xlu0 %758 }
 0x4b9   :  { %v4961_v55 = vpop.eup %4338  ;;  %v761_v30 = vpop.permute.xlu1 %760 }
 0x4ba   :  { %v743_v52 = vsel %vm489_vm5, %v4961_v55, 0.0  ;;  %v4965_v2 = vpop.eup %4340 }
 0x4bb   :  { %744 = vadd.xlane.f32.xlu1 %v743_v52  ;;  %v511_v40 = vsel %vm489_vm5, %v4965_v2, 0.0  ;;  %v4982_v4 = vpop.permute.xlu0 %1009 }
 0x4bd   :  { %v4985_v35 = vpop.eup %4342 }
 0x4be   :  { %v746_v39 = vsel %vm489_vm5, %v4985_v35, 0.0 }
 0x4bf   :  { %512 = vadd.xlane.f32.xlu1 %v511_v40 }
 0x4c1   :  { %v4990_v44 = vpop.eup %4344 }
 0x4c2   :  { %v4992_v45 = vpop.eup %4346  ;;  %v514_v51 = vsel %vm489_vm5, %v4990_v44, 0.0 }
 0x4c3   :  { %v749_v53 = vsel %vm489_vm5, %v4992_v45, 0.0 }
 0x4cd   :  { %1005 = vrot.lane.b32.xlu0 %v4791_v13, %s4545_s27 }
 0x4d0   :  { %1007 = vrot.lane.b32.xlu1 %v4785_v12, %s4545_s27 }
 0x4d1   :  { %1244 = vrot.lane.b32.xlu0 %v4779_v10, %s4546_s28  ;;  %v986_v10 = vmul.f32 1.442695, %v982_v23 }
 0x4d3   :  { %4348 = vpow2.f32 %v986_v10 }
 0x4d4   :  { %4350 = vpow2.f32 %v984_v46 }
 0x4ea   :  { %v1209_v5 = vpop.xlane.xlu1 %1208 }
 0x4eb   :  { %v1216_v32 = vsub.f32 %v4933_v41, %v1209_v5 }
 0x4ec   :  { %v980_v20 = vpop.xlane.xlu0 %979 }
 0x4ed   :  { %v983_v37 = vsub.f32 %v4936_v42, %v980_v20  ;;  %v1219_v14 = vmul.f32 1.442695, %v1216_v32  ;;  %v4997_v42 = vpop.eup %4348 }
 0x4ee   :  { %v5001_v54 = vpop.eup %4350  ;;  %v993_v57 = vsel %vm489_vm5, %v4997_v42, 0.0  ;;  %v1215_v52 = vpop.xlane.xlu1 %1214 }
 0x4ef   :  { %v988_v38 = vmul.f32 1.442695, %v983_v37  ;;  %v1218_v40 = vsub.f32 %v4939_v43, %v1215_v52 }
 0x4f0   :  { %747 = vadd.xlane.f32.xlu0 %v746_v39  ;;  %v1212_v6 = vpop.xlane.xlu0 %1211 }
 0x4f1   :  { %4352 = vpow2.f32 %v988_v38  ;;  %v1217_v48 = vsub.f32 %v4944_v3, %v1212_v6  ;;  %v990_v3 = vsel %vm489_vm5, %v5001_v54, 0.0  ;;  %v1223_v59 = vmul.f32 1.442695, %v1218_v40 }
 0x4f2   :  { %4354 = vpow2.f32 %v1219_v14 }
 0x4f3   :  { %v1221_v41 = vmul.f32 1.442695, %v1217_v48 }
 0x4f4   :  { %515 = vadd.xlane.f32.xlu0 %v514_v51  ;;  %750 = vadd.xlane.f32.xlu1 %v749_v53 }
 0x4f5   :  { %4356 = vpow2.f32 %v1221_v41 }
 0x4f6   :  { %4358 = vpow2.f32 %v1223_v59 }
 0x4f8   :  { %994 = vadd.xlane.f32.xlu0 %v993_v57  ;;  %991 = vadd.xlane.f32.xlu1 %v990_v3 }
 0x4fe   :  { %v5007_v58 = vpop.eup %4352 }
 0x4ff   :  { %v996_v15 = vsel %vm489_vm5, %v5007_v58, 0.0  ;;  %v5011_v60 = vpop.eup %4354 }
 0x500   :  { %997 = vadd.xlane.f32.xlu1 %v996_v15  ;;  %v1225_v47 = vsel %vm489_vm5, %v5011_v60, 0.0 }
 0x502   :  { %v5015_v61 = vpop.eup %4356 }
 0x503   :  { %v1228_v0 = vsel %vm489_vm5, %v5015_v61, 0.0  ;;  %v5024_v63 = vpop.eup %4358 }
 0x504   :  { %1226 = vadd.xlane.f32.xlu1 %v1225_v47  ;;  %v1231_v7 = vsel %vm489_vm5, %v5024_v63, 0.0 }
 0x508   :  { %1229 = vadd.xlane.f32.xlu1 %v1228_v0 }
 0x50e   :  { %1242 = vrot.lane.b32.xlu0 %v4785_v12, %s4546_s28 }
 0x519   :  { %1240 = vrot.lane.b32.xlu1 %v4791_v13, %s4546_s28 }
 0x52d   :  { %1232 = vadd.xlane.f32.xlu0 %v1231_v7 }
 0x540   :  { %v510_v8 = vpop.xlane.xlu0 %509 }
 0x541   :  { %4360 = vrcp.f32 %v510_v8 }
 0x544   :  { %v745_v9 = vpop.xlane.xlu1 %744 }
 0x548   :  { %v513_v11 = vpop.xlane.xlu1 %512 }
 0x549   :  { %4362 = vrcp.f32 %v513_v11 }
 0x54c   :  { %v1008_v22 = vpop.permute.xlu1 %1007 }
 0x54e   :  { %v4361_v12 = vpop.eup %4360 }
 0x54f   :  { %v520_v16 = vmul.f32 %v4361_v12, %v4957_v62 }
 0x551   :  { %3963 = vmatmul.mubr.msk.f32.vlgmr.msra.gmra.mxu0 %vm489_vm5, %v520_v16 }
 0x552   :  { %3987 = vmatpush3.msra.mxu0 %v4952_v49  ;;  %3965 = vmatprep.mubr.msk.f32.mxu0 %vm4542_vm2, %v4540_v1  ;;  %v1006_v49 = vpop.permute.xlu0 %1005 }
 0x553   :  { %3988 = vmatprep.subr.mxu0 %v4540_v1 }
 0x554   :  { %3989 = vmatpush3.msra.mxu0 %v761_v30 }
 0x555   :  { %3990 = vmatprep.subr.mxu0 %v4540_v1 }
 0x556   :  { %3991 = vmatpush3.msra.mxu0 %v4980_v28  ;;  %v4363_v13 = vpop.eup %4362  ;;  %v1245_v62 = vpop.permute.xlu0 %1244 }
 0x557   :  { %4016 = vmatprep.subr.mxu0 %v4540_v1  ;;  %v521_v43 = vmul.f32 %v4363_v13, %v4965_v2 }
 0x559   :  { %3966 = vmatmul.mubr.msk.f32.gmra.mxu0 %vm489_vm5, %v521_v43 }
 0x55a   :  { %3968 = vmatprep.mubr.msk.f32.mxu0 %vm4542_vm2, %v4540_v1 }
 0x579   :  { %v748_v17 = vpop.xlane.xlu0 %747 }
 0x57d   :  { %v516_v19 = vpop.xlane.xlu0 %515  ;;  %v751_v23 = vpop.xlane.xlu1 %750 }
 0x57e   :  { %4364 = vrcp.f32 %v516_v19 }
 0x57f   :  { %4366 = vrcp.f32 %v745_v9 }
 0x580   :  { %4368 = vrcp.f32 %v748_v17 }
 0x581   :  { %4370 = vrcp.f32 %v751_v23  ;;  %v992_v26 = vpop.xlane.xlu1 %991  ;;  %v995_v10 = vpop.xlane.xlu0 %994 }
 0x582   :  { %4372 = vrcp.f32 %v992_v26 }
 0x583   :  { %4374 = vrcp.f32 %v995_v10 }
 0x585   :  { %v1243_v39 = vpop.permute.xlu0 %1242 }
 0x589   :  { %v998_v46 = vpop.xlane.xlu1 %997 }
 0x58a   :  { %4376 = vrcp.f32 %v998_v46 }
 0x58b   :  { %v4365_v27 = vpop.eup %4364 }
 0x58c   :  { %v522_v2 = vmul.f32 %v4365_v27, %v4990_v44  ;;  %v4367_v28 = vpop.eup %4366 }
 0x58d   :  { %v755_v30 = vmul.f32 %v4367_v28, %v4961_v55  ;;  %v4369_v5 = vpop.eup %4368  ;;  %v1227_v32 = vpop.xlane.xlu1 %1226 }
 0x58e   :  { %3969 = vmatmul.mubr.msk.f32.gmra.mxu0 %vm489_vm5, %v522_v2  ;;  %v756_v20 = vmul.f32 %v4369_v5, %v4985_v35  ;;  %v4371_v37 = vpop.eup %4370  ;;  %4378 = vrcp.f32 %v1227_v32 }
 0x58f   :  { %3992 = vmatprep.mubr.msk.f32.mxu0 %vm4542_vm2, %v4540_v1  ;;  %v757_v55 = vmul.f32 %v4371_v37, %v4992_v45 }
 0x591   :  { %v1230_v14 = vpop.xlane.xlu1 %1229 }
 0x592   :  { %3993 = vmatmul.mubr.msk.f32.vlgmr.msra.gmra.mxu0 %vm489_vm5, %v755_v30  ;;  %4380 = vrcp.f32 %v1230_v14 }
 0x593   :  { %4017 = vmatpush3.msra.mxu0 %v4982_v4  ;;  %3995 = vmatprep.mubr.msk.f32.mxu0 %vm4542_vm2, %v4540_v1  ;;  %v4373_v4 = vpop.eup %4372 }
 0x594   :  { %4018 = vmatprep.subr.mxu0 %v4540_v1  ;;  %v1002_v35 = vmul.f32 %v4373_v4, %v5001_v54  ;;  %v4375_v38 = vpop.eup %4374 }
 0x595   :  { %4019 = vmatpush3.msra.mxu0 %v1008_v22  ;;  %v1003_v44 = vmul.f32 %v4375_v38, %v4997_v42  ;;  %v1241_v45 = vpop.permute.xlu1 %1240 }
 0x596   :  { %4020 = vmatprep.subr.mxu0 %v4540_v1  ;;  %3996 = vmatmul.mubr.msk.f32.gmra.mxu0 %vm489_vm5, %v756_v20 }
 0x597   :  { %4021 = vmatpush3.msra.mxu0 %v1006_v49  ;;  %3998 = vmatprep.mubr.msk.f32.mxu0 %vm4542_vm2, %v4540_v1  ;;  %v4377_v6 = vpop.eup %4376 }
 0x598   :  { %4046 = vmatprep.subr.mxu0 %v4540_v1  ;;  %v1004_v48 = vmul.f32 %v4377_v6, %v5007_v58 }
 0x59a   :  { %3999 = vmatmul.mubr.msk.f32.gmra.mxu0 %vm489_vm5, %v757_v55 }
 0x59b   :  { %4022 = vmatprep.mubr.msk.f32.mxu0 %vm4542_vm2, %v4540_v1  ;;  %v4379_v41 = vpop.eup %4378 }
 0x59c   :  { %v1237_v51 = vmul.f32 %v4379_v41, %v5011_v60 }
 0x59e   :  { %4023 = vmatmul.mubr.msk.f32.vlgmr.msra.gmra.mxu0 %vm489_vm5, %v1002_v35 }
 0x59f   :  { %4047 = vmatpush3.msra.mxu0 %v1245_v62  ;;  %4025 = vmatprep.mubr.msk.f32.mxu0 %vm4542_vm2, %v4540_v1  ;;  %v4381_v42 = vpop.eup %4380 }
 0x5a0   :  { %4048 = vmatprep.subr.mxu0 %v4540_v1  ;;  %v1238_v53 = vmul.f32 %v4381_v42, %v5015_v61 }
 0x5a1   :  { %4049 = vmatpush3.msra.mxu0 %v1243_v39 }
 0x5a2   :  { %4050 = vmatprep.subr.mxu0 %v4540_v1  ;;  %4026 = vmatmul.mubr.msk.f32.gmra.mxu0 %vm489_vm5, %v1003_v44 }
 0x5a3   :  { %4051 = vmatpush3.msra.mxu0 %v1241_v45  ;;  %4028 = vmatprep.mubr.msk.f32.mxu0 %vm4542_vm2, %v4540_v1 }
 0x5a6   :  { %4029 = vmatmul.mubr.msk.f32.gmra.mxu0 %vm489_vm5, %v1004_v48 }
 0x5a7   :  { %4052 = vmatprep.mubr.msk.f32.mxu0 %vm4542_vm2, %v4540_v1 }
 0x5aa   :  { %4053 = vmatmul.mubr.msk.f32.vlgmr.msra.gmra.mxu0 %vm489_vm5, %v1237_v51 }
 0x5ab   :  { %4055 = vmatprep.mubr.msk.f32.mxu0 %vm4542_vm2, %v4540_v1 }
 0x5ae   :  { %4056 = vmatmul.mubr.msk.f32.gmra.mxu0 %vm489_vm5, %v1238_v53 }
 0x5af   :  { %4058 = vmatprep.mubr.msk.f32.mxu0 %vm4542_vm2, %v4540_v1 }
 0x5b6   :  { %v1233_v54 = vpop.xlane.xlu0 %1232 }
 0x5b7   :  { %4382 = vrcp.f32 %v1233_v54 }
 0x5c4   :  { %v4383_v57 = vpop.eup %4382 }
 0x5c5   :  { %v1239_v3 = vmul.f32 %v4383_v57, %v5024_v63 }
 0x5c7   :  { %4059 = vmatmul.mubr.msk.f32.gmra.mxu0 %vm489_vm5, %v1239_v3 }
 0x611   :  { %v607_v58 = vpop.f32.mrf.mxu0 }
 0x613   :  { %v3964_v15 = vpop.f32.mrf.mxu0 }
 0x619   :  { %v612_v60 = vpop.f32.mrf.mxu0 }
 0x61b   :  { %v3967_v47 = vpop.f32.mrf.mxu0 }
 0x64e   :  { %v617_v0 = vpop.f32.mrf.mxu0 }
 0x650   :  { %v3970_v52 = vpop.f32.mrf.mxu0 }
 0x652   :  { %v842_v40 = vpop.f32.mrf.mxu0 }
 0x653   :  { %859 = vrot.lane.b32.xlu0 %v842_v40, %s4548_s29 }
 0x654   :  { %v3994_v61 = vpop.f32.mrf.mxu0 }
 0x656   :  { %v847_v59 = vpop.f32.mrf.mxu0 }
 0x657   :  { %861 = vrot.lane.b32.xlu1 %v847_v59, %s4548_s29 }
 0x658   :  { %v3997_v7 = vpop.f32.mrf.mxu0 }
 0x65a   :  { %v852_v8 = vpop.f32.mrf.mxu0 }
 0x65b   :  { %863 = vrot.lane.b32.xlu1 %v852_v8, %s4548_s29 }
 0x65c   :  { %v4000_v63 = vpop.f32.mrf.mxu0 }
 0x65e   :  { %v1089_v9 = vpop.f32.mrf.mxu0 }
 0x660   :  { %v4024_v11 = vpop.f32.mrf.mxu0 }
 0x662   :  { %v1094_v12 = vpop.f32.mrf.mxu0 }
 0x664   :  { %v4027_v16 = vpop.f32.mrf.mxu0 }
 0x665   :  { %v1460_v16 = vld [vmem:[%s5856_s5 + $0x18] sm:$0xff] }
 0x666   :  { %v1099_v13 = vpop.f32.mrf.mxu0  ;;  %4061 = vmatprep.subr.mxu1 %v1460_v16 }
 0x667   :  { %4062 = vmatpush3.msra.mxu1 %v1460_v16 }
 0x668   :  { %v4030_v43 = vpop.f32.mrf.mxu0 }
 0x669   :  { %v1458_v43 = vld [vmem:[%s5856_s5 + $0x8] sm:$0xff] }
 0x66a   :  { %v1324_v49 = vpop.f32.mrf.mxu0 }
 0x66b   :  { %1341 = vrot.lane.b32.xlu1 %v1324_v49, %s4548_s29  ;;  %v1457_v49 = vld [vmem:[%s5856_s5] sm:$0xff] }
 0x66c   :  { %v4054_v62 = vpop.f32.mrf.mxu0 }
 0x66e   :  { %v1329_v17 = vpop.f32.mrf.mxu0 }
 0x66f   :  { %1343 = vrot.lane.b32.xlu0 %v1329_v17, %s4548_s29 }
 0x670   :  { %v4057_v19 = vpop.f32.mrf.mxu0 }
 0x687   :  { %v1334_v22 = vpop.f32.mrf.mxu0 }
 0x688   :  { %1345 = vrot.lane.b32.xlu1 %v1334_v22, %s4548_s29 }
 0x689   :  { %v4060_v23 = vpop.f32.mrf.mxu0 }
 0x6c5   :  { %v860_v26 = vpop.permute.xlu0 %859 }
 0x6c6   :  { %v868_v27 = vsel %vm396_vm3, %v607_v58, %v860_v26 }
 0x6c7   :  { %v5093_v2 = vadd.f32 %v868_v27, %v4644_v18 }
 0x6c9   :  { %v862_v28 = vpop.permute.xlu1 %861  ;;  %v1359_v10 = vsel %vm166_vm1, %v5093_v2, 0.0 }
 0x6ca   :  { %v869_v46 = vsel %vm396_vm3, %v612_v60, %v862_v28  ;;  %1360 = vadd.xlane.f32.xlu0 %v1359_v10 }
 0x6cb   :  { %v5099_v30 = vadd.f32 %v869_v46, %v4649_v21 }
 0x6cd   :  { %v864_v5 = vpop.permute.xlu1 %863  ;;  %v1362_v32 = vsel %vm166_vm1, %v5099_v30, 0.0 }
 0x6ce   :  { %v870_v20 = vsel %vm396_vm3, %v617_v0, %v864_v5  ;;  %1363 = vadd.xlane.f32.xlu1 %v1362_v32 }
 0x6cf   :  { %v5105_v18 = vadd.f32 %v870_v20, %v4656_v25 }
 0x6d1   :  { %v1365_v37 = vsel %vm166_vm1, %v5105_v18, 0.0 }
 0x6d2   :  { %1366 = vadd.xlane.f32.xlu0 %v1365_v37 }
 0x6dd   :  { %v1342_v55 = vpop.permute.xlu1 %1341 }
 0x6de   :  { %v1350_v4 = vsel %vm396_vm3, %v1089_v9, %v1342_v55  ;;  %v1439_v55 = vsub.s32 2, %v4729_v24 }
 0x6df   :  { %v5111_v21 = vadd.f32 %v1350_v4, %v4664_v29  ;;  %v1449_v4 = vsub.s32 3, %v4729_v24 }
 0x6e1   :  { %v1344_v14 = vpop.permute.xlu0 %1343  ;;  %v1368_v35 = vsel %vm166_vm1, %v5111_v21, 0.0 }
 0x6e2   :  { %v1351_v38 = vsel %vm396_vm3, %v1094_v12, %v1344_v14  ;;  %1369 = vadd.xlane.f32.xlu0 %v1368_v35  ;;  %v5176_v14 = vld [vmem:[%s5854_s3] sm:$0xff] }
 0x6e3   :  { %v5117_v25 = vadd.f32 %v1351_v38, %v4672_v34  ;;  %v1440_v35 = vrot.slane %v5176_v14, %v1439_v55 }
 0x6e5   :  { %v1371_v39 = vsel %vm166_vm1, %v5117_v25, 0.0 }
 0x6e6   :  { %1372 = vadd.xlane.f32.xlu0 %v1371_v39 }
 0x6fa   :  { %v1346_v44 = vpop.permute.xlu1 %1345 }
 0x6fb   :  { %v1352_v6 = vsel %vm396_vm3, %v1099_v13, %v1346_v44  ;;  %v1459_v13 = vld [vmem:[%s5856_s5 + $0x10] sm:$0xff]  ;;  %v1450_v44 = vrot.slane %v5176_v14, %v1449_v4 }
 0x6fc   :  { %v5123_v29 = vadd.f32 %v1352_v6, %v4670_v33  ;;  %4063 = vmatprep.subr.mxu1 %v1459_v13 }
 0x6fd   :  { %4064 = vmatpush3.msra.mxu1 %v1459_v13 }
 0x6fe   :  { %v1374_v45 = vsel %vm166_vm1, %v5123_v29, 0.0  ;;  %4065 = vmatprep.subr.mxu1 %v1458_v43 }
 0x6ff   :  { %1375 = vadd.xlane.f32.xlu1 %v1374_v45  ;;  %4066 = vmatpush3.msra.mxu1 %v1458_v43 }
 0x700   :  { %4067 = vmatprep.subr.mxu1 %v1457_v49 }
 0x701   :  { %4068 = vmatpush3.msra.mxu1 %v1457_v49 }
 0x753   :  { %v1361_v48 = vpop.xlane.xlu0 %1360 }
 0x754   :  { %v1377_v41 = vmul.f32 0.03125, %v1361_v48 }
 0x756   :  { %v5128_v51 = vsub.f32 %v5093_v2, %v1377_v41 }
 0x757   :  { %v1364_v34 = vpop.xlane.xlu1 %1363 }
 0x758   :  { %v1378_v42 = vmul.f32 0.03125, %v1364_v34  ;;  %v1389_v53 = vmul.f32 %v5128_v51, %v5128_v51 }
 0x75a   :  { %v5133_v54 = vsub.f32 %v5099_v30, %v1378_v42  ;;  %v1395_v33 = vsel %vm166_vm1, %v1389_v53, 0.0 }
 0x75b   :  { %1396 = vadd.xlane.f32.xlu0 %v1395_v33  ;;  %v1367_v57 = vpop.xlane.xlu0 %1366 }
 0x75c   :  { %v1379_v3 = vmul.f32 0.03125, %v1367_v57  ;;  %v1390_v58 = vmul.f32 %v5133_v54, %v5133_v54 }
 0x75e   :  { %v5139_v15 = vsub.f32 %v5105_v18, %v1379_v3  ;;  %v1398_v60 = vsel %vm166_vm1, %v1390_v58, 0.0 }
 0x75f   :  { %1399 = vadd.xlane.f32.xlu1 %v1398_v60 }
 0x760   :  { %v1391_v47 = vmul.f32 %v5139_v15, %v5139_v15 }
 0x762   :  { %v1401_v0 = vsel %vm166_vm1, %v1391_v47, 0.0 }
 0x763   :  { %1402 = vadd.xlane.f32.xlu0 %v1401_v0 }
 0x76b   :  { %v1370_v52 = vpop.xlane.xlu0 %1369 }
 0x76c   :  { %v1380_v40 = vmul.f32 0.03125, %v1370_v52 }
 0x76e   :  { %v5146_v61 = vsub.f32 %v5111_v21, %v1380_v40 }
 0x76f   :  { %v1373_v59 = vpop.xlane.xlu0 %1372 }
 0x770   :  { %v1381_v7 = vmul.f32 0.03125, %v1373_v59  ;;  %v1392_v8 = vmul.f32 %v5146_v61, %v5146_v61 }
 0x772   :  { %v5151_v63 = vsub.f32 %v5117_v25, %v1381_v7  ;;  %v1404_v9 = vsel %vm166_vm1, %v1392_v8, 0.0 }
 0x773   :  { %1405 = vadd.xlane.f32.xlu1 %v1404_v9 }
 0x774   :  { %v1393_v11 = vmul.f32 %v5151_v63, %v5151_v63 }
 0x776   :  { %v1407_v12 = vsel %vm166_vm1, %v1393_v11, 0.0 }
 0x777   :  { %1408 = vadd.xlane.f32.xlu0 %v1407_v12 }
 0x788   :  { %v1376_v62 = vpop.xlane.xlu1 %1375 }
 0x789   :  { %v1382_v17 = vmul.f32 0.03125, %v1376_v62 }
 0x78b   :  { %v1388_v19 = vsub.f32 %v5123_v29, %v1382_v17 }
 0x78d   :  { %v1394_v22 = vmul.f32 %v1388_v19, %v1388_v19 }
 0x78f   :  { %v1410_v23 = vsel %vm166_vm1, %v1394_v22, 0.0  ;;  %v1752_v22 = vld [vmem:[%s5857_s6 + $0x60] sm:$0xff] }
 0x790   :  { %1411 = vadd.xlane.f32.xlu1 %v1410_v23  ;;  %v1751_v23 = vld [vmem:[%s5857_s6 + $0x58] sm:$0xff] }
 0x7e4   :  { %v1397_v26 = vpop.xlane.xlu0 %1396 }
 0x7e5   :  { %v1413_v27 = vmul.f32 0.03125, %v1397_v26  ;;  %v1750_v26 = vld [vmem:[%s5857_s6 + $0x50] sm:$0xff] }
 0x7e7   :  { %v1419_v28 = vadd.f32 1e-05, %v1413_v27  ;;  %v1749_v27 = vld [vmem:[%s5857_s6 + $0x48] sm:$0xff] }
 0x7e8   :  { %v1400_v10 = vpop.xlane.xlu1 %1399 }
 0x7e9   :  { %4384 = vrsqrt.f32 %v1419_v28  ;;  %v1414_v46 = vmul.f32 0.03125, %v1400_v10  ;;  %v1748_v28 = vld [vmem:[%s5857_s6 + $0x40] sm:$0xff]  ;;  %v1747_v10 = vld [vmem:[%s5857_s6 + $0x38] sm:$0xff] }
 0x7eb   :  { %v1420_v5 = vadd.f32 1e-05, %v1414_v46  ;;  %v1746_v46 = vld [vmem:[%s5857_s6 + $0x30] sm:$0xff] }
 0x7ec   :  { %v1403_v32 = vpop.xlane.xlu0 %1402 }
 0x7ed   :  { %4386 = vrsqrt.f32 %v1420_v5  ;;  %v1415_v20 = vmul.f32 0.03125, %v1403_v32  ;;  %v1745_v5 = vld [vmem:[%s5857_s6 + $0x28] sm:$0xff]  ;;  %v1744_v32 = vld [vmem:[%s5857_s6 + $0x20] sm:$0xff] }
 0x7ef   :  { %v1421_v37 = vadd.f32 1e-05, %v1415_v20  ;;  %v1743_v20 = vld [vmem:[%s5857_s6 + $0x18] sm:$0xff] }
 0x7f1   :  { %4388 = vrsqrt.f32 %v1421_v37  ;;  %v1742_v37 = vld [vmem:[%s5857_s6 + $0x10] sm:$0xff] }
 0x7f6   :  { %v4385_v38 = vpop.eup %4384 }
 0x7f7   :  { %v1431_v39 = vmul.f32 %v4385_v38, %v5128_v51  ;;  %v1740_v38 = vld [vmem:[%s5857_s6] sm:$0xff] }
 0x7f9   :  { %v1441_v6 = vmul.f32 %v1440_v35, %v1431_v39  ;;  %v1463_v39 = vsub.s32 6, %v4729_v24 }
 0x7fa   :  { %v4387_v45 = vpop.eup %4386 }
 0x7fb   :  { %v1432_v48 = vmul.f32 %v4387_v45, %v5133_v54  ;;  %v1451_v41 = vadd.f32 %v1450_v44, %v1441_v6 }
 0x7fc   :  { %v1406_v34 = vpop.xlane.xlu1 %1405 }
 0x7fd   :  { %v1442_v42 = vmul.f32 %v1440_v35, %v1432_v48  ;;  %v1416_v53 = vmul.f32 0.03125, %v1406_v34  ;;  %4069 = vmatprep.mubr.msk.f32.mxu1 %vm166_vm1, %v1451_v41 }
 0x7fe   :  { %v4389_v33 = vpop.eup %4388 }
 0x7ff   :  { %v1422_v57 = vadd.f32 1e-05, %v1416_v53  ;;  %v1452_v3 = vadd.f32 %v1450_v44, %v1442_v42  ;;  %v1433_v58 = vmul.f32 %v4389_v33, %v5139_v15 }
 0x800   :  { %v1409_v51 = vpop.xlane.xlu0 %1408 }
 0x801   :  { %4390 = vrsqrt.f32 %v1422_v57  ;;  %v1417_v60 = vmul.f32 0.03125, %v1409_v51  ;;  %4070 = vmatmul.mubr.msk.f32.vlgmr.msra.gmra.mxu1 %vm166_vm1, %v1452_v3  ;;  %v1443_v47 = vmul.f32 %v1440_v35, %v1433_v58 }
 0x803   :  { %v1423_v0 = vadd.f32 1e-05, %v1417_v60  ;;  %v1453_v52 = vadd.f32 %v1450_v44, %v1443_v47 }
 0x805   :  { %4392 = vrsqrt.f32 %v1423_v0  ;;  %4072 = vmatprep.mubr.msk.f32.mxu1 %vm166_vm1, %v1453_v52 }
 0x80e   :  { %v4391_v54 = vpop.eup %4390 }
 0x80f   :  { %v1434_v40 = vmul.f32 %v4391_v54, %v5146_v61  ;;  %v1755_v61 = vld [vmem:[%s5857_s6 + $0x78] sm:$0xff] }
 0x810   :  { %4078 = vmatprep.subr.mxu0 %v1755_v61 }
 0x811   :  { %v1444_v59 = vmul.f32 %v1440_v35, %v1434_v40  ;;  %4079 = vmatpush3.msra.mxu0 %v1755_v61 }
 0x812   :  { %v4393_v7 = vpop.eup %4392 }
 0x813   :  { %v1454_v8 = vadd.f32 %v1450_v44, %v1444_v59  ;;  %v1435_v9 = vmul.f32 %v4393_v7, %v5151_v63  ;;  %v1754_v63 = vld [vmem:[%s5857_s6 + $0x70] sm:$0xff] }
 0x814   :  { %4080 = vmatprep.subr.mxu0 %v1754_v63 }
 0x815   :  { %4073 = vmatmul.mubr.msk.f32.gmra.mxu1 %vm166_vm1, %v1454_v8  ;;  %v1445_v15 = vmul.f32 %v1440_v35, %v1435_v9  ;;  %4081 = vmatpush3.msra.mxu0 %v1754_v63 }
 0x817   :  { %v1455_v11 = vadd.f32 %v1450_v44, %v1445_v15 }
 0x819   :  { %v1412_v12 = vpop.xlane.xlu1 %1411  ;;  %4075 = vmatprep.mubr.msk.f32.mxu1 %vm166_vm1, %v1455_v11 }
 0x81a   :  { %v1418_v16 = vmul.f32 0.03125, %v1412_v12 }
 0x81c   :  { %v1424_v13 = vadd.f32 1e-05, %v1418_v16 }
 0x81e   :  { %4394 = vrsqrt.f32 %v1424_v13 }
 0x82b   :  { %v4395_v43 = vpop.eup %4394 }
 0x82c   :  { %v1436_v49 = vmul.f32 %v4395_v43, %v1388_v19  ;;  %v1753_v19 = vld [vmem:[%s5857_s6 + $0x68] sm:$0xff] }
 0x82d   :  { %4082 = vmatprep.subr.mxu0 %v1753_v19 }
 0x82e   :  { %v1446_v62 = vmul.f32 %v1440_v35, %v1436_v49  ;;  %4083 = vmatpush3.msra.mxu0 %v1753_v19  ;;  %v1741_v35 = vld [vmem:[%s5857_s6 + $0x8] sm:$0xff] }
 0x82f   :  { %4084 = vmatprep.subr.mxu0 %v1752_v22 }
 0x830   :  { %v1456_v17 = vadd.f32 %v1450_v44, %v1446_v62  ;;  %4085 = vmatpush3.msra.mxu0 %v1752_v22  ;;  %v5248_v44 = vrot.slane %v5176_v14, %v1463_v39 }
 0x831   :  { %4086 = vmatprep.subr.mxu0 %v1751_v23 }
 0x832   :  { %4076 = vmatmul.mubr.msk.f32.gmra.mxu1 %vm166_vm1, %v1456_v17  ;;  %4087 = vmatpush3.msra.mxu0 %v1751_v23 }
 0x833   :  { %4088 = vmatprep.subr.mxu0 %v1750_v26 }
 0x834   :  { %4089 = vmatpush3.msra.mxu0 %v1750_v26 }
 0x835   :  { %4090 = vmatprep.subr.mxu0 %v1749_v27 }
 0x836   :  { %4091 = vmatpush3.msra.mxu0 %v1749_v27 }
 0x837   :  { %4092 = vmatprep.subr.mxu0 %v1748_v28 }
 0x838   :  { %4093 = vmatpush3.msra.mxu0 %v1748_v28 }
 0x839   :  { %4094 = vmatprep.subr.mxu0 %v1747_v10 }
 0x83a   :  { %4095 = vmatpush3.msra.mxu0 %v1747_v10 }
 0x83b   :  { %4096 = vmatprep.subr.mxu0 %v1746_v46 }
 0x83c   :  { %4097 = vmatpush3.msra.mxu0 %v1746_v46 }
 0x83d   :  { %4098 = vmatprep.subr.mxu0 %v1745_v5 }
 0x83e   :  { %4099 = vmatpush3.msra.mxu0 %v1745_v5 }
 0x83f   :  { %4100 = vmatprep.subr.mxu0 %v1744_v32 }
 0x840   :  { %4101 = vmatpush3.msra.mxu0 %v1744_v32 }
 0x841   :  { %4102 = vmatprep.subr.mxu0 %v1743_v20 }
 0x842   :  { %4103 = vmatpush3.msra.mxu0 %v1743_v20 }
 0x843   :  { %4104 = vmatprep.subr.mxu0 %v1742_v37 }
 0x844   :  { %4105 = vmatpush3.msra.mxu0 %v1742_v37 }
 0x845   :  { %4106 = vmatprep.subr.mxu0 %v1741_v35 }
 0x846   :  { %4107 = vmatpush3.msra.mxu0 %v1741_v35 }
 0x847   :  { %4108 = vmatprep.subr.mxu0 %v1740_v38 }
 0x848   :  { %4109 = vmatpush3.msra.mxu0 %v1740_v38 }
 0x849   :  { %4166 = vmatprep.subr.mxu0 %v4540_v1 }
 0x8c1   :  { %v4071_v6 = vpop.f32.mrf.mxu1 }
 0x8c2   :  { %v5251_v45 = vadd.f32 %v4071_v6, %v5248_v44 }
 0x8c3   :  { %v1549_v48 = vpop.f32.mrf.mxu1 }
 0x8c4   :  { %v5254_v41 = vmul.f32 0.70710677, %v5251_v45  ;;  %v5257_v34 = vadd.f32 %v1549_v48, %v5248_v44 }
 0x8c6   :  { %v1591_v42 = vand.u32 2147483647, %v5254_v41  ;;  %v5261_v53 = vmul.f32 0.70710677, %v5257_v34  ;;  %vm1711_vm6 = vcmp.ge.f32.partialorder %v5254_v41, 0.0 }
 0x8c8   :  { %v1597_v33 = vmul.f32 0.3275911, %v1591_v42  ;;  %v1590_v57 = vand.u32 2147483647, %v5261_v53  ;;  %v1675_v60 = vsub.f32 0.0, %v1591_v42  ;;  %vm1710_vm7 = vcmp.ge.f32.partialorder %v5261_v53, 0.0 }
 0x8ca   :  { %v1603_v3 = vadd.f32 1.0, %v1597_v33  ;;  %v1596_v58 = vmul.f32 0.3275911, %v1590_v57  ;;  %v1674_v47 = vsub.f32 0.0, %v1590_v57  ;;  %v1681_v52 = vmul.f32 %v1675_v60, %v1591_v42 }
 0x8cc   :  { %4396 = vrcp.f32 %v1603_v3  ;;  %v1602_v51 = vadd.f32 1.0, %v1596_v58  ;;  %v1680_v9 = vmul.f32 %v1674_v47, %v1590_v57  ;;  %v1688_v11 = vmul.f32 1.442695, %v1681_v52 }
 0x8ce   :  { %4398 = vrcp.f32 %v1602_v51  ;;  %v1686_v62 = vmul.f32 1.442695, %v1680_v9 }
 0x8cf   :  { %4400 = vpow2.f32 %v1688_v11 }
 0x8d5   :  { %v4074_v0 = vpop.f32.mrf.mxu1 }
 0x8d6   :  { %v5265_v54 = vadd.f32 %v4074_v0, %v5248_v44 }
 0x8d7   :  { %v1559_v40 = vpop.f32.mrf.mxu1 }
 0x8d8   :  { %v5268_v59 = vmul.f32 0.70710677, %v5265_v54  ;;  %v5271_v7 = vadd.f32 %v1559_v40, %v5248_v44 }
 0x8d9   :  { %v4397_v8 = vpop.eup %4396 }
 0x8da   :  { %v1621_v15 = vmul.f32 1.0614054, %v4397_v8  ;;  %v1593_v12 = vand.u32 2147483647, %v5268_v59  ;;  %v5275_v16 = vmul.f32 0.70710677, %v5271_v7 }
 0x8db   :  { %v4399_v13 = vpop.eup %4398  ;;  %vm1713_vm8 = vcmp.ge.f32.partialorder %v5268_v59, 0.0 }
 0x8dc   :  { %v1627_v43 = vadd.f32 -1.4531521, %v1621_v15  ;;  %v1599_v49 = vmul.f32 0.3275911, %v1593_v12  ;;  %v1592_v17 = vand.u32 2147483647, %v5275_v16  ;;  %v4401_v57 = vpop.eup %4400 }
 0x8dd   :  { %v1620_v61 = vmul.f32 1.0614054, %v4399_v13  ;;  %v1677_v37 = vsub.f32 0.0, %v1593_v12  ;;  %vm1712_vm9 = vcmp.ge.f32.partialorder %v5275_v16, 0.0 }
 0x8de   :  { %v1633_v63 = vmul.f32 %v4397_v8, %v1627_v43  ;;  %v1605_v19 = vadd.f32 1.0, %v1599_v49  ;;  %v1598_v22 = vmul.f32 0.3275911, %v1592_v17  ;;  %v1676_v33 = vsub.f32 0.0, %v1592_v17 }
 0x8df   :  { %v1626_v23 = vadd.f32 -1.4531521, %v1620_v61  ;;  %v1683_v42 = vmul.f32 %v1677_v37, %v1593_v12  ;;  %v1578_v37 = vmul.f32 0.5, %v5257_v34 }
 0x8e0   :  { %v1639_v26 = vadd.f32 1.4214138, %v1633_v63  ;;  %4402 = vrcp.f32 %v1605_v19  ;;  %v1604_v27 = vadd.f32 1.0, %v1598_v22  ;;  %v1682_v40 = vmul.f32 %v1676_v33, %v1592_v17 }
 0x8e1   :  { %4404 = vpow2.f32 %v1686_v62  ;;  %v1632_v28 = vmul.f32 %v4399_v13, %v1626_v23  ;;  %v1692_v52 = vmul.f32 1.442695, %v1683_v42 }
 0x8e2   :  { %v1645_v10 = vmul.f32 %v4397_v8, %v1639_v26  ;;  %4406 = vrcp.f32 %v1604_v27 }
 0x8e3   :  { %v1638_v46 = vadd.f32 1.4214138, %v1632_v28  ;;  %4408 = vpow2.f32 %v1692_v52 }
 0x8e4   :  { %v1651_v5 = vadd.f32 -0.28449672, %v1645_v10 }
 0x8e5   :  { %v1644_v32 = vmul.f32 %v4399_v13, %v1638_v46 }
 0x8e6   :  { %v1657_v20 = vmul.f32 %v4397_v8, %v1651_v5 }
 0x8e7   :  { %v1650_v35 = vadd.f32 -0.28449672, %v1644_v32 }
 0x8e8   :  { %v1663_v38 = vadd.f32 0.2548296, %v1657_v20 }
 0x8e9   :  { %v1656_v6 = vmul.f32 %v4399_v13, %v1650_v35 }
 0x8ea   :  { %v1669_v48 = vmul.f32 %v4397_v8, %v1663_v38  ;;  %v1690_v8 = vmul.f32 1.442695, %v1682_v40 }
 0x8eb   :  { %v1662_v3 = vadd.f32 0.2548296, %v1656_v6  ;;  %v1579_v6 = vmul.f32 0.5, %v5251_v45 }
 0x8ec   :  { %v1699_v58 = vmul.f32 %v4401_v57, %v1669_v48  ;;  %4410 = vpow2.f32 %v1690_v8 }
 0x8ed   :  { %v4403_v51 = vpop.eup %4402  ;;  %v1668_v60 = vmul.f32 %v4399_v13, %v1662_v3 }
 0x8ee   :  { %v4405_v47 = vpop.eup %4404  ;;  %v1705_v0 = vsub.f32 1.0, %v1699_v58  ;;  %v1623_v9 = vmul.f32 1.0614054, %v4403_v51 }
 0x8ef   :  { %v1698_v15 = vmul.f32 %v4405_v47, %v1668_v60  ;;  %v4407_v11 = vpop.eup %4406 }
 0x8f0   :  { %v1717_v43 = vsub.f32 0.0, %v1705_v0  ;;  %v1629_v49 = vadd.f32 -1.4531521, %v1623_v9  ;;  %v1622_v61 = vmul.f32 1.0614054, %v4407_v11  ;;  %v4409_v9 = vpop.eup %4408 }
 0x8f1   :  { %v1704_v62 = vsub.f32 1.0, %v1698_v15 }
 0x8f2   :  { %v4077_v12 = vpop.f32.mrf.mxu1  ;;  %v1635_v63 = vmul.f32 %v4403_v51, %v1629_v49  ;;  %v1628_v22 = vadd.f32 -1.4531521, %v1622_v61  ;;  %v1723_v23 = vsel %vm1711_vm6, %v1705_v0, %v1717_v43 }
 0x8f3   :  { %v5280_v19 = vadd.f32 %v4077_v12, %v5248_v44  ;;  %v1716_v13 = vsub.f32 0.0, %v1704_v62  ;;  %v1729_v5 = vadd.f32 1.0, %v1723_v23 }
 0x8f4   :  { %v1569_v17 = vpop.f32.mrf.mxu1  ;;  %v1641_v26 = vadd.f32 1.4214138, %v1635_v63  ;;  %v1634_v46 = vmul.f32 %v4407_v11, %v1628_v22 }
 0x8f5   :  { %v5284_v27 = vmul.f32 0.70710677, %v5280_v19  ;;  %v5287_v28 = vadd.f32 %v1569_v17, %v5248_v44  ;;  %v1722_v10 = vsel %vm1710_vm7, %v1704_v62, %v1716_v13  ;;  %v1735_v3 = vmul.f32 %v1729_v5, %v1579_v6 }
 0x8f6   :  { %v1647_v41 = vmul.f32 %v4403_v51, %v1641_v26  ;;  %v1728_v35 = vadd.f32 1.0, %v1722_v10  ;;  %v1640_v53 = vadd.f32 1.4214138, %v1634_v46 }
 0x8f7   :  { %v1595_v32 = vand.u32 2147483647, %v5284_v27  ;;  %v5291_v20 = vmul.f32 0.70710677, %v5287_v28  ;;  %vm1715_vm10 = vcmp.ge.f32.partialorder %v5284_v27, 0.0  ;;  %v1859_v27 = vsub.s32 4, %v4729_v24 }
 0x8f8   :  { %v1653_v38 = vadd.f32 -0.28449672, %v1647_v41  ;;  %v1734_v42 = vmul.f32 %v1728_v35, %v1578_v37  ;;  %v1646_v33 = vmul.f32 %v4407_v11, %v1640_v53  ;;  %v1581_v35 = vmul.f32 0.5, %v5265_v54 }
 0x8f9   :  { %v1601_v48 = vmul.f32 0.3275911, %v1595_v32  ;;  %v1594_v44 = vand.u32 2147483647, %v5291_v20  ;;  %v4411_v62 = vpop.eup %4410  ;;  %v1679_v61 = vsub.f32 0.0, %v1595_v32  ;;  %vm1714_vm11 = vcmp.ge.f32.partialorder %v5291_v20, 0.0 }
 0x8fa   :  { %v1659_v57 = vmul.f32 %v4403_v51, %v1653_v38  ;;  %4110 = vmatprep.mubr.f32.mxu0 %v1734_v42  ;;  %v1652_v47 = vadd.f32 -0.28449672, %v1646_v33  ;;  %v1860_v20 = vrot.slane %v5176_v14, %v1859_v27 }
 0x8fb   :  { %v1607_v58 = vadd.f32 1.0, %v1601_v48  ;;  %v1600_v60 = vmul.f32 0.3275911, %v1594_v44  ;;  %4111 = vmatmul.mubr.f32.vlgmr.msra.gmra.mxu0 %v1735_v3  ;;  %v1678_v63 = vsub.f32 0.0, %v1594_v44  ;;  %v1685_v22 = vmul.f32 %v1679_v61, %v1595_v32 }
 0x8fc   :  { %v1665_v0 = vadd.f32 0.2548296, %v1659_v57  ;;  %v1658_v34 = vmul.f32 %v4407_v11, %v1652_v47 }
 0x8fd   :  { %4412 = vrcp.f32 %v1607_v58  ;;  %v1606_v52 = vadd.f32 1.0, %v1600_v60  ;;  %v1684_v26 = vmul.f32 %v1678_v63, %v1594_v44  ;;  %v1696_v41 = vmul.f32 1.442695, %v1685_v22 }
 0x8fe   :  { %v1671_v40 = vmul.f32 %v4403_v51, %v1665_v0  ;;  %v1664_v45 = vadd.f32 0.2548296, %v1658_v34  ;;  %v1582_v22 = vmul.f32 0.5, %v5287_v28 }
 0x8ff   :  { %4414 = vrcp.f32 %v1606_v52  ;;  %v1694_v6 = vmul.f32 1.442695, %v1684_v26 }
 0x900   :  { %v1701_v15 = vmul.f32 %v4409_v9, %v1671_v40  ;;  %v1670_v43 = vmul.f32 %v4407_v11, %v1664_v45  ;;  %v1580_v11 = vmul.f32 0.5, %v5271_v7  ;;  %4416 = vpow2.f32 %v1696_v41 }
 0x901   :  { %4418 = vpow2.f32 %v1694_v6 }
 0x902   :  { %v1707_v49 = vsub.f32 1.0, %v1701_v15  ;;  %v1700_v8 = vmul.f32 %v4411_v62, %v1670_v43 }
 0x904   :  { %v1719_v12 = vsub.f32 0.0, %v1707_v49  ;;  %v1706_v13 = vsub.f32 1.0, %v1700_v8 }
 0x906   :  { %v1725_v23 = vsel %vm1713_vm8, %v1707_v49, %v1719_v12  ;;  %v1718_v17 = vsub.f32 0.0, %v1706_v13 }
 0x907   :  { %v1731_v46 = vadd.f32 1.0, %v1725_v23 }
 0x908   :  { %v1724_v10 = vsel %vm1712_vm9, %v1706_v13, %v1718_v17  ;;  %v1583_v17 = vmul.f32 0.5, %v5280_v19 }
 0x909   :  { %v1730_v5 = vadd.f32 1.0, %v1724_v10  ;;  %v1737_v32 = vmul.f32 %v1731_v46, %v1581_v35 }
 0x90a   :  { %v4413_v51 = vpop.eup %4412 }
 0x90b   :  { %v1625_v37 = vmul.f32 1.0614054, %v4413_v51  ;;  %v1736_v59 = vmul.f32 %v1730_v5, %v1580_v11 }
 0x90c   :  { %v4415_v53 = vpop.eup %4414 }
 0x90d   :  { %v1631_v38 = vadd.f32 -1.4531521, %v1625_v37  ;;  %v1624_v48 = vmul.f32 1.0614054, %v4415_v53  ;;  %4113 = vmatprep.mubr.f32.mxu0 %v1736_v59  ;;  %v4417_v34 = vpop.eup %4416 }
 0x90e   :  { %4114 = vmatmul.mubr.f32.gmra.mxu0 %v1737_v32  ;;  %v4419_v15 = vpop.eup %4418 }
 0x90f   :  { %v1637_v16 = vmul.f32 %v4413_v51, %v1631_v38  ;;  %v1630_v44 = vadd.f32 -1.4531521, %v1624_v48 }
 0x911   :  { %v1643_v42 = vadd.f32 1.4214138, %v1637_v16  ;;  %v1636_v33 = vmul.f32 %v4415_v53, %v1630_v44 }
 0x913   :  { %v1649_v7 = vmul.f32 %v4413_v51, %v1643_v42  ;;  %v1642_v57 = vadd.f32 1.4214138, %v1636_v33 }
 0x915   :  { %v1655_v3 = vadd.f32 -0.28449672, %v1649_v7  ;;  %v1648_v58 = vmul.f32 %v4415_v53, %v1642_v57 }
 0x917   :  { %v1661_v60 = vmul.f32 %v4413_v51, %v1655_v3  ;;  %v1654_v54 = vadd.f32 -0.28449672, %v1648_v58 }
 0x919   :  { %v1667_v47 = vadd.f32 0.2548296, %v1661_v60  ;;  %v1660_v0 = vmul.f32 %v4415_v53, %v1654_v54 }
 0x91b   :  { %v1673_v52 = vmul.f32 %v4413_v51, %v1667_v47  ;;  %v1666_v40 = vadd.f32 0.2548296, %v1660_v0 }
 0x91d   :  { %v1703_v9 = vmul.f32 %v4417_v34, %v1673_v52  ;;  %v1672_v45 = vmul.f32 %v4415_v53, %v1666_v40 }
 0x91f   :  { %v1709_v43 = vsub.f32 1.0, %v1703_v9  ;;  %v1702_v49 = vmul.f32 %v4419_v15, %v1672_v45 }
 0x921   :  { %v1721_v62 = vsub.f32 0.0, %v1709_v43  ;;  %v1708_v61 = vsub.f32 1.0, %v1702_v49 }
 0x923   :  { %v1727_v8 = vsel %vm1715_vm10, %v1709_v43, %v1721_v62  ;;  %v1720_v12 = vsub.f32 0.0, %v1708_v61 }
 0x924   :  { %v1733_v13 = vadd.f32 1.0, %v1727_v8  ;;  %v3636_v8 = vld [vmem:[%s5855_s4 + $0x38] sm:$0xff] }
 0x925   :  { %v1726_v63 = vsel %vm1714_vm11, %v1708_v61, %v1720_v12  ;;  %4119 = vmatprep.subr.mxu1 %v3636_v8  ;;  %v3635_v12 = vld [vmem:[%s5855_s4 + $0x30] sm:$0xff] }
 0x926   :  { %v1732_v23 = vadd.f32 1.0, %v1726_v63  ;;  %v1739_v26 = vmul.f32 %v1733_v13, %v1583_v17  ;;  %4120 = vmatpush3.msra.mxu1 %v3636_v8  ;;  %v3634_v63 = vld [vmem:[%s5855_s4 + $0x28] sm:$0xff]  ;;  %v3633_v13 = vld [vmem:[%s5855_s4 + $0x20] sm:$0xff] }
 0x927   :  { %4121 = vmatprep.subr.mxu1 %v3635_v12 }
 0x928   :  { %v1738_v51 = vmul.f32 %v1732_v23, %v1582_v22  ;;  %4122 = vmatpush3.msra.mxu1 %v3635_v12 }
 0x929   :  { %4123 = vmatprep.subr.mxu1 %v3634_v63 }
 0x92a   :  { %4116 = vmatprep.mubr.f32.mxu0 %v1738_v51  ;;  %4124 = vmatpush3.msra.mxu1 %v3634_v63 }
 0x92b   :  { %4117 = vmatmul.mubr.f32.gmra.mxu0 %v1739_v26  ;;  %4125 = vmatprep.subr.mxu1 %v3633_v13 }
 0x92c   :  { %4172 = vmatprep.mubr.msk.f32.mxu0 %vm4542_vm2, %v4540_v1  ;;  %4126 = vmatpush3.msra.mxu1 %v3633_v13 }
 0x92d   :  { %4136 = vmatprep.subr.mxu1 %v4540_v1 }
 0x9bb   :  { %v4112_v10 = vpop.f32.mrf.mxu0 }
 0x9bc   :  { %v1852_v46 = vadd.f32 %v4112_v10, %v5099_v30 }
 0x9bd   :  { %v1822_v28 = vpop.f32.mrf.mxu0 }
 0x9be   :  { %v5311_v11 = vadd.f32 %v1860_v20, %v1852_v46  ;;  %v1851_v19 = vadd.f32 %v1822_v28, %v5093_v2 }
 0x9c0   :  { %v5314_v41 = vadd.f32 %v1860_v20, %v1851_v19  ;;  %v1872_v5 = vsel %vm166_vm1, %v5311_v11, 0.0 }
 0x9c1   :  { %1873 = vadd.xlane.f32.xlu1 %v1872_v5 }
 0x9c2   :  { %v1869_v37 = vsel %vm166_vm1, %v5314_v41, 0.0 }
 0x9c3   :  { %1870 = vadd.xlane.f32.xlu0 %v1869_v37 }
 0x9ce   :  { %v4115_v35 = vpop.f32.mrf.mxu0 }
 0x9cf   :  { %v1854_v14 = vadd.f32 %v4115_v35, %v5111_v21 }
 0x9d0   :  { %v1832_v53 = vpop.f32.mrf.mxu0 }
 0x9d1   :  { %v5321_v30 = vadd.f32 %v1860_v20, %v1854_v14  ;;  %v1853_v59 = vadd.f32 %v1832_v53, %v5105_v18 }
 0x9d3   :  { %v5324_v38 = vadd.f32 %v1860_v20, %v1853_v59  ;;  %v1878_v2 = vsel %vm166_vm1, %v5321_v30, 0.0 }
 0x9d4   :  { %1879 = vadd.xlane.f32.xlu1 %v1878_v2  ;;  %v3632_v2 = vld [vmem:[%s5854_s3 + $0x8] sm:$0xff] }
 0x9d5   :  { %v1875_v6 = vsel %vm166_vm1, %v5324_v38, 0.0 }
 0x9d6   :  { %1876 = vadd.xlane.f32.xlu0 %v1875_v6  ;;  %v1950_v6 = vrot.slane %v3632_v2, %v248_v31 }
 0x9eb   :  { %v4118_v32 = vpop.f32.mrf.mxu0 }
 0x9ec   :  { %v1856_v48 = vadd.f32 %v4118_v32, %v5123_v29 }
 0x9ed   :  { %v1842_v16 = vpop.f32.mrf.mxu0 }
 0x9ee   :  { %v5331_v21 = vadd.f32 %v1860_v20, %v1856_v48  ;;  %v1855_v44 = vadd.f32 %v1842_v16, %v5117_v25  ;;  %v1960_v48 = vrot.slane %v3632_v2, %v258_v36 }
 0x9f0   :  { %v5334_v42 = vadd.f32 %v1860_v20, %v1855_v44  ;;  %v1884_v18 = vsel %vm166_vm1, %v5331_v21, 0.0 }
 0x9f1   :  { %1885 = vadd.xlane.f32.xlu1 %v1884_v18 }
 0x9f2   :  { %v1881_v33 = vsel %vm166_vm1, %v5334_v42, 0.0 }
 0x9f3   :  { %1882 = vadd.xlane.f32.xlu0 %v1881_v33 }
 0xa4a   :  { %v1874_v7 = vpop.xlane.xlu1 %1873 }
 0xa4b   :  { %v1888_v57 = vmul.f32 0.03125, %v1874_v7 }
 0xa4c   :  { %v1871_v3 = vpop.xlane.xlu0 %1870 }
 0xa4d   :  { %v1894_v29 = vsub.f32 %v5311_v11, %v1888_v57  ;;  %v1887_v58 = vmul.f32 0.03125, %v1871_v3 }
 0xa4f   :  { %v1893_v60 = vsub.f32 %v5314_v41, %v1887_v58  ;;  %v1900_v54 = vmul.f32 %v1894_v29, %v1894_v29 }
 0xa51   :  { %v1908_v25 = vsel %vm166_vm1, %v1900_v54, 0.0  ;;  %v1899_v47 = vmul.f32 %v1893_v60, %v1893_v60 }
 0xa52   :  { %1909 = vadd.xlane.f32.xlu1 %v1908_v25 }
 0xa53   :  { %v1905_v0 = vsel %vm166_vm1, %v1899_v47, 0.0 }
 0xa54   :  { %1906 = vadd.xlane.f32.xlu0 %v1905_v0 }
 0xa5d   :  { %v1880_v52 = vpop.xlane.xlu1 %1879 }
 0xa5e   :  { %v1890_v34 = vmul.f32 0.03125, %v1880_v52 }
 0xa5f   :  { %v1877_v40 = vpop.xlane.xlu0 %1876 }
 0xa60   :  { %v5345_v9 = vsub.f32 %v5321_v30, %v1890_v34  ;;  %v1889_v45 = vmul.f32 0.03125, %v1877_v40 }
 0xa62   :  { %v5348_v15 = vsub.f32 %v5324_v38, %v1889_v45  ;;  %v1902_v43 = vmul.f32 %v5345_v9, %v5345_v9 }
 0xa64   :  { %v1914_v49 = vsel %vm166_vm1, %v1902_v43, 0.0  ;;  %v1901_v62 = vmul.f32 %v5348_v15, %v5348_v15 }
 0xa65   :  { %1915 = vadd.xlane.f32.xlu1 %v1914_v49 }
 0xa66   :  { %v1911_v61 = vsel %vm166_vm1, %v1901_v62, 0.0 }
 0xa67   :  { %1912 = vadd.xlane.f32.xlu0 %v1911_v61 }
 0xa7a   :  { %v1886_v22 = vpop.xlane.xlu1 %1885 }
 0xa7b   :  { %v1892_v23 = vmul.f32 0.03125, %v1886_v22 }
 0xa7c   :  { %v1883_v17 = vpop.xlane.xlu0 %1882 }
 0xa7d   :  { %v1898_v51 = vsub.f32 %v5331_v21, %v1892_v23  ;;  %v1891_v26 = vmul.f32 0.03125, %v1883_v17 }
 0xa7f   :  { %v1897_v20 = vsub.f32 %v5334_v42, %v1891_v26  ;;  %v1904_v10 = vmul.f32 %v1898_v51, %v1898_v51 }
 0xa81   :  { %v1920_v46 = vsel %vm166_vm1, %v1904_v10, 0.0  ;;  %v1903_v28 = vmul.f32 %v1897_v20, %v1897_v20 }
 0xa82   :  { %1921 = vadd.xlane.f32.xlu1 %v1920_v46  ;;  %v1975_v46 = vrot.slane %v3632_v2, %v272_v56 }
 0xa83   :  { %v1917_v19 = vsel %vm166_vm1, %v1903_v28, 0.0 }
 0xa84   :  { %1918 = vadd.xlane.f32.xlu0 %v1917_v19 }
 0xadb   :  { %v1910_v5 = vpop.xlane.xlu1 %1909 }
 0xadc   :  { %v1924_v37 = vmul.f32 0.03125, %v1910_v5 }
 0xadd   :  { %v1907_v35 = vpop.xlane.xlu0 %1906 }
 0xade   :  { %v1930_v14 = vadd.f32 1e-05, %v1924_v37  ;;  %v1923_v53 = vmul.f32 0.03125, %v1907_v35 }
 0xae0   :  { %4420 = vrsqrt.f32 %v1930_v14  ;;  %v1929_v59 = vadd.f32 1e-05, %v1923_v53 }
 0xae2   :  { %4422 = vrsqrt.f32 %v1929_v59 }
 0xaed   :  { %v4421_v32 = vpop.eup %4420 }
 0xaee   :  { %v1942_v16 = vmul.f32 %v4421_v32, %v1894_v29  ;;  %v1916_v44 = vpop.xlane.xlu1 %1915 }
 0xaef   :  { %v4423_v18 = vpop.eup %4422  ;;  %v1926_v33 = vmul.f32 0.03125, %v1916_v44 }
 0xaf0   :  { %v1952_v7 = vmul.f32 %v1950_v6, %v1942_v16  ;;  %v1913_v57 = vpop.xlane.xlu0 %1912  ;;  %v1941_v3 = vmul.f32 %v4423_v18, %v1893_v60 }
 0xaf1   :  { %v1932_v58 = vadd.f32 1e-05, %v1926_v33  ;;  %v1925_v54 = vmul.f32 0.03125, %v1913_v57 }
 0xaf2   :  { %v1951_v25 = vmul.f32 %v1950_v6, %v1941_v3  ;;  %v1962_v47 = vadd.f32 %v1960_v48, %v1952_v7 }
 0xaf3   :  { %4424 = vrsqrt.f32 %v1932_v58  ;;  %v1931_v0 = vadd.f32 1e-05, %v1925_v54 }
 0xaf4   :  { %v1961_v52 = vadd.f32 %v1960_v48, %v1951_v25 }
 0xaf5   :  { %4426 = vrsqrt.f32 %v1931_v0 }
 0xaf6   :  { %4127 = vmatprep.mubr.msk.f32.mxu1 %vm166_vm1, %v1961_v52 }
 0xaf7   :  { %4128 = vmatmul.mubr.msk.f32.vlgmr.msra.gmra.mxu1 %vm166_vm1, %v1962_v47 }
 0xb00   :  { %v4425_v31 = vpop.eup %4424 }
 0xb01   :  { %v1944_v36 = vmul.f32 %v4425_v31, %v5345_v9 }
 0xb02   :  { %v4427_v29 = vpop.eup %4426 }
 0xb03   :  { %v1943_v34 = vmul.f32 %v4427_v29, %v5348_v15  ;;  %v1954_v40 = vmul.f32 %v1950_v6, %v1944_v36 }
 0xb05   :  { %v1953_v60 = vmul.f32 %v1950_v6, %v1943_v34  ;;  %v1964_v45 = vadd.f32 %v1960_v48, %v1954_v40 }
 0xb07   :  { %v1963_v43 = vadd.f32 %v1960_v48, %v1953_v60 }
 0xb09   :  { %4130 = vmatprep.mubr.msk.f32.mxu1 %vm166_vm1, %v1963_v43 }
 0xb0a   :  { %4131 = vmatmul.mubr.msk.f32.gmra.mxu1 %vm166_vm1, %v1964_v45 }
 0xb0b   :  { %v1922_v49 = vpop.xlane.xlu1 %1921 }
 0xb0c   :  { %v1928_v62 = vmul.f32 0.03125, %v1922_v49 }
 0xb0d   :  { %v1919_v61 = vpop.xlane.xlu0 %1918 }
 0xb0e   :  { %v1934_v8 = vadd.f32 1e-05, %v1928_v62  ;;  %v1927_v12 = vmul.f32 0.03125, %v1919_v61 }
 0xb10   :  { %4428 = vrsqrt.f32 %v1934_v8  ;;  %v1933_v63 = vadd.f32 1e-05, %v1927_v12 }
 0xb12   :  { %4430 = vrsqrt.f32 %v1933_v63 }
 0xb1d   :  { %v4429_v9 = vpop.eup %4428 }
 0xb1e   :  { %v1946_v13 = vmul.f32 %v4429_v9, %v1898_v51 }
 0xb1f   :  { %v4431_v22 = vpop.eup %4430 }
 0xb20   :  { %v1945_v15 = vmul.f32 %v4431_v22, %v1897_v20  ;;  %v1956_v23 = vmul.f32 %v1950_v6, %v1946_v13 }
 0xb22   :  { %v1955_v17 = vmul.f32 %v1950_v6, %v1945_v15  ;;  %v1966_v26 = vadd.f32 %v1960_v48, %v1956_v23 }
 0xb24   :  { %v1965_v10 = vadd.f32 %v1960_v48, %v1955_v17 }
 0xb26   :  { %4133 = vmatprep.mubr.msk.f32.mxu1 %vm166_vm1, %v1965_v10 }
 0xb27   :  { %4134 = vmatmul.mubr.msk.f32.gmra.mxu1 %vm166_vm1, %v1966_v26 }
 0xb28   :  { %4142 = vmatprep.mubr.msk.f32.mxu1 %vm4542_vm2, %v4540_v1 }
 0xbb7   :  { %v4129_v28 = vpop.f32.mrf.mxu1 }
 0xbb8   :  { %v2066_v19 = vadd.f32 %v4129_v28, %v1975_v46 }
 0xbb9   :  { %v2060_v5 = vpop.f32.mrf.mxu1 }
 0xbba   :  { %2094 = vrot.lane.b32.xlu1 %v2066_v19, %s4541_s1  ;;  %v2061_v51 = vadd.f32 %v2060_v5, %v1975_v46 }
 0xbbe   :  { %2092 = vrot.lane.b32.xlu1 %v2061_v51, %s4541_s1 }
 0xbca   :  { %v4132_v20 = vpop.f32.mrf.mxu1 }
 0xbcb   :  { %v5407_v59 = vadd.f32 %v4132_v20, %v1975_v46 }
 0xbcc   :  { %v2070_v37 = vpop.f32.mrf.mxu1 }
 0xbcd   :  { %v2071_v35 = vadd.f32 %v2070_v37, %v1975_v46 }
 0xbcf   :  { %2331 = vrot.lane.b32.xlu1 %v2071_v35, %s4543_s25  ;;  %2096 = vrot.lane.b32.xlu0 %v2071_v35, %s4541_s1 }
 0xbd3   :  { %2327 = vrot.lane.b32.xlu1 %v2061_v51, %s4543_s25  ;;  %2329 = vrot.lane.b32.xlu0 %v2066_v19, %s4543_s25 }
 0xbd7   :  { %2321 = vrot.lane.b32.xlu0 %v2061_v51, %s4544_s26 }
 0xbdb   :  { %2323 = vrot.lane.b32.xlu0 %v2066_v19, %s4544_s26 }
 0xbdf   :  { %2325 = vrot.lane.b32.xlu0 %v2071_v35, %s4544_s26 }
 0xbe7   :  { %v4135_v56 = vpop.f32.mrf.mxu1 }
 0xbe8   :  { %v5401_v14 = vadd.f32 %v4135_v56, %v1975_v46 }
 0xbe9   :  { %v2080_v53 = vpop.f32.mrf.mxu1 }
 0xbea   :  { %2813 = vrot.lane.b32.xlu0 %v5401_v14, %s4543_s25  ;;  %2578 = vrot.lane.b32.xlu1 %v5401_v14, %s4541_s1  ;;  %v5409_v2 = vadd.f32 %v2080_v53, %v1975_v46 }
 0xbee   :  { %2809 = vrot.lane.b32.xlu0 %v5407_v59, %s4543_s25  ;;  %2576 = vrot.lane.b32.xlu1 %v5409_v2, %s4541_s1 }
 0xbf2   :  { %2805 = vrot.lane.b32.xlu0 %v5409_v2, %s4544_s26  ;;  %2574 = vrot.lane.b32.xlu1 %v5407_v59, %s4541_s1 }
 0xbf6   :  { %2227 = vrot.lane.b32.xlu0 %v2071_v35, %s4545_s27  ;;  %2811 = vrot.lane.b32.xlu1 %v5409_v2, %s4543_s25 }
 0xbfa   :  { %2462 = vrot.lane.b32.xlu0 %v2071_v35, %s4546_s28  ;;  %2803 = vrot.lane.b32.xlu1 %v5407_v59, %s4544_s26 }
 0xbfe   :  { %2458 = vrot.lane.b32.xlu0 %v2061_v51, %s4546_s28  ;;  %2807 = vrot.lane.b32.xlu1 %v5401_v14, %s4544_s26 }
 0xc02   :  { %2225 = vrot.lane.b32.xlu1 %v2066_v19, %s4545_s27 }
 0xc06   :  { %2223 = vrot.lane.b32.xlu1 %v2061_v51, %s4545_s27 }
 0xc0a   :  { %2460 = vrot.lane.b32.xlu1 %v2066_v19, %s4546_s28 }
 0xc2c   :  { %v2095_v6 = vpop.permute.xlu1 %2094 }
 0xc30   :  { %v2093_v32 = vpop.permute.xlu1 %2092 }
 0xc41   :  { %v2332_v48 = vpop.permute.xlu1 %2331  ;;  %v2097_v16 = vpop.permute.xlu0 %2096 }
 0xc42   :  { %4137 = vmatpush3.xpose.msk.msra.mxu1 %vm396_vm3, %v2097_v16  ;;  %4167 = vmatpush3.xpose.msk.msra.mxu0 %vm396_vm3, %v2332_v48 }
 0xc43   :  { %4168 = vmatprep.subr.mxu0 %v4540_v1  ;;  %4138 = vmatprep.subr.mxu1 %v4540_v1 }
 0xc45   :  { %v2330_v44 = vpop.permute.xlu0 %2329  ;;  %v2328_v18 = vpop.permute.xlu1 %2327 }
 0xc46   :  { %4139 = vmatpush3.xpose.msk.msra.mxu1 %vm396_vm3, %v2095_v6  ;;  %4169 = vmatpush3.xpose.msk.msra.mxu0 %vm396_vm3, %v2330_v44 }
 0xc47   :  { %4140 = vmatprep.subr.mxu1 %v4540_v1  ;;  %4170 = vmatprep.subr.mxu0 %v4540_v1 }
 0xc49   :  { %v2322_v33 = vpop.permute.xlu0 %2321 }
 0xc4a   :  { %4141 = vmatpush3.xpose.msk.msra.mxu1 %vm396_vm3, %v2093_v32  ;;  %4171 = vmatpush3.xpose.msk.msra.mxu0 %vm396_vm3, %v2328_v18 }
 0xc4b   :  { %4196 = vmatprep.subr.mxu0 %v4540_v1  ;;  %4151 = vmatprep.subr.mxu1 %v4540_v1 }
 0xc4d   :  { %4143 = vmatmul.mubr.msk.f32.vlgmr.msra.gmra.mxu1 %vm396_vm3, %v2061_v51  ;;  %4173 = vmatmul.mubr.msk.f32.vlgmr.msra.gmra.mxu0 %vm396_vm3, %v2322_v33  ;;  %v2324_v7 = vpop.permute.xlu0 %2323 }
 0xc4e   :  { %4145 = vmatprep.mubr.msk.f32.mxu1 %vm4542_vm2, %v4540_v1  ;;  %4175 = vmatprep.mubr.msk.f32.mxu0 %vm4542_vm2, %v4540_v1 }
 0xc51   :  { %4146 = vmatmul.mubr.msk.f32.gmra.mxu1 %vm396_vm3, %v2066_v19  ;;  %4176 = vmatmul.mubr.msk.f32.gmra.mxu0 %vm396_vm3, %v2324_v7  ;;  %v2326_v57 = vpop.permute.xlu0 %2325 }
 0xc52   :  { %4148 = vmatprep.mubr.msk.f32.mxu1 %vm4542_vm2, %v4540_v1  ;;  %4178 = vmatprep.mubr.msk.f32.mxu0 %vm4542_vm2, %v4540_v1 }
 0xc55   :  { %4149 = vmatmul.mubr.msk.f32.gmra.mxu1 %vm396_vm3, %v2071_v35  ;;  %4179 = vmatmul.mubr.msk.f32.gmra.mxu0 %vm396_vm3, %v2326_v57 }
 0xc56   :  { %4202 = vmatprep.mubr.msk.f32.mxu0 %vm4542_vm2, %v4540_v1  ;;  %4157 = vmatprep.mubr.msk.f32.mxu1 %vm4542_vm2, %v4540_v1 }
 0xc5c   :  { %v2579_v3 = vpop.permute.xlu1 %2578  ;;  %v2814_v58 = vpop.permute.xlu0 %2813 }
 0xc5d   :  { %4197 = vmatpush3.xpose.msk.msra.mxu0 %vm396_vm3, %v2579_v3 }
 0xc5e   :  { %4198 = vmatprep.subr.mxu0 %v4540_v1 }
 0xc60   :  { %v2577_v54 = vpop.permute.xlu1 %2576  ;;  %v2810_v25 = vpop.permute.xlu0 %2809 }
 0xc61   :  { %4199 = vmatpush3.xpose.msk.msra.mxu0 %vm396_vm3, %v2577_v54 }
 0xc62   :  { %4200 = vmatprep.subr.mxu0 %v4540_v1 }
 0xc64   :  { %v2575_v47 = vpop.permute.xlu1 %2574  ;;  %v2806_v0 = vpop.permute.xlu0 %2805 }
 0xc65   :  { %4201 = vmatpush3.xpose.msk.msra.mxu0 %vm396_vm3, %v2575_v47 }
 0xc66   :  { %4226 = vmatprep.subr.mxu0 %v4540_v1 }
 0xc68   :  { %v2812_v52 = vpop.permute.xlu1 %2811  ;;  %4203 = vmatmul.mubr.msk.f32.vlgmr.msra.gmra.mxu0 %vm396_vm3, %v5407_v59  ;;  %v2228_v31 = vpop.permute.xlu0 %2227 }
 0xc69   :  { %4152 = vmatpush3.msra.mxu1 %v2228_v31  ;;  %4227 = vmatpush3.xpose.msk.msra.mxu0 %vm396_vm3, %v2814_v58 }
 0xc6a   :  { %4205 = vmatprep.mubr.msk.f32.mxu0 %vm4542_vm2, %v4540_v1  ;;  %4228 = vmatprep.subr.mxu0 %v4540_v1 }
 0xc6b   :  { %4153 = vmatprep.subr.mxu1 %v4540_v1 }
 0xc6c   :  { %v2804_v36 = vpop.permute.xlu1 %2803  ;;  %4206 = vmatmul.mubr.msk.f32.gmra.mxu0 %vm396_vm3, %v5409_v2 }
 0xc6d   :  { %4229 = vmatpush3.xpose.msk.msra.mxu0 %vm396_vm3, %v2812_v52  ;;  %4208 = vmatprep.mubr.msk.f32.mxu0 %vm4542_vm2, %v4540_v1 }
 0xc6e   :  { %4230 = vmatprep.subr.mxu0 %v4540_v1 }
 0xc70   :  { %v2808_v29 = vpop.permute.xlu1 %2807  ;;  %4209 = vmatmul.mubr.msk.f32.gmra.mxu0 %vm396_vm3, %v5401_v14 }
 0xc71   :  { %4231 = vmatpush3.xpose.msk.msra.mxu0 %vm396_vm3, %v2810_v25  ;;  %4232 = vmatprep.mubr.msk.f32.mxu0 %vm4542_vm2, %v4540_v1 }
 0xc74   :  { %v2226_v34 = vpop.permute.xlu1 %2225  ;;  %4233 = vmatmul.mubr.msk.f32.vlgmr.msra.gmra.mxu0 %vm396_vm3, %v2804_v36 }
 0xc75   :  { %4154 = vmatpush3.msra.mxu1 %v2226_v34  ;;  %4235 = vmatprep.mubr.msk.f32.mxu0 %vm4542_vm2, %v4540_v1 }
 0xc76   :  { %4155 = vmatprep.subr.mxu1 %v4540_v1 }
 0xc78   :  { %v2224_v40 = vpop.permute.xlu1 %2223  ;;  %4236 = vmatmul.mubr.msk.f32.gmra.mxu0 %vm396_vm3, %v2806_v0 }
 0xc79   :  { %4156 = vmatpush3.msra.mxu1 %v2224_v40  ;;  %4238 = vmatprep.mubr.msk.f32.mxu0 %vm4542_vm2, %v4540_v1 }
 0xc7a   :  { %4181 = vmatprep.subr.mxu1 %v4540_v1 }
 0xc7c   :  { %4239 = vmatmul.mubr.msk.f32.gmra.mxu0 %vm396_vm3, %v2808_v29 }
 0xd0d   :  { %v2176_v60 = vpop.f32.mrf.mxu1  ;;  %v2411_v45 = vpop.f32.mrf.mxu0 }
 0xd0e   :  { %v5495_v43 = vadd.f32 %v2176_v60, %v4884_v50  ;;  %v5498_v61 = vadd.f32 %v2411_v45, %v4884_v50  ;;  %v5555_v60 = vpop.permute.xlu0 %2462 }
 0xd0f   :  { %v4144_v49 = vpop.f32.mrf.mxu1  ;;  %v4174_v62 = vpop.f32.mrf.mxu0 }
 0xd10   :  { %v2190_v8 = vsel %vm489_vm5, %v5495_v43, -inf  ;;  %v2425_v17 = vsel %vm489_vm5, %v5498_v61, -inf  ;;  %v5559_v49 = vpop.permute.xlu1 %2460 }
 0xd11   :  { %2191 = vmax.xlane.f32.xlu0 %v2190_v8  ;;  %v2181_v12 = vpop.f32.mrf.mxu1  ;;  %v2416_v63 = vpop.f32.mrf.mxu0 }
 0xd12   :  { %v5503_v9 = vadd.f32 %v2181_v12, %v4884_v50  ;;  %v5506_v15 = vadd.f32 %v2416_v63, %v4884_v50  ;;  %v5557_v45 = vpop.permute.xlu0 %2458 }
 0xd13   :  { %v4147_v13 = vpop.f32.mrf.mxu1  ;;  %v4177_v22 = vpop.f32.mrf.mxu0 }
 0xd14   :  { %v2193_v23 = vsel %vm489_vm5, %v5503_v9, -inf  ;;  %v2428_v51 = vsel %vm489_vm5, %v5506_v15, -inf }
 0xd15   :  { %2194 = vmax.xlane.f32.xlu1 %v2193_v23  ;;  %v2186_v26 = vpop.f32.mrf.mxu1  ;;  %2426 = vmax.xlane.f32.xlu0 %v2425_v17  ;;  %v2421_v10 = vpop.f32.mrf.mxu0 }
 0xd16   :  { %v5513_v46 = vadd.f32 %v2421_v10, %v4884_v50  ;;  %v2187_v5 = vadd.f32 %v2186_v26, %v4884_v50 }
 0xd17   :  { %v4150_v28 = vpop.f32.mrf.mxu1  ;;  %v4180_v19 = vpop.f32.mrf.mxu0 }
 0xd18   :  { %v2431_v20 = vsel %vm489_vm5, %v5513_v46, -inf  ;;  %v2196_v37 = vsel %vm489_vm5, %v2187_v5, -inf }
 0xd19   :  { %2429 = vmax.xlane.f32.xlu0 %v2428_v51  ;;  %2432 = vmax.xlane.f32.xlu1 %v2431_v20 }
 0xd1d   :  { %2197 = vmax.xlane.f32.xlu0 %v2196_v37 }
 0xd28   :  { %v2658_v35 = vpop.f32.mrf.mxu0 }
 0xd29   :  { %v5522_v56 = vadd.f32 %v2658_v35, %v4884_v50 }
 0xd2a   :  { %v4204_v53 = vpop.f32.mrf.mxu0 }
 0xd2b   :  { %v2672_v6 = vsel %vm489_vm5, %v5522_v56, -inf }
 0xd2c   :  { %2673 = vmax.xlane.f32.xlu0 %v2672_v6  ;;  %v2663_v32 = vpop.f32.mrf.mxu0 }
 0xd2d   :  { %v5527_v48 = vadd.f32 %v2663_v32, %v4884_v50 }
 0xd2e   :  { %v4207_v16 = vpop.f32.mrf.mxu0 }
 0xd2f   :  { %v2675_v44 = vsel %vm489_vm5, %v5527_v48, -inf }
 0xd30   :  { %2676 = vmax.xlane.f32.xlu1 %v2675_v44  ;;  %v2668_v18 = vpop.f32.mrf.mxu0 }
 0xd31   :  { %v5532_v33 = vadd.f32 %v2668_v18, %v4884_v50 }
 0xd32   :  { %v4210_v7 = vpop.f32.mrf.mxu0 }
 0xd33   :  { %v2678_v57 = vsel %vm489_vm5, %v5532_v33, -inf }
 0xd34   :  { %2679 = vmax.xlane.f32.xlu0 %v2678_v57  ;;  %v2893_v3 = vpop.f32.mrf.mxu0 }
 0xd35   :  { %v5537_v58 = vadd.f32 %v2893_v3, %v4884_v50 }
 0xd36   :  { %v4234_v54 = vpop.f32.mrf.mxu0 }
 0xd37   :  { %v2907_v25 = vsel %vm489_vm5, %v5537_v58, -inf }
 0xd38   :  { %2908 = vmax.xlane.f32.xlu1 %v2907_v25  ;;  %v2898_v47 = vpop.f32.mrf.mxu0 }
 0xd39   :  { %v5542_v0 = vadd.f32 %v2898_v47, %v4884_v50 }
 0xd3a   :  { %v4237_v52 = vpop.f32.mrf.mxu0 }
 0xd3b   :  { %v2910_v31 = vsel %vm489_vm5, %v5542_v0, -inf }
 0xd3c   :  { %2911 = vmax.xlane.f32.xlu0 %v2910_v31  ;;  %v2903_v36 = vpop.f32.mrf.mxu0 }
 0xd3d   :  { %v5551_v34 = vadd.f32 %v2903_v36, %v4884_v50 }
 0xd3e   :  { %v4240_v29 = vpop.f32.mrf.mxu0 }
 0xd3f   :  { %v2913_v40 = vsel %vm489_vm5, %v5551_v34, -inf }
 0xd49   :  { %2707 = vrot.lane.b32.xlu1 %v5409_v2, %s4545_s27 }
 0xd52   :  { %2709 = vrot.lane.b32.xlu0 %v5401_v14, %s4545_s27 }
 0xd6d   :  { %2914 = vmax.xlane.f32.xlu1 %v2913_v40 }
 0xd9a   :  { %v2192_v62 = vpop.xlane.xlu0 %2191 }
 0xd9b   :  { %v2199_v8 = vsub.f32 %v5495_v43, %v2192_v62 }
 0xd9d   :  { %v2202_v12 = vmul.f32 1.442695, %v2199_v8 }
 0xd9e   :  { %v2195_v63 = vpop.xlane.xlu1 %2194  ;;  %v2427_v13 = vpop.xlane.xlu0 %2426 }
 0xd9f   :  { %4432 = vpow2.f32 %v2202_v12  ;;  %v2200_v50 = vsub.f32 %v5503_v9, %v2195_v63  ;;  %v2434_v22 = vsub.f32 %v5498_v61, %v2427_v13 }
 0xda1   :  { %v2437_v23 = vmul.f32 1.442695, %v2434_v22  ;;  %v2204_v17 = vmul.f32 1.442695, %v2200_v50 }
 0xda2   :  { %v2430_v26 = vpop.xlane.xlu0 %2429  ;;  %v2433_v16 = vpop.xlane.xlu1 %2432 }
 0xda3   :  { %v2435_v10 = vsub.f32 %v5506_v15, %v2430_v26  ;;  %4434 = vpow2.f32 %v2437_v23  ;;  %v2436_v18 = vsub.f32 %v5513_v46, %v2433_v16 }
 0xda4   :  { %4436 = vpow2.f32 %v2204_v17 }
 0xda5   :  { %v2439_v28 = vmul.f32 1.442695, %v2435_v10  ;;  %v2441_v54 = vmul.f32 1.442695, %v2436_v18 }
 0xda6   :  { %v2198_v19 = vpop.xlane.xlu0 %2197 }
 0xda7   :  { %v2201_v51 = vsub.f32 %v2187_v5, %v2198_v19  ;;  %4438 = vpow2.f32 %v2439_v28 }
 0xda9   :  { %v2206_v43 = vmul.f32 1.442695, %v2201_v51 }
 0xdab   :  { %4440 = vpow2.f32 %v2206_v43 }
 0xdac   :  { %v5565_v20 = vpop.eup %4432  ;;  %4442 = vpow2.f32 %v2441_v54 }
 0xdad   :  { %v2208_v9 = vsel %vm489_vm5, %v5565_v20, 0.0 }
 0xdae   :  { %2209 = vadd.xlane.f32.xlu0 %v2208_v9 }
 0xdb0   :  { %v5569_v61 = vpop.eup %4434 }
 0xdb1   :  { %v2443_v37 = vsel %vm489_vm5, %v5569_v61, 0.0  ;;  %v5573_v15 = vpop.eup %4436 }
 0xdb2   :  { %2444 = vadd.xlane.f32.xlu1 %v2443_v37  ;;  %v2211_v5 = vsel %vm489_vm5, %v5573_v15, 0.0 }
 0xdb4   :  { %v5575_v35 = vpop.eup %4438 }
 0xdb5   :  { %v2446_v53 = vsel %vm489_vm5, %v5575_v35, 0.0  ;;  %v2674_v44 = vpop.xlane.xlu0 %2673 }
 0xdb6   :  { %2212 = vadd.xlane.f32.xlu1 %v2211_v5  ;;  %2447 = vadd.xlane.f32.xlu0 %v2446_v53  ;;  %v2681_v3 = vsub.f32 %v5522_v56, %v2674_v44 }
 0xdb8   :  { %v5581_v6 = vpop.eup %4440  ;;  %v2684_v52 = vmul.f32 1.442695, %v2681_v3 }
 0xdb9   :  { %v2214_v32 = vsel %vm489_vm5, %v5581_v6, 0.0  ;;  %v2677_v7 = vpop.xlane.xlu1 %2676 }
 0xdba   :  { %2215 = vadd.xlane.f32.xlu0 %v2214_v32  ;;  %v2682_v25 = vsub.f32 %v5527_v48, %v2677_v7  ;;  %4444 = vpow2.f32 %v2684_v52  ;;  %v5595_v48 = vpop.eup %4442 }
 0xdbd   :  { %v2680_v57 = vpop.xlane.xlu0 %2679 }
 0xdbe   :  { %v2683_v31 = vsub.f32 %v5532_v33, %v2680_v57  ;;  %v2449_v33 = vsel %vm489_vm5, %v5595_v48, 0.0 }
 0xdc0   :  { %v2688_v40 = vmul.f32 1.442695, %v2683_v31 }
 0xdc1   :  { %v2909_v29 = vpop.xlane.xlu1 %2908 }
 0xdc2   :  { %v2916_v46 = vsub.f32 %v5537_v58, %v2909_v29 }
 0xdc4   :  { %v2919_v56 = vmul.f32 1.442695, %v2916_v46 }
 0xdc5   :  { %v2912_v47 = vpop.xlane.xlu0 %2911  ;;  %v2708_v50 = vpop.permute.xlu1 %2707 }
 0xdc6   :  { %v2917_v36 = vsub.f32 %v5542_v0, %v2912_v47 }
 0xdc7   :  { %2944 = vrot.lane.b32.xlu1 %v5401_v14, %s4546_s28  ;;  %v2686_v14 = vmul.f32 1.442695, %v2682_v25  ;;  %v5597_v8 = vpop.eup %4444 }
 0xdc8   :  { %v2921_v62 = vmul.f32 1.442695, %v2917_v36  ;;  %v2690_v63 = vsel %vm489_vm5, %v5597_v8, 0.0 }
 0xdc9   :  { %4446 = vpow2.f32 %v2686_v14  ;;  %v2710_v9 = vpop.permute.xlu0 %2709 }
 0xdca   :  { %4448 = vpow2.f32 %v2688_v40 }
 0xdcb   :  { %4450 = vpow2.f32 %v2921_v62 }
 0xdcc   :  { %4452 = vpow2.f32 %v2919_v56 }
 0xdd0   :  { %2705 = vrot.lane.b32.xlu0 %v5407_v59, %s4545_s27 }
 0xdd6   :  { %v5601_v12 = vpop.eup %4446 }
 0xdd7   :  { %v5603_v0 = vpop.eup %4448  ;;  %v2693_v58 = vsel %vm489_vm5, %v5601_v12, 0.0 }
 0xdd8   :  { %v5609_v13 = vpop.eup %4450  ;;  %v2696_v22 = vsel %vm489_vm5, %v5603_v0, 0.0 }
 0xdd9   :  { %v2928_v23 = vsel %vm489_vm5, %v5609_v13, 0.0  ;;  %v5615_v17 = vpop.eup %4452 }
 0xdda   :  { %v2925_v28 = vsel %vm489_vm5, %v5615_v17, 0.0 }
 0xdeb   :  { %2450 = vadd.xlane.f32.xlu1 %v2449_v33 }
 0xdef   :  { %2694 = vadd.xlane.f32.xlu0 %v2693_v58  ;;  %2691 = vadd.xlane.f32.xlu1 %v2690_v63 }
 0xdf3   :  { %2697 = vadd.xlane.f32.xlu1 %v2696_v22  ;;  %2929 = vadd.xlane.f32.xlu0 %v2928_v23 }
 0xdf6   :  { %v2915_v26 = vpop.xlane.xlu1 %2914 }
 0xdf7   :  { %v2918_v10 = vsub.f32 %v5551_v34, %v2915_v26  ;;  %2926 = vadd.xlane.f32.xlu1 %v2925_v28 }
 0xdf9   :  { %v2923_v19 = vmul.f32 1.442695, %v2918_v10 }
 0xdfb   :  { %4454 = vpow2.f32 %v2923_v19 }
 0xe08   :  { %v5620_v51 = vpop.eup %4454 }
 0xe09   :  { %v2931_v43 = vsel %vm489_vm5, %v5620_v51, 0.0  ;;  %2942 = vrot.lane.b32.xlu0 %v5409_v2, %s4546_s28 }
 0xe0a   :  { %2932 = vadd.xlane.f32.xlu1 %v2931_v43 }
 0xe1b   :  { %2940 = vrot.lane.b32.xlu1 %v5407_v59, %s4546_s28 }
 0xe37   :  { %v2210_v34 = vpop.xlane.xlu0 %2209 }
 0xe38   :  { %4456 = vrcp.f32 %v2210_v34 }
 0xe3b   :  { %v2445_v37 = vpop.xlane.xlu1 %2444 }
 0xe3f   :  { %v2213_v5 = vpop.xlane.xlu1 %2212  ;;  %v2448_v53 = vpop.xlane.xlu0 %2447 }
 0xe40   :  { %4458 = vrcp.f32 %v2213_v5 }
 0xe43   :  { %v2216_v32 = vpop.xlane.xlu0 %2215 }
 0xe44   :  { %4460 = vrcp.f32 %v2216_v32 }
 0xe45   :  { %v4457_v16 = vpop.eup %4456  ;;  %4462 = vrcp.f32 %v2445_v37 }
 0xe46   :  { %v2220_v44 = vmul.f32 %v4457_v16, %v5565_v20  ;;  %4464 = vrcp.f32 %v2448_v53 }
 0xe48   :  { %4158 = vmatmul.mubr.msk.f32.vlgmr.msra.gmra.mxu1 %vm489_vm5, %v2220_v44 }
 0xe49   :  { %4182 = vmatpush3.msra.mxu1 %v5555_v60  ;;  %4160 = vmatprep.mubr.msk.f32.mxu1 %vm4542_vm2, %v4540_v1 }
 0xe4a   :  { %4183 = vmatprep.subr.mxu1 %v4540_v1 }
 0xe4b   :  { %4184 = vmatpush3.msra.mxu1 %v5559_v49 }
 0xe4c   :  { %4185 = vmatprep.subr.mxu1 %v4540_v1 }
 0xe4d   :  { %4186 = vmatpush3.msra.mxu1 %v5557_v45  ;;  %v4459_v59 = vpop.eup %4458 }
 0xe4e   :  { %4211 = vmatprep.subr.mxu1 %v4540_v1  ;;  %v2221_v2 = vmul.f32 %v4459_v59, %v5573_v15 }
 0xe50   :  { %4161 = vmatmul.mubr.msk.f32.gmra.mxu1 %vm489_vm5, %v2221_v2 }
 0xe51   :  { %v4461_v60 = vpop.eup %4460  ;;  %4163 = vmatprep.mubr.msk.f32.mxu1 %vm4542_vm2, %v4540_v1 }
 0xe52   :  { %v2222_v20 = vmul.f32 %v4461_v60, %v5581_v6  ;;  %v4463_v18 = vpop.eup %4462  ;;  %v2706_v6 = vpop.permute.xlu0 %2705 }
 0xe53   :  { %v2455_v45 = vmul.f32 %v4463_v18, %v5569_v61  ;;  %v4465_v49 = vpop.eup %4464  ;;  %v2945_v61 = vpop.permute.xlu1 %2944 }
 0xe54   :  { %4164 = vmatmul.mubr.msk.f32.gmra.mxu1 %vm489_vm5, %v2222_v20  ;;  %v2456_v15 = vmul.f32 %v4465_v49, %v5575_v35 }
 0xe55   :  { %4187 = vmatprep.mubr.msk.f32.mxu1 %vm4542_vm2, %v4540_v1 }
 0xe58   :  { %4188 = vmatmul.mubr.msk.f32.vlgmr.msra.gmra.mxu1 %vm489_vm5, %v2455_v45 }
 0xe59   :  { %4212 = vmatpush3.msra.mxu1 %v2710_v9  ;;  %4190 = vmatprep.mubr.msk.f32.mxu1 %vm4542_vm2, %v4540_v1 }
 0xe5a   :  { %4213 = vmatprep.subr.mxu1 %v4540_v1 }
 0xe5b   :  { %4214 = vmatpush3.msra.mxu1 %v2708_v50 }
 0xe5c   :  { %4215 = vmatprep.subr.mxu1 %v4540_v1  ;;  %4191 = vmatmul.mubr.msk.f32.gmra.mxu1 %vm489_vm5, %v2456_v15 }
 0xe5d   :  { %4216 = vmatpush3.msra.mxu1 %v2706_v6  ;;  %4193 = vmatprep.mubr.msk.f32.mxu1 %vm4542_vm2, %v4540_v1 }
 0xe5e   :  { %4241 = vmatprep.subr.mxu1 %v4540_v1 }
 0xe74   :  { %v2451_v7 = vpop.xlane.xlu1 %2450 }
 0xe75   :  { %4466 = vrcp.f32 %v2451_v7 }
 0xe78   :  { %v2692_v57 = vpop.xlane.xlu1 %2691  ;;  %v2695_v3 = vpop.xlane.xlu0 %2694 }
 0xe79   :  { %4468 = vrcp.f32 %v2692_v57 }
 0xe7a   :  { %4470 = vrcp.f32 %v2695_v3 }
 0xe7c   :  { %v2698_v35 = vpop.xlane.xlu1 %2697  ;;  %v2930_v52 = vpop.xlane.xlu0 %2929 }
 0xe7d   :  { %4472 = vrcp.f32 %v2698_v35 }
 0xe80   :  { %v2927_v25 = vpop.xlane.xlu1 %2926  ;;  %v2943_v29 = vpop.permute.xlu0 %2942 }
 0xe81   :  { %4474 = vrcp.f32 %v2927_v25 }
 0xe82   :  { %v4467_v54 = vpop.eup %4466  ;;  %4476 = vrcp.f32 %v2930_v52 }
 0xe83   :  { %v2457_v47 = vmul.f32 %v4467_v54, %v5595_v48 }
 0xe85   :  { %4194 = vmatmul.mubr.msk.f32.gmra.mxu1 %vm489_vm5, %v2457_v47 }
 0xe86   :  { %v4469_v31 = vpop.eup %4468  ;;  %4217 = vmatprep.mubr.msk.f32.mxu1 %vm4542_vm2, %v4540_v1 }
 0xe87   :  { %v2702_v14 = vmul.f32 %v4469_v31, %v5597_v8  ;;  %v4471_v36 = vpop.eup %4470 }
 0xe88   :  { %v2703_v40 = vmul.f32 %v4471_v36, %v5601_v12 }
 0xe89   :  { %4218 = vmatmul.mubr.msk.f32.vlgmr.msra.gmra.mxu1 %vm489_vm5, %v2702_v14 }
 0xe8a   :  { %4242 = vmatpush3.msra.mxu1 %v2945_v61  ;;  %4220 = vmatprep.mubr.msk.f32.mxu1 %vm4542_vm2, %v4540_v1  ;;  %v4473_v46 = vpop.eup %4472 }
 0xe8b   :  { %4243 = vmatprep.subr.mxu1 %v4540_v1  ;;  %v2704_v62 = vmul.f32 %v4473_v46, %v5603_v0 }
 0xe8c   :  { %4244 = vmatpush3.msra.mxu1 %v2943_v29 }
 0xe8d   :  { %4221 = vmatmul.mubr.msk.f32.gmra.mxu1 %vm489_vm5, %v2703_v40  ;;  %4245 = vmatprep.subr.mxu1 %v4540_v1 }
 0xe8e   :  { %4223 = vmatprep.mubr.msk.f32.mxu1 %vm4542_vm2, %v4540_v1  ;;  %v4475_v48 = vpop.eup %4474 }
 0xe8f   :  { %v2937_v8 = vmul.f32 %v4475_v48, %v5615_v17  ;;  %v4477_v12 = vpop.eup %4476 }
 0xe90   :  { %v2938_v0 = vmul.f32 %v4477_v12, %v5609_v13 }
 0xe91   :  { %4224 = vmatmul.mubr.msk.f32.gmra.mxu1 %vm489_vm5, %v2704_v62 }
 0xe92   :  { %4247 = vmatprep.mubr.msk.f32.mxu1 %vm4542_vm2, %v4540_v1 }
 0xe93   :  { %v2933_v56 = vpop.xlane.xlu1 %2932 }
 0xe94   :  { %4478 = vrcp.f32 %v2933_v56 }
 0xe97   :  { %v2941_v33 = vpop.permute.xlu1 %2940 }
 0xe98   :  { %4246 = vmatpush3.msra.mxu1 %v2941_v33 }
 0xe99   :  { %4248 = vmatmul.mubr.msk.f32.vlgmr.msra.gmra.mxu1 %vm489_vm5, %v2937_v8 }
 0xe9a   :  { %4250 = vmatprep.mubr.msk.f32.mxu1 %vm4542_vm2, %v4540_v1 }
 0xe9d   :  { %4251 = vmatmul.mubr.msk.f32.gmra.mxu1 %vm489_vm5, %v2938_v0 }
 0xe9e   :  { %4253 = vmatprep.mubr.msk.f32.mxu1 %vm4542_vm2, %v4540_v1  ;;  %vm3560_vm2 = vcmask 1040384  }
 0xea1   :  { %v4479_v58 = vpop.eup %4478 }
 0xea2   :  { %v2939_v63 = vmul.f32 %v4479_v58, %v5620_v51 }
 0xea4   :  { %4254 = vmatmul.mubr.msk.f32.gmra.mxu1 %vm489_vm5, %v2939_v63 }
 0xf08   :  { %v2307_v50 = vpop.f32.mrf.mxu1 }
 0xf0a   :  { %v4159_v22 = vpop.f32.mrf.mxu1 }
 0xf0b   :  { %v3680_v22 = vld [vmem:[%s5856_s5 + $0x28] sm:$0xff] }
 0xf10   :  { %v2312_v23 = vpop.f32.mrf.mxu1 }
 0xf12   :  { %v4162_v17 = vpop.f32.mrf.mxu1 }
 0xf14   :  { %v2317_v26 = vpop.f32.mrf.mxu1 }
 0xf16   :  { %v4165_v10 = vpop.f32.mrf.mxu1 }
 0xf18   :  { %v2542_v28 = vpop.f32.mrf.mxu1 }
 0xf19   :  { %2559 = vrot.lane.b32.xlu0 %v2542_v28, %s4548_s29 }
 0xf1a   :  { %v4189_v13 = vpop.f32.mrf.mxu1 }
 0xf1c   :  { %v2547_v19 = vpop.f32.mrf.mxu1 }
 0xf1d   :  { %2561 = vrot.lane.b32.xlu1 %v2547_v19, %s4548_s29 }
 0xf1e   :  { %v4192_v43 = vpop.f32.mrf.mxu1 }
 0xf45   :  { %v2552_v1 = vpop.f32.mrf.mxu1 }
 0xf46   :  { %2563 = vrot.lane.b32.xlu0 %v2552_v1, %s4548_s29 }
 0xf47   :  { %v4195_v51 = vpop.f32.mrf.mxu1 }
 0xf49   :  { %v2789_v9 = vpop.f32.mrf.mxu1 }
 0xf4b   :  { %v4219_v34 = vpop.f32.mrf.mxu1 }
 0xf4d   :  { %v2794_v37 = vpop.f32.mrf.mxu1 }
 0xf4f   :  { %v4222_v5 = vpop.f32.mrf.mxu1 }
 0xf51   :  { %v2799_v53 = vpop.f32.mrf.mxu1 }
 0xf53   :  { %v4225_v32 = vpop.f32.mrf.mxu1 }
 0xf59   :  { %v3024_v16 = vpop.f32.mrf.mxu1 }
 0xf5a   :  { %3041 = vrot.lane.b32.xlu1 %v3024_v16, %s4548_s29 }
 0xf5b   :  { %v4249_v44 = vpop.f32.mrf.mxu1 }
 0xf5d   :  { %v3029_v59 = vpop.f32.mrf.mxu1 }
 0xf5e   :  { %3043 = vrot.lane.b32.xlu0 %v3029_v59, %s4548_s29 }
 0xf5f   :  { %v4252_v2 = vpop.f32.mrf.mxu1 }
 0xf64   :  { %v3034_v60 = vpop.f32.mrf.mxu1 }
 0xf65   :  { %3045 = vrot.lane.b32.xlu1 %v3034_v60, %s4548_s29 }
 0xf66   :  { %v4255_v20 = vpop.f32.mrf.mxu1 }
 0xf8b   :  { %v2560_v18 = vpop.permute.xlu0 %2559 }
 0xf8c   :  { %v2568_v45 = vsel %vm396_vm3, %v2307_v50, %v2560_v18  ;;  %v3681_v50 = vld [vmem:[%s5856_s5 + $0x30] sm:$0xff] }
 0xf8d   :  { %v3053_v49 = vadd.f32 %v2568_v45, %v5314_v41 }
 0xf8f   :  { %v2562_v15 = vpop.permute.xlu1 %2561  ;;  %v3059_v6 = vsel %vm166_vm1, %v3053_v49, 0.0 }
 0xf90   :  { %v2569_v61 = vsel %vm396_vm3, %v2312_v23, %v2562_v15  ;;  %3060 = vadd.xlane.f32.xlu0 %v3059_v6  ;;  %v3679_v23 = vld [vmem:[%s5856_s5 + $0x20] sm:$0xff] }
 0xf91   :  { %v3054_v7 = vadd.f32 %v2569_v61, %v5311_v11  ;;  %v5738_v61 = vld [vmem:[%s5854_s3 + $0x8] sm:$0xff] }
 0xf93   :  { %v3062_v57 = vsel %vm166_vm1, %v3054_v7, 0.0 }
 0xf94   :  { %3063 = vadd.xlane.f32.xlu1 %v3062_v57 }
 0xfb8   :  { %v2564_v3 = vpop.permute.xlu0 %2563 }
 0xfb9   :  { %v2570_v35 = vsel %vm396_vm3, %v2317_v26, %v2564_v3 }
 0xfba   :  { %v5699_v54 = vadd.f32 %v2570_v35, %v5324_v38  ;;  %v3150_v35 = vrot.slane %v5738_v61, %v1449_v4 }
 0xfbc   :  { %v3065_v41 = vsel %vm166_vm1, %v5699_v54, 0.0 }
 0xfbd   :  { %3066 = vadd.xlane.f32.xlu0 %v3065_v41 }
 0xfcc   :  { %v3042_v25 = vpop.permute.xlu1 %3041 }
 0xfcd   :  { %v3050_v47 = vsel %vm396_vm3, %v2789_v9, %v3042_v25 }
 0xfce   :  { %v3056_v52 = vadd.f32 %v3050_v47, %v5321_v30 }
 0xfd0   :  { %v3044_v31 = vpop.permute.xlu0 %3043  ;;  %v3068_v11 = vsel %vm166_vm1, %v3056_v52, 0.0 }
 0xfd1   :  { %v3051_v14 = vsel %vm396_vm3, %v2794_v37, %v3044_v31  ;;  %3069 = vadd.xlane.f32.xlu0 %v3068_v11 }
 0xfd2   :  { %v3057_v36 = vadd.f32 %v3051_v14, %v5334_v42 }
 0xfd4   :  { %v3071_v38 = vsel %vm166_vm1, %v3057_v36, 0.0 }
 0xfd5   :  { %3072 = vadd.xlane.f32.xlu0 %v3071_v38 }
 0xfd7   :  { %v3046_v29 = vpop.permute.xlu1 %3045 }
 0xfd8   :  { %v3052_v40 = vsel %vm396_vm3, %v2799_v53, %v3046_v29  ;;  %vm3562_vm3 = vcmask 254976  }
 0xfd9   :  { %v5711_v46 = vadd.f32 %v3052_v40, %v5331_v21  ;;  %v3682_v21 = vld [vmem:[%s5856_s5 + $0x38] sm:$0xff] }
 0xfda   :  { %4256 = vmatprep.subr.mxu0 %v3682_v21 }
 0xfdb   :  { %v3074_v30 = vsel %vm166_vm1, %v5711_v46, 0.0  ;;  %4257 = vmatpush3.msra.mxu0 %v3682_v21 }
 0xfdc   :  { %3075 = vadd.xlane.f32.xlu1 %v3074_v30  ;;  %4258 = vmatprep.subr.mxu0 %v3681_v50 }
 0xfdd   :  { %4259 = vmatpush3.msra.mxu0 %v3681_v50 }
 0xfde   :  { %4260 = vmatprep.subr.mxu0 %v3680_v22 }
 0xfdf   :  { %4261 = vmatpush3.msra.mxu0 %v3680_v22 }
 0xfe0   :  { %4262 = vmatprep.subr.mxu0 %v3679_v23 }
 0xfe1   :  { %4263 = vmatpush3.msra.mxu0 %v3679_v23 }
0x1019   :  { %v3061_v62 = vpop.xlane.xlu0 %3060 }
0x101a   :  { %v3077_v56 = vmul.f32 0.03125, %v3061_v62 }
0x101c   :  { %v3083_v48 = vsub.f32 %v3053_v49, %v3077_v56 }
0x101d   :  { %v3064_v8 = vpop.xlane.xlu1 %3063 }
0x101e   :  { %v3078_v33 = vmul.f32 0.03125, %v3064_v8  ;;  %v3089_v12 = vmul.f32 %v3083_v48, %v3083_v48 }
0x1020   :  { %v3084_v42 = vsub.f32 %v3054_v7, %v3078_v33  ;;  %v3095_v0 = vsel %vm166_vm1, %v3089_v12, 0.0  ;;  %v3140_v7 = vrot.slane %v5738_v61, %v1439_v55 }
0x1021   :  { %3096 = vadd.xlane.f32.xlu0 %v3095_v0 }
0x1022   :  { %v3090_v58 = vmul.f32 %v3084_v42, %v3084_v42 }
0x1024   :  { %v3098_v63 = vsel %vm166_vm1, %v3090_v58, 0.0 }
0x1025   :  { %3099 = vadd.xlane.f32.xlu1 %v3098_v63 }
0x1046   :  { %v3067_v17 = vpop.xlane.xlu0 %3066 }
0x1047   :  { %v3079_v26 = vmul.f32 0.03125, %v3067_v17 }
0x1049   :  { %v3085_v10 = vsub.f32 %v5699_v54, %v3079_v26 }
0x104b   :  { %v3091_v28 = vmul.f32 %v3085_v10, %v3085_v10 }
0x104d   :  { %v3101_v13 = vsel %vm166_vm1, %v3091_v28, 0.0 }
0x104e   :  { %3102 = vadd.xlane.f32.xlu0 %v3101_v13 }
0x105a   :  { %v3070_v19 = vpop.xlane.xlu0 %3069 }
0x105b   :  { %v3080_v43 = vmul.f32 0.03125, %v3070_v19 }
0x105d   :  { %v3086_v1 = vsub.f32 %v3056_v52, %v3080_v43  ;;  %v3704_v43 = vld [vmem:[%s5857_s6 + $0xf8] sm:$0xff] }
0x105e   :  { %v3073_v51 = vpop.xlane.xlu0 %3072  ;;  %4273 = vmatprep.subr.mxu1 %v3704_v43 }
0x105f   :  { %v3081_v9 = vmul.f32 0.03125, %v3073_v51  ;;  %v3092_v34 = vmul.f32 %v3086_v1, %v3086_v1  ;;  %4274 = vmatpush3.msra.mxu1 %v3704_v43  ;;  %v3702_v51 = vld [vmem:[%s5857_s6 + $0xe8] sm:$0xff] }
0x1061   :  { %v3087_v37 = vsub.f32 %v3057_v36, %v3081_v9  ;;  %v3104_v5 = vsel %vm166_vm1, %v3092_v34, 0.0  ;;  %v3701_v9 = vld [vmem:[%s5857_s6 + $0xe0] sm:$0xff]  ;;  %v3700_v34 = vld [vmem:[%s5857_s6 + $0xd8] sm:$0xff] }
0x1062   :  { %3105 = vadd.xlane.f32.xlu1 %v3104_v5  ;;  %v3698_v5 = vld [vmem:[%s5857_s6 + $0xc8] sm:$0xff] }
0x1063   :  { %v3093_v53 = vmul.f32 %v3087_v37, %v3087_v37 }
0x1065   :  { %v3076_v32 = vpop.xlane.xlu1 %3075  ;;  %v3107_v16 = vsel %vm166_vm1, %v3093_v53, 0.0  ;;  %v3697_v53 = vld [vmem:[%s5857_s6 + $0xc0] sm:$0xff] }
0x1066   :  { %v3082_v44 = vmul.f32 0.03125, %v3076_v32  ;;  %3108 = vadd.xlane.f32.xlu0 %v3107_v16  ;;  %v3696_v32 = vld [vmem:[%s5857_s6 + $0xb8] sm:$0xff]  ;;  %v3695_v16 = vld [vmem:[%s5857_s6 + $0xb0] sm:$0xff] }
0x1068   :  { %v3088_v59 = vsub.f32 %v5711_v46, %v3082_v44  ;;  %v3694_v44 = vld [vmem:[%s5857_s6 + $0xa8] sm:$0xff] }
0x106a   :  { %v3094_v2 = vmul.f32 %v3088_v59, %v3088_v59 }
0x106c   :  { %v3110_v60 = vsel %vm166_vm1, %v3094_v2, 0.0  ;;  %v3692_v2 = vld [vmem:[%s5857_s6 + $0x98] sm:$0xff] }
0x106d   :  { %3111 = vadd.xlane.f32.xlu1 %v3110_v60  ;;  %v3691_v60 = vld [vmem:[%s5857_s6 + $0x90] sm:$0xff] }
0x10aa   :  { %v3097_v20 = vpop.xlane.xlu0 %3096 }
0x10ab   :  { %v3113_v18 = vmul.f32 0.03125, %v3097_v20  ;;  %v3690_v20 = vld [vmem:[%s5857_s6 + $0x88] sm:$0xff] }
0x10ad   :  { %v3119_v45 = vadd.f32 1e-05, %v3113_v18  ;;  %v3689_v18 = vld [vmem:[%s5857_s6 + $0x80] sm:$0xff] }
0x10ae   :  { %v3100_v49 = vpop.xlane.xlu1 %3099 }
0x10af   :  { %4480 = vrsqrt.f32 %v3119_v45  ;;  %v3114_v15 = vmul.f32 0.03125, %v3100_v49  ;;  %v5803_v45 = vrot.slane %v5738_v61, %v1463_v39 }
0x10b1   :  { %v3120_v6 = vadd.f32 1e-05, %v3114_v15 }
0x10b3   :  { %4482 = vrsqrt.f32 %v3120_v6 }
0x10bc   :  { %v4481_v57 = vpop.eup %4480 }
0x10bd   :  { %v3131_v3 = vmul.f32 %v4481_v57, %v3083_v48 }
0x10bf   :  { %v3141_v41 = vmul.f32 %v3140_v7, %v3131_v3 }
0x10c0   :  { %v4483_v25 = vpop.eup %4482 }
0x10c1   :  { %v3132_v47 = vmul.f32 %v4483_v25, %v3084_v42  ;;  %v3151_v52 = vadd.f32 %v3150_v35, %v3141_v41 }
0x10c3   :  { %v3142_v31 = vmul.f32 %v3140_v7, %v3132_v47  ;;  %4264 = vmatprep.mubr.msk.f32.mxu0 %vm166_vm1, %v3151_v52 }
0x10c5   :  { %v3152_v11 = vadd.f32 %v3150_v35, %v3142_v31 }
0x10c7   :  { %4265 = vmatmul.mubr.msk.f32.vlgmr.msra.gmra.mxu0 %vm166_vm1, %v3152_v11 }
0x10d7   :  { %v3103_v14 = vpop.xlane.xlu0 %3102 }
0x10d8   :  { %v3115_v36 = vmul.f32 0.03125, %v3103_v14 }
0x10da   :  { %v3121_v38 = vadd.f32 1e-05, %v3115_v36 }
0x10dc   :  { %4484 = vrsqrt.f32 %v3121_v38 }
0x10e9   :  { %v4485_v55 = vpop.eup %4484 }
0x10ea   :  { %v3133_v30 = vmul.f32 %v4485_v55, %v3085_v10 }
0x10eb   :  { %v3106_v29 = vpop.xlane.xlu1 %3105 }
0x10ec   :  { %v3116_v40 = vmul.f32 0.03125, %v3106_v29  ;;  %v3143_v4 = vmul.f32 %v3140_v7, %v3133_v30 }
0x10ee   :  { %v3122_v62 = vadd.f32 1e-05, %v3116_v40  ;;  %v3153_v8 = vadd.f32 %v3150_v35, %v3143_v4 }
0x10ef   :  { %v3109_v56 = vpop.xlane.xlu0 %3108 }
0x10f0   :  { %4486 = vrsqrt.f32 %v3122_v62  ;;  %v3117_v48 = vmul.f32 0.03125, %v3109_v56  ;;  %4267 = vmatprep.mubr.msk.f32.mxu0 %vm166_vm1, %v3153_v8 }
0x10f2   :  { %v3123_v33 = vadd.f32 1e-05, %v3117_v48 }
0x10f4   :  { %4488 = vrsqrt.f32 %v3123_v33 }
0x10f6   :  { %v3112_v12 = vpop.xlane.xlu1 %3111 }
0x10f7   :  { %v3118_v42 = vmul.f32 0.03125, %v3112_v12 }
0x10f9   :  { %v3124_v0 = vadd.f32 1e-05, %v3118_v42 }
0x10fb   :  { %4490 = vrsqrt.f32 %v3124_v0 }
0x10fd   :  { %v4487_v58 = vpop.eup %4486 }
0x10fe   :  { %v3134_v63 = vmul.f32 %v4487_v58, %v3086_v1  ;;  %v3703_v1 = vld [vmem:[%s5857_s6 + $0xf0] sm:$0xff] }
0x10ff   :  { %4275 = vmatprep.subr.mxu1 %v3703_v1 }
0x1100   :  { %v3144_v21 = vmul.f32 %v3140_v7, %v3134_v63  ;;  %4276 = vmatpush3.msra.mxu1 %v3703_v1 }
0x1101   :  { %v4489_v50 = vpop.eup %4488  ;;  %4277 = vmatprep.subr.mxu1 %v3702_v51 }
0x1102   :  { %v3154_v22 = vadd.f32 %v3150_v35, %v3144_v21  ;;  %v3135_v23 = vmul.f32 %v4489_v50, %v3087_v37  ;;  %4278 = vmatpush3.msra.mxu1 %v3702_v51  ;;  %v3699_v37 = vld [vmem:[%s5857_s6 + $0xd0] sm:$0xff] }
0x1103   :  { %4279 = vmatprep.subr.mxu1 %v3701_v9 }
0x1104   :  { %4268 = vmatmul.mubr.msk.f32.gmra.mxu0 %vm166_vm1, %v3154_v22  ;;  %v3145_v17 = vmul.f32 %v3140_v7, %v3135_v23  ;;  %4280 = vmatpush3.msra.mxu1 %v3701_v9 }
0x1105   :  { %4281 = vmatprep.subr.mxu1 %v3700_v34 }
0x1106   :  { %v3155_v26 = vadd.f32 %v3150_v35, %v3145_v17  ;;  %4282 = vmatpush3.msra.mxu1 %v3700_v34 }
0x1107   :  { %4283 = vmatprep.subr.mxu1 %v3699_v37 }
0x1108   :  { %v4491_v10 = vpop.eup %4490  ;;  %4270 = vmatprep.mubr.msk.f32.mxu0 %vm166_vm1, %v3155_v26  ;;  %4284 = vmatpush3.msra.mxu1 %v3699_v37 }
0x1109   :  { %v3136_v28 = vmul.f32 %v4491_v10, %v3088_v59  ;;  %4285 = vmatprep.subr.mxu1 %v3698_v5  ;;  %v3693_v59 = vld [vmem:[%s5857_s6 + $0xa0] sm:$0xff]  ;;  %s4549_s6 = smov [#allocation2]  }
0x110a   :  { %4286 = vmatpush3.msra.mxu1 %v3698_v5  ;;  %s3570_s21 = sshll.u32 %s4549_s6, 4  ;;  %s3571_s21 = int_to_ptr.vmem [resolvable:$true] %s3570_s21 }
0x110b   :  { %v3146_v13 = vmul.f32 %v3140_v7, %v3136_v28  ;;  %4287 = vmatprep.subr.mxu1 %v3697_v53  ;;  %s4518_s22 = scalar_lea.vmem %s3571_s21, 32  ;;  %p4523_p1 = scmp.lt.s32.totalorder %s3571_s21, %s3571_s21 }
0x110c   :  { %4288 = vmatpush3.msra.mxu1 %v3697_v53  ;;  %p4519_p0 = scmp.ne.s32.totalorder %s3571_s21, %s4518_s22  ;;  %p4524_p2 = scmp.lt.s32.totalorder %s4518_s22, %s4518_s22 }
0x110d   :  { %v3156_v19 = vadd.f32 %v3150_v35, %v3146_v13  ;;  %4289 = vmatprep.subr.mxu1 %v3696_v32 }
0x110e   :  { %4290 = vmatpush3.msra.mxu1 %v3696_v32  ;;  %p4525_p3 = por %p4524_p2, %p4523_p1 }
0x110f   :  { %4271 = vmatmul.mubr.msk.f32.gmra.mxu0 %vm166_vm1, %v3156_v19  ;;  %4291 = vmatprep.subr.mxu1 %v3695_v16 }
0x1110   :  { %4292 = vmatpush3.msra.mxu1 %v3695_v16  ;;  %p4526_p4 = pnand %p4525_p3, %p4519_p0 }
0x1111   :  { %4293 = vmatprep.subr.mxu1 %v3694_v44 }
0x1112   :  { %4294 = vmatpush3.msra.mxu1 %v3694_v44 }
0x1113   :  { %4295 = vmatprep.subr.mxu1 %v3693_v59 }
0x1114   :  { %4296 = vmatpush3.msra.mxu1 %v3693_v59 }
0x1115   :  { %4297 = vmatprep.subr.mxu1 %v3692_v2 }
0x1116   :  { %4298 = vmatpush3.msra.mxu1 %v3692_v2 }
0x1117   :  { %4299 = vmatprep.subr.mxu1 %v3691_v60 }
0x1118   :  { %4300 = vmatpush3.msra.mxu1 %v3691_v60 }
0x1119   :  { %4301 = vmatprep.subr.mxu1 %v3690_v20 }
0x111a   :  { %4302 = vmatpush3.msra.mxu1 %v3690_v20 }
0x111b   :  { %4303 = vmatprep.subr.mxu1 %v3689_v18 }
0x111c   :  { %4304 = vmatpush3.msra.mxu1 %v3689_v18 }
0x1187   :  { %v4266_v49 = vpop.f32.mrf.mxu0 }
0x1188   :  { %v3256_v15 = vadd.f32 %v4266_v49, %v5803_v45 }
0x1189   :  { %v3250_v6 = vpop.f32.mrf.mxu0 }
0x118a   :  { %v3286_v7 = vmul.f32 0.70710677, %v3256_v15  ;;  %v3251_v57 = vadd.f32 %v3250_v6, %v5803_v45  ;;  %v3280_v16 = vmul.f32 0.5, %v3256_v15 }
0x118c   :  { %v3292_v3 = vand.u32 2147483647, %v3286_v7  ;;  %v3285_v35 = vmul.f32 0.70710677, %v3251_v57  ;;  %vm3412_vm12 = vcmp.ge.f32.partialorder %v3286_v7, 0.0  ;;  %v3279_v53 = vmul.f32 0.5, %v3251_v57 }
0x118e   :  { %v3298_v41 = vmul.f32 0.3275911, %v3292_v3  ;;  %v3291_v25 = vand.u32 2147483647, %v3285_v35  ;;  %v3376_v11 = vsub.f32 0.0, %v3292_v3  ;;  %vm3411_vm13 = vcmp.ge.f32.partialorder %v3285_v35, 0.0 }
0x1190   :  { %v3304_v47 = vadd.f32 1.0, %v3298_v41  ;;  %v3297_v52 = vmul.f32 0.3275911, %v3291_v25  ;;  %v3375_v14 = vsub.f32 0.0, %v3291_v25  ;;  %v3382_v39 = vmul.f32 %v3376_v11, %v3292_v3 }
0x1192   :  { %4492 = vrcp.f32 %v3304_v47  ;;  %v3303_v31 = vadd.f32 1.0, %v3297_v52  ;;  %v3381_v38 = vmul.f32 %v3375_v14, %v3291_v25  ;;  %v3389_v29 = vmul.f32 1.442695, %v3382_v39 }
0x1194   :  { %4494 = vrcp.f32 %v3303_v31  ;;  %v3387_v62 = vmul.f32 1.442695, %v3381_v38 }
0x1195   :  { %4496 = vpow2.f32 %v3389_v29 }
0x1196   :  { %4498 = vpow2.f32 %v3387_v62 }
0x119f   :  { %v4493_v36 = vpop.eup %4492 }
0x11a0   :  { %v3322_v55 = vmul.f32 1.0614054, %v4493_v36 }
0x11a1   :  { %v4495_v40 = vpop.eup %4494 }
0x11a2   :  { %v3328_v30 = vadd.f32 -1.4531521, %v3322_v55  ;;  %v3321_v4 = vmul.f32 1.0614054, %v4495_v40  ;;  %v4497_v17 = vpop.eup %4496 }
0x11a3   :  { %v4499_v13 = vpop.eup %4498 }
0x11a4   :  { %v3334_v56 = vmul.f32 %v4493_v36, %v3328_v30  ;;  %v3327_v48 = vadd.f32 -1.4531521, %v3321_v4 }
0x11a6   :  { %v3340_v8 = vadd.f32 1.4214138, %v3334_v56  ;;  %v3333_v33 = vmul.f32 %v4495_v40, %v3327_v48 }
0x11a8   :  { %v3346_v12 = vmul.f32 %v4493_v36, %v3340_v8  ;;  %v3339_v42 = vadd.f32 1.4214138, %v3333_v33 }
0x11aa   :  { %v3352_v0 = vadd.f32 -0.28449672, %v3346_v12  ;;  %v3345_v58 = vmul.f32 %v4495_v40, %v3339_v42 }
0x11ac   :  { %v3358_v63 = vmul.f32 %v4493_v36, %v3352_v0  ;;  %v3351_v21 = vadd.f32 -0.28449672, %v3345_v58 }
0x11ae   :  { %v3364_v50 = vadd.f32 0.2548296, %v3358_v63  ;;  %v3357_v22 = vmul.f32 %v4495_v40, %v3351_v21 }
0x11b0   :  { %v3370_v23 = vmul.f32 %v4493_v36, %v3364_v50  ;;  %v3363_v26 = vadd.f32 0.2548296, %v3357_v22 }
0x11b2   :  { %v3400_v10 = vmul.f32 %v4497_v17, %v3370_v23  ;;  %v3369_v28 = vmul.f32 %v4495_v40, %v3363_v26 }
0x11b4   :  { %v3406_v19 = vsub.f32 1.0, %v3400_v10  ;;  %v3399_v43 = vmul.f32 %v4499_v13, %v3369_v28 }
0x11b6   :  { %v3418_v1 = vsub.f32 0.0, %v3406_v19  ;;  %v3405_v51 = vsub.f32 1.0, %v3399_v43 }
0x11b8   :  { %v3424_v9 = vsel %vm3412_vm12, %v3406_v19, %v3418_v1  ;;  %v3417_v34 = vsub.f32 0.0, %v3405_v51 }
0x11b9   :  { %v3430_v37 = vadd.f32 1.0, %v3424_v9 }
0x11ba   :  { %v3423_v5 = vsel %vm3411_vm13, %v3405_v51, %v3417_v34 }
0x11bb   :  { %v3429_v32 = vadd.f32 1.0, %v3423_v5  ;;  %v3436_v59 = vmul.f32 %v3430_v37, %v3280_v16 }
0x11bd   :  { %v3435_v44 = vmul.f32 %v3429_v32, %v3279_v53 }
0x11bf   :  { %4305 = vmatprep.mubr.f32.mxu1 %v3435_v44 }
0x11c0   :  { %4306 = vmatmul.mubr.f32.vlgmr.msra.gmra.mxu1 %v3436_v59 }
0x11c4   :  { %v4269_v2 = vpop.f32.mrf.mxu0 }
0x11c5   :  { %v5808_v60 = vadd.f32 %v4269_v2, %v5803_v45 }
0x11c6   :  { %v3260_v20 = vpop.f32.mrf.mxu0 }
0x11c7   :  { %v5811_v18 = vmul.f32 0.70710677, %v5808_v60  ;;  %v5814_v49 = vadd.f32 %v3260_v20, %v5803_v45 }
0x11c9   :  { %v3294_v6 = vand.u32 2147483647, %v5811_v18  ;;  %v5818_v7 = vmul.f32 0.70710677, %v5814_v49  ;;  %vm3414_vm14 = vcmp.ge.f32.partialorder %v5811_v18, 0.0 }
0x11cb   :  { %v3300_v15 = vmul.f32 0.3275911, %v3294_v6  ;;  %v3293_v57 = vand.u32 2147483647, %v5818_v7  ;;  %v3378_v36 = vsub.f32 0.0, %v3294_v6  ;;  %vm3413_vm15 = vcmp.ge.f32.partialorder %v5818_v7, 0.0 }
0x11cd   :  { %v3306_v3 = vadd.f32 1.0, %v3300_v15  ;;  %v3299_v35 = vmul.f32 0.3275911, %v3293_v57  ;;  %v3377_v29 = vsub.f32 0.0, %v3293_v57  ;;  %v3384_v62 = vmul.f32 %v3378_v36, %v3294_v6 }
0x11cf   :  { %4500 = vrcp.f32 %v3306_v3  ;;  %v3305_v41 = vadd.f32 1.0, %v3299_v35  ;;  %v4272_v25 = vpop.f32.mrf.mxu0  ;;  %v3383_v48 = vmul.f32 %v3377_v29, %v3293_v57  ;;  %v3393_v8 = vmul.f32 1.442695, %v3384_v62 }
0x11d0   :  { %v5822_v47 = vadd.f32 %v4272_v25, %v5803_v45 }
0x11d1   :  { %v3270_v52 = vpop.f32.mrf.mxu0  ;;  %4502 = vrcp.f32 %v3305_v41  ;;  %v3391_v42 = vmul.f32 1.442695, %v3383_v48 }
0x11d2   :  { %v5825_v31 = vmul.f32 0.70710677, %v5822_v47  ;;  %v5828_v11 = vadd.f32 %v3270_v52, %v5803_v45 }
0x11d4   :  { %v3296_v14 = vand.u32 2147483647, %v5825_v31  ;;  %v5832_v39 = vmul.f32 0.70710677, %v5828_v11  ;;  %vm3416_vm0 = vcmp.ge.f32.partialorder %v5825_v31, 0.0 }
0x11d6   :  { %v3302_v38 = vmul.f32 0.3275911, %v3296_v14  ;;  %v3295_v55 = vand.u32 2147483647, %v5832_v39  ;;  %v3380_v0 = vsub.f32 0.0, %v3296_v14  ;;  %vm3415_vm1 = vcmp.ge.f32.partialorder %v5832_v39, 0.0 }
0x11d7   :  { %v3554_v39 = vrot.slane %v5738_v61, %v1859_v27 }
0x11d8   :  { %v3308_v40 = vadd.f32 1.0, %v3302_v38  ;;  %v3301_v30 = vmul.f32 0.3275911, %v3295_v55  ;;  %v3379_v50 = vsub.f32 0.0, %v3295_v55  ;;  %v3386_v23 = vmul.f32 %v3380_v0, %v3296_v14 }
0x11da   :  { %4504 = vrcp.f32 %v3308_v40  ;;  %v3307_v4 = vadd.f32 1.0, %v3301_v30  ;;  %v3385_v13 = vmul.f32 %v3379_v50, %v3295_v55  ;;  %v3397_v43 = vmul.f32 1.442695, %v3386_v23 }
0x11db   :  { %v3282_v50 = vmul.f32 0.5, %v5808_v60  ;;  %v3283_v60 = vmul.f32 0.5, %v5828_v11 }
0x11dc   :  { %v4501_v56 = vpop.eup %4500  ;;  %4506 = vrcp.f32 %v3307_v4  ;;  %v3395_v53 = vmul.f32 1.442695, %v3385_v13 }
0x11dd   :  { %v3324_v45 = vmul.f32 1.0614054, %v4501_v56  ;;  %4508 = vpow2.f32 %v3393_v8 }
0x11de   :  { %v4503_v33 = vpop.eup %4502  ;;  %4510 = vpow2.f32 %v3391_v42 }
0x11df   :  { %v3330_v12 = vadd.f32 -1.4531521, %v3324_v45  ;;  %v3323_v58 = vmul.f32 1.0614054, %v4503_v33  ;;  %4512 = vpow2.f32 %v3397_v43 }
0x11e0   :  { %4514 = vpow2.f32 %v3395_v53 }
0x11e1   :  { %v3336_v63 = vmul.f32 %v4501_v56, %v3330_v12  ;;  %v3329_v21 = vadd.f32 -1.4531521, %v3323_v58  ;;  %v3281_v58 = vmul.f32 0.5, %v5814_v49 }
0x11e3   :  { %v3342_v22 = vadd.f32 1.4214138, %v3336_v63  ;;  %v3335_v17 = vmul.f32 %v4503_v33, %v3329_v21 }
0x11e5   :  { %v3348_v26 = vmul.f32 %v4501_v56, %v3342_v22  ;;  %v3341_v10 = vadd.f32 1.4214138, %v3335_v17 }
0x11e7   :  { %v4505_v28 = vpop.eup %4504  ;;  %v3354_v19 = vadd.f32 -0.28449672, %v3348_v26  ;;  %v3347_v1 = vmul.f32 %v4503_v33, %v3341_v10 }
0x11e8   :  { %v3326_v51 = vmul.f32 1.0614054, %v4505_v28 }
0x11e9   :  { %v3360_v9 = vmul.f32 %v4501_v56, %v3354_v19  ;;  %v4507_v34 = vpop.eup %4506  ;;  %v3353_v37 = vadd.f32 -0.28449672, %v3347_v1 }
0x11ea   :  { %v3332_v5 = vadd.f32 -1.4531521, %v3326_v51  ;;  %v3325_v16 = vmul.f32 1.0614054, %v4507_v34  ;;  %v4509_v6 = vpop.eup %4508 }
0x11eb   :  { %v3366_v32 = vadd.f32 0.2548296, %v3360_v9  ;;  %v3359_v44 = vmul.f32 %v4503_v33, %v3353_v37  ;;  %v4511_v52 = vpop.eup %4510  ;;  %v3284_v9 = vmul.f32 0.5, %v5822_v47 }
0x11ec   :  { %v3338_v59 = vmul.f32 %v4505_v28, %v3332_v5  ;;  %v3331_v20 = vadd.f32 -1.4531521, %v3325_v16  ;;  %v4513_v0 = vpop.eup %4512 }
0x11ed   :  { %v3372_v2 = vmul.f32 %v4501_v56, %v3366_v32  ;;  %v3365_v15 = vadd.f32 0.2548296, %v3359_v44  ;;  %v4515_v17 = vpop.eup %4514 }
0x11ee   :  { %v3344_v57 = vadd.f32 1.4214138, %v3338_v59  ;;  %v3337_v35 = vmul.f32 %v4507_v34, %v3331_v20 }
0x11ef   :  { %v3402_v3 = vmul.f32 %v4509_v6, %v3372_v2  ;;  %v3371_v41 = vmul.f32 %v4503_v33, %v3365_v15 }
0x11f0   :  { %v3350_v25 = vmul.f32 %v4505_v28, %v3344_v57  ;;  %v3343_v36 = vadd.f32 1.4214138, %v3337_v35 }
0x11f1   :  { %v3408_v14 = vsub.f32 1.0, %v3402_v3  ;;  %v3401_v38 = vmul.f32 %v4511_v52, %v3371_v41 }
0x11f2   :  { %v3356_v55 = vadd.f32 -0.28449672, %v3350_v25  ;;  %v3349_v40 = vmul.f32 %v4507_v34, %v3343_v36 }
0x11f3   :  { %v3420_v29 = vsub.f32 0.0, %v3408_v14  ;;  %v3407_v30 = vsub.f32 1.0, %v3401_v38 }
0x11f4   :  { %v3362_v62 = vmul.f32 %v4505_v28, %v3356_v55  ;;  %v3355_v56 = vadd.f32 -0.28449672, %v3349_v40 }
0x11f5   :  { %v3426_v4 = vsel %vm3414_vm14, %v3408_v14, %v3420_v29  ;;  %v3419_v48 = vsub.f32 0.0, %v3407_v30 }
0x11f6   :  { %v3368_v8 = vadd.f32 0.2548296, %v3362_v62  ;;  %v3361_v45 = vmul.f32 %v4507_v34, %v3355_v56  ;;  %v3432_v12 = vadd.f32 1.0, %v3426_v4 }
0x11f7   :  { %v3425_v33 = vsel %vm3413_vm15, %v3407_v30, %v3419_v48 }
0x11f8   :  { %v3374_v42 = vmul.f32 %v4505_v28, %v3368_v8  ;;  %v3431_v63 = vadd.f32 1.0, %v3425_v33  ;;  %v3367_v21 = vadd.f32 0.2548296, %v3361_v45  ;;  %v3438_v26 = vmul.f32 %v3432_v12, %v3282_v50 }
0x11fa   :  { %v3404_v18 = vmul.f32 %v4513_v0, %v3374_v42  ;;  %v3437_v22 = vmul.f32 %v3431_v63, %v3281_v58  ;;  %v3373_v23 = vmul.f32 %v4507_v34, %v3367_v21 }
0x11fc   :  { %v3410_v10 = vsub.f32 1.0, %v3404_v18  ;;  %4308 = vmatprep.mubr.f32.mxu1 %v3437_v22  ;;  %v3403_v13 = vmul.f32 %v4515_v17, %v3373_v23 }
0x11fd   :  { %4309 = vmatmul.mubr.f32.gmra.mxu1 %v3438_v26 }
0x11fe   :  { %v3422_v7 = vsub.f32 0.0, %v3410_v10  ;;  %v3409_v28 = vsub.f32 1.0, %v3403_v13 }
0x1200   :  { %v3428_v19 = vsel %vm3416_vm0, %v3410_v10, %v3422_v7  ;;  %v3421_v43 = vsub.f32 0.0, %v3409_v28 }
0x1201   :  { %v3434_v1 = vadd.f32 1.0, %v3428_v19 }
0x1202   :  { %v3427_v49 = vsel %vm3415_vm1, %v3409_v28, %v3421_v43 }
0x1203   :  { %v3433_v51 = vadd.f32 1.0, %v3427_v49  ;;  %v3440_v37 = vmul.f32 %v3434_v1, %v3284_v9 }
0x1205   :  { %v3439_v34 = vmul.f32 %v3433_v51, %v3283_v60 }
0x1207   :  { %4311 = vmatprep.mubr.f32.mxu1 %v3439_v34 }
0x1208   :  { %4312 = vmatmul.mubr.f32.gmra.mxu1 %v3440_v37 }
0x1280   :  { %v4307_v5 = vpop.f32.mrf.mxu1 }
0x1282   :  { %v3524_v53 = vpop.f32.mrf.mxu1 }
0x12bd   :  { %v4310_v32 = vpop.f32.mrf.mxu1 }
0x12bf   :  { %v3532_v31 = vpop.f32.mrf.mxu1 }
0x12c0   :  { %v3549_v44 = vadd.f32 %v3532_v31, %v5699_v54 }
0x12c2   :  { %v3555_v47 = vadd.f32 %v3554_v39, %v3549_v44 }
0x12c8   :  { %v4313_v16 = vpop.f32.mrf.mxu1 }
0x12c9   :  { %v3550_v11 = vadd.f32 %v4313_v16, %v5711_v46 }
0x12ca   :  { %v3541_v59 = vpop.f32.mrf.mxu1 }
0x12cb   :  { %v3556_v2 = vadd.f32 %v3554_v39, %v3550_v11 }
0x12cd   :  { %v3558_v20 = vrot.slane %v3556_v2, 7 }
0x12cf   :  { %v3561_v6 = vsel %vm3560_vm2, %v3555_v47, %v3558_v20 }
0x12d0   :  { %3563 = vst.msk [vmem:[#allocation2] sm:$0x3] %vm3562_vm3, %v3561_v6 }
0x12d1   :  { %4529 = shalt.err (!%p4526_p4)
}
0x12d2   :  { %3573 = dma.vmem_to_hbm [thread:$0]  %s3571_s21, 32, %s5858_s7, [#allocation3]  }
0x12d3   :  { %4538 = dma.done.wait [#allocation3], 32  }
0x12d4   :  { %4539 = vsyncadd [#allocation3], 4294967264 }
0x12d5   :  { %3577 = vsyncpa [#allocation3], 1 }

</bundles_post_ra>
